<compile_context>
chip_gen: v5e
topology: v5e:2x2
jax: 0.10.0
libtpu: 0.0.40
codegen_flags: <defaults>
</compile_context>

<pallas_src>
import functools

import jax
import jax.numpy as jnp
from jax.experimental import pallas as pl
from jax.experimental.pallas import tpu as pltpu

# Logical (PyTorch) feature sizes.
D_IN = 300
D_H1 = 128
D_H2 = 64
D_ENC = 10
D_ENC_P = 128   # one-time zero pad of the 10-wide bottleneck (w3/b3/w4 only)


def _cdiv(a, b):
    return -(-a // b)


def _round_up(n, m):
    return ((n + m - 1) // m) * m


def _choose_tile(B, max_tile):
    """Batch tile that minimizes padding/partial-block waste.

    B <= max_tile  -> single full-extent block (always a legal block shape).
    B >  max_tile  -> split into ~equal tiles of at most max_tile rows,
                      rounded up to 8 sublanes (f32 input).
    """
    if B <= max_tile:
        return B
    n_steps = _cdiv(B, max_tile)
    return _round_up(_cdiv(B, n_steps), 8)


def _default_act_dtype():
    """bf16 transcendentals on v6e/v7x (bf16 EUP); f32 elsewhere (v5e etc.)."""
    try:
        kind = jax.devices()[0].device_kind.lower()
    except Exception:
        return jnp.float32
    if "v6" in kind or "v7" in kind:
        return jnp.bfloat16
    return jnp.float32


# ----------------------------- Pallas kernel ------------------------------- #
def _autoencoder_kernel(
    x_ref,
    w1_ref, b1_ref, w2_ref, b2_ref, w3_ref, b3_ref,
    w4_ref, b4_ref, w5_ref, b5_ref, w6_ref, b6_ref,
    enc_ref, dec_ref,
    *, act_dtype,
):
    """One batch tile: full encoder+decoder.

    Matmuls take bf16 operands (MXU native rate) and accumulate in f32; bias
    adds stay f32; tanh/sigmoid run in `act_dtype` (bf16 on v6e/v7x, f32 on v5e).
    """
    bf16 = jnp.bfloat16
    f32 = jnp.float32

    x = x_ref[...].astype(bf16)          # (bt, 300); Mosaic pads K internally

    # ---- encoder: Linear(300,128) -> Tanh -> Linear(128,64) -> Tanh -> Linear(64,10)
    h = jnp.dot(x, w1_ref[...], preferred_element_type=f32) + b1_ref[...]
    h = jnp.tanh(h.astype(act_dtype)).astype(bf16)
    h = jnp.dot(h, w2_ref[...], preferred_element_type=f32) + b2_ref[...]
    h = jnp.tanh(h.astype(act_dtype)).astype(bf16)
    # w3/b3 are zero-padded 10 -> 128 lanes, so lanes 10.. of enc_p are exactly 0.
    enc_p = jnp.dot(h, w3_ref[...], preferred_element_type=f32) + b3_ref[...]
    # Store only the 10 logical lanes (masked store; output array is (B, 10)).
    enc_ref[...] = enc_p[:, : enc_ref.shape[-1]].astype(enc_ref.dtype)

    # ---- decoder: Linear(10,64) -> Tanh -> Linear(64,128) -> Tanh -> Linear(128,300) -> Sigmoid
    # enc_p's padded lanes are exactly 0 and w4's padded rows are 0 -> same math.
    h = jnp.dot(enc_p.astype(bf16), w4_ref[...], preferred_element_type=f32) + b4_ref[...]
    h = jnp.tanh(h.astype(act_dtype)).astype(bf16)
    h = jnp.dot(h, w5_ref[...], preferred_element_type=f32) + b5_ref[...]
    h = jnp.tanh(h.astype(act_dtype)).astype(bf16)
    dec = jnp.dot(h, w6_ref[...], preferred_element_type=f32) + b6_ref[...]
    dec_ref[...] = jax.nn.sigmoid(dec.astype(act_dtype)).astype(dec_ref.dtype)


# ------------------------------- wrapper ------------------------------------ #
def prepare_params(params):
    """One-time (outside the jitted forward) weight cast/pad.

    Only the 10-wide bottleneck is padded (w3 cols, b3 cols, w4 rows -> 128),
    all with zeros; every other parameter keeps its natural shape.  Weights are
    bf16 (MXU operands), biases stay f32.
    """
    (w1, b1), (w2, b2), (w3, b3), (w4, b4), (w5, b5), (w6, b6) = params
    bf16 = jnp.bfloat16
    w3_p = jnp.pad(w3, ((0, 0), (0, D_ENC_P - D_ENC)))
    b3_p = jnp.pad(b3, ((0, 0), (0, D_ENC_P - D_ENC)))
    w4_p = jnp.pad(w4, ((0, D_ENC_P - D_ENC), (0, 0)))
    return (
        w1.astype(bf16), b1,
        w2.astype(bf16), b2,
        w3_p.astype(bf16), b3_p,
        w4_p.astype(bf16), b4,
        w5.astype(bf16), b5,
        w6.astype(bf16), b6,
    )


@functools.partial(jax.jit, static_argnames=("batch_tile", "act_dtype"))
def autoencoder_forward(x, prepared_params, *, batch_tile=256, act_dtype=jnp.float32):
    """x: [B, 300] float32.  Returns (encoded [B, 10], decoded [B, 300])."""
    B, d_in = x.shape
    assert d_in == D_IN, "AutoEncoder expects 300 input features"

    # Adaptive batch tile; keep batch_tile <= B/2 on v7x so both TCs get steps.
    # (If switching the input to bf16, round bt up to 16 instead of 8.)
    bt = _choose_tile(B, batch_tile)
    grid = (_cdiv(B, bt),)

    (w1, b1, w2, b2, w3, b3, w4, b4, w5, b5, w6, b6) = prepared_params
    operands = (x, w1, b1, w2, b2, w3, b3, w4, b4, w5, b5, w6, b6)

    def batch_spec(feat):
        # Batch tiled over grid axis 0; last dim is the full array extent
        # (legal even when not a multiple of 128).
        return pl.BlockSpec((bt, feat), lambda i: (i, 0))

    def param_spec(a):
        # Full (small) parameter array; same block every step -> stays in VMEM.
        return pl.BlockSpec(a.shape, lambda i: (0, 0))

    in_specs = [batch_spec(D_IN)] + [param_spec(a) for a in operands[1:]]
    out_specs = [batch_spec(D_ENC), batch_spec(D_IN)]

    # Advisory cost estimate with the real (unpadded) I/O and bf16 param bytes.
    flops_per_row = 2 * (D_IN * D_H1 + D_H1 * D_H2 + D_H2 * D_ENC
                         + D_ENC * D_H2 + D_H2 * D_H1 + D_H1 * D_IN)
    trans_per_row = D_H1 + D_H2 + D_H2 + D_H1 + D_IN
    param_bytes = sum(int(a.size) * a.dtype.itemsize for a in operands[1:])
    io_bytes = B * (2 * D_IN + D_ENC) * x.dtype.itemsize
    cost = pl.CostEstimate(
        flops=B * flops_per_row,
        transcendentals=B * trans_per_row,
        bytes_accessed=io_bytes + param_bytes,
    )

    enc, dec = pl.pallas_call(
        functools.partial(_autoencoder_kernel, act_dtype=act_dtype),
        out_shape=(
            jax.ShapeDtypeStruct((B, D_ENC), x.dtype),
            jax.ShapeDtypeStruct((B, D_IN), x.dtype),
        ),
        grid_spec=pltpu.PrefetchScalarGridSpec(
            num_scalar_prefetch=0,
            grid=grid,
            in_specs=in_specs,
            out_specs=out_specs,
        ),
        compiler_params=pltpu.CompilerParams(
            dimension_semantics=("parallel",),
            vmem_limit_bytes=32 * 1024 * 1024,
        ),
        cost_estimate=cost,
    )(*operands)

    return enc, dec


# -------------------------- parameter construction -------------------------- #
def init_params(key):
    """Deterministic synthetic parameters (PyTorch nn.Linear-style uniform init).

    Each Linear(in, out) gets:
      W: (in, out)   -- already transposed relative to torch's (out, in)
      b: (1, out)
    """
    dims = [(300, 128), (128, 64), (64, 10), (10, 64), (64, 128), (128, 300)]
    params = []
    for (din, dout) in dims:
        key, kw, kb = jax.random.split(key, 3)
        bound = 1.0 / jnp.sqrt(jnp.float32(din))
        w = jax.random.uniform(kw, (din, dout), jnp.float32, -bound, bound)
        b = jax.random.uniform(kb, (1, dout), jnp.float32, -bound, bound)
        params.append((w, b))
    return params


# ------------------------------ reference ----------------------------------- #
def reference_forward(x, params):
    (w1, b1), (w2, b2), (w3, b3), (w4, b4), (w5, b5), (w6, b6) = params
    h = jnp.tanh(x @ w1 + b1)
    h = jnp.tanh(h @ w2 + b2)
    enc = h @ w3 + b3
    h = jnp.tanh(enc @ w4 + b4)
    h = jnp.tanh(h @ w5 + b5)
    dec = jax.nn.sigmoid(h @ w6 + b6)
    return enc, dec


if __name__ == "__main__":
    key = jax.random.PRNGKey(0)
    key, kx = jax.random.split(key)
    params = init_params(key)
    prepped = prepare_params(params)          # one-time pad/cast, outside the jit
    act_dtype = _default_act_dtype()          # bf16 activations on v6e/v7x only

    # Two grid steps of 256 rows -> both v7x TensorCores get work.
    B = 512
    x = jax.random.normal(kx, (B, 300), jnp.float32)
    enc, dec = autoencoder_forward(x, prepped, batch_tile=256, act_dtype=act_dtype)
    jax.block_until_ready((enc, dec))

    enc_ref, dec_ref = reference_forward(x, params)
    assert enc.shape == (B, 10) and dec.shape == (B, 300)
    # bf16 matmul operands (and bf16 activations on v6e/v7x) with f32
    # accumulation -> loose tolerance vs the all-f32 reference.
    assert jnp.allclose(enc, enc_ref, atol=5e-2, rtol=5e-2)
    assert jnp.allclose(dec, dec_ref, atol=5e-2, rtol=5e-2)

    # Small, non-8-multiple batch: the tile clamps to the full batch
    # (single full-extent block, no padding, no slicing).
    B2 = 20
    x2 = jax.random.normal(jax.random.PRNGKey(1), (B2, 300), jnp.float32)
    enc2, dec2 = autoencoder_forward(x2, prepped, act_dtype=act_dtype)
    jax.block_until_ready((enc2, dec2))
    enc2_ref, dec2_ref = reference_forward(x2, params)
    assert enc2.shape == (B2, 10) and dec2.shape == (B2, 300)
    assert jnp.allclose(enc2, enc2_ref, atol=5e-2, rtol=5e-2)
    assert jnp.allclose(dec2, dec2_ref, atol=5e-2, rtol=5e-2)

    print("KERNEL_OK")
</pallas_src>

<mosaic_0001>
module attributes {stable_mosaic.version = 11 : i64} {
  func.func @_autoencoder_kernel(%arg0: i32, %arg1: memref<256x300xf32, #tpu.memory_space<vmem>>, %arg2: memref<300x128xbf16, #tpu.memory_space<vmem>>, %arg3: memref<1x128xf32, #tpu.memory_space<vmem>>, %arg4: memref<128x64xbf16, #tpu.memory_space<vmem>>, %arg5: memref<1x64xf32, #tpu.memory_space<vmem>>, %arg6: memref<64x128xbf16, #tpu.memory_space<vmem>>, %arg7: memref<1x128xf32, #tpu.memory_space<vmem>>, %arg8: memref<128x64xbf16, #tpu.memory_space<vmem>>, %arg9: memref<1x64xf32, #tpu.memory_space<vmem>>, %arg10: memref<64x128xbf16, #tpu.memory_space<vmem>>, %arg11: memref<1x128xf32, #tpu.memory_space<vmem>>, %arg12: memref<128x300xbf16, #tpu.memory_space<vmem>>, %arg13: memref<1x300xf32, #tpu.memory_space<vmem>>, %arg14: memref<256x10xf32, #tpu.memory_space<vmem>>, %arg15: memref<256x300xf32, #tpu.memory_space<vmem>>) attributes {dimension_semantics = [#tpu.dimension_semantics<parallel>], iteration_bounds = array<i64: 2>, scalar_prefetch = 0 : i64, scratch_operands = 0 : i64, tpu.core_type = #tpu.core_type<tc>, window_params = [{transform_indices = @transform_0, window_bounds = array<i64: 256, 300>}, {pipeline_mode = #tpu.pipeline_mode<synchronous>, transform_indices = @transform_1, window_bounds = array<i64: 300, 128>}, {pipeline_mode = #tpu.pipeline_mode<synchronous>, transform_indices = @transform_2, window_bounds = array<i64: 1, 128>}, {pipeline_mode = #tpu.pipeline_mode<synchronous>, transform_indices = @transform_3, window_bounds = array<i64: 128, 64>}, {pipeline_mode = #tpu.pipeline_mode<synchronous>, transform_indices = @transform_4, window_bounds = array<i64: 1, 64>}, {pipeline_mode = #tpu.pipeline_mode<synchronous>, transform_indices = @transform_5, window_bounds = array<i64: 64, 128>}, {pipeline_mode = #tpu.pipeline_mode<synchronous>, transform_indices = @transform_6, window_bounds = array<i64: 1, 128>}, {pipeline_mode = #tpu.pipeline_mode<synchronous>, transform_indices = @transform_7, window_bounds = array<i64: 128, 64>}, {pipeline_mode = #tpu.pipeline_mode<synchronous>, transform_indices = @transform_8, window_bounds = array<i64: 1, 64>}, {pipeline_mode = #tpu.pipeline_mode<synchronous>, transform_indices = @transform_9, window_bounds = array<i64: 64, 128>}, {pipeline_mode = #tpu.pipeline_mode<synchronous>, transform_indices = @transform_10, window_bounds = array<i64: 1, 128>}, {pipeline_mode = #tpu.pipeline_mode<synchronous>, transform_indices = @transform_11, window_bounds = array<i64: 128, 300>}, {pipeline_mode = #tpu.pipeline_mode<synchronous>, transform_indices = @transform_12, window_bounds = array<i64: 1, 300>}, {transform_indices = @transform_13, window_bounds = array<i64: 256, 10>}, {transform_indices = @transform_14, window_bounds = array<i64: 256, 300>}]} {
    %c0 = arith.constant 0 : index
    %c0_0 = arith.constant 0 : index
    %0 = vector.load %arg1[%c0, %c0_0] : memref<256x300xf32, #tpu.memory_space<vmem>>, vector<256x300xf32>
    %1 = arith.truncf %0 : vector<256x300xf32> to vector<256x300xbf16>
    %c0_1 = arith.constant 0 : index
    %c0_2 = arith.constant 0 : index
    %2 = vector.load %arg2[%c0_1, %c0_2] : memref<300x128xbf16, #tpu.memory_space<vmem>>, vector<300x128xbf16>
    %cst = arith.constant dense<0.000000e+00> : vector<256x128xf32>
    %3 = tpu.matmul %1, %2, %cst {dimension_numbers = #tpu.dot_dimension_numbers<[1], [0], [0], [1], [0, 0, 1, 1], [], []>} : vector<256x300xbf16>, vector<300x128xbf16>, vector<256x128xf32> -> vector<256x128xf32>
    %c0_3 = arith.constant 0 : index
    %c0_4 = arith.constant 0 : index
    %4 = vector.load %arg3[%c0_3, %c0_4] : memref<1x128xf32, #tpu.memory_space<vmem>>, vector<1x128xf32>
    %5 = vector.broadcast %4 : vector<1x128xf32> to vector<256x128xf32>
    %6 = arith.addf %3, %5 : vector<256x128xf32>
    %7 = math.tanh %6 : vector<256x128xf32>
    %8 = arith.truncf %7 : vector<256x128xf32> to vector<256x128xbf16>
    %c0_5 = arith.constant 0 : index
    %c0_6 = arith.constant 0 : index
    %9 = vector.load %arg4[%c0_5, %c0_6] : memref<128x64xbf16, #tpu.memory_space<vmem>>, vector<128x64xbf16>
    %cst_7 = arith.constant dense<0.000000e+00> : vector<256x64xf32>
    %10 = tpu.matmul %8, %9, %cst_7 {dimension_numbers = #tpu.dot_dimension_numbers<[1], [0], [0], [1], [0, 0, 1, 1], [], []>} : vector<256x128xbf16>, vector<128x64xbf16>, vector<256x64xf32> -> vector<256x64xf32>
    %c0_8 = arith.constant 0 : index
    %c0_9 = arith.constant 0 : index
    %11 = vector.load %arg5[%c0_8, %c0_9] : memref<1x64xf32, #tpu.memory_space<vmem>>, vector<1x64xf32>
    %12 = vector.broadcast %11 : vector<1x64xf32> to vector<256x64xf32>
    %13 = arith.addf %10, %12 : vector<256x64xf32>
    %14 = math.tanh %13 : vector<256x64xf32>
    %15 = arith.truncf %14 : vector<256x64xf32> to vector<256x64xbf16>
    %c0_10 = arith.constant 0 : index
    %c0_11 = arith.constant 0 : index
    %16 = vector.load %arg6[%c0_10, %c0_11] : memref<64x128xbf16, #tpu.memory_space<vmem>>, vector<64x128xbf16>
    %cst_12 = arith.constant dense<0.000000e+00> : vector<256x128xf32>
    %17 = tpu.matmul %15, %16, %cst_12 {dimension_numbers = #tpu.dot_dimension_numbers<[1], [0], [0], [1], [0, 0, 1, 1], [], []>} : vector<256x64xbf16>, vector<64x128xbf16>, vector<256x128xf32> -> vector<256x128xf32>
    %c0_13 = arith.constant 0 : index
    %c0_14 = arith.constant 0 : index
    %18 = vector.load %arg7[%c0_13, %c0_14] : memref<1x128xf32, #tpu.memory_space<vmem>>, vector<1x128xf32>
    %19 = vector.broadcast %18 : vector<1x128xf32> to vector<256x128xf32>
    %20 = arith.addf %17, %19 : vector<256x128xf32>
    %21 = vector.extract_strided_slice %20 {offsets = [0, 0], sizes = [256, 10], strides = [1, 1]} : vector<256x128xf32> to vector<256x10xf32>
    %c0_15 = arith.constant 0 : index
    %c0_16 = arith.constant 0 : index
    %22 = vector.load %arg14[%c0_15, %c0_16] : memref<256x10xf32, #tpu.memory_space<vmem>>, vector<256x10xf32>
    tpu.vector_store %arg14[%c0_15, %c0_16], %21 {strides = array<i32>} : memref<256x10xf32, #tpu.memory_space<vmem>>, vector<256x10xf32>,
    %23 = arith.truncf %20 : vector<256x128xf32> to vector<256x128xbf16>
    %c0_17 = arith.constant 0 : index
    %c0_18 = arith.constant 0 : index
    %24 = vector.load %arg8[%c0_17, %c0_18] : memref<128x64xbf16, #tpu.memory_space<vmem>>, vector<128x64xbf16>
    %cst_19 = arith.constant dense<0.000000e+00> : vector<256x64xf32>
    %25 = tpu.matmul %23, %24, %cst_19 {dimension_numbers = #tpu.dot_dimension_numbers<[1], [0], [0], [1], [0, 0, 1, 1], [], []>} : vector<256x128xbf16>, vector<128x64xbf16>, vector<256x64xf32> -> vector<256x64xf32>
    %c0_20 = arith.constant 0 : index
    %c0_21 = arith.constant 0 : index
    %26 = vector.load %arg9[%c0_20, %c0_21] : memref<1x64xf32, #tpu.memory_space<vmem>>, vector<1x64xf32>
    %27 = vector.broadcast %26 : vector<1x64xf32> to vector<256x64xf32>
    %28 = arith.addf %25, %27 : vector<256x64xf32>
    %29 = math.tanh %28 : vector<256x64xf32>
    %30 = arith.truncf %29 : vector<256x64xf32> to vector<256x64xbf16>
    %c0_22 = arith.constant 0 : index
    %c0_23 = arith.constant 0 : index
    %31 = vector.load %arg10[%c0_22, %c0_23] : memref<64x128xbf16, #tpu.memory_space<vmem>>, vector<64x128xbf16>
    %cst_24 = arith.constant dense<0.000000e+00> : vector<256x128xf32>
    %32 = tpu.matmul %30, %31, %cst_24 {dimension_numbers = #tpu.dot_dimension_numbers<[1], [0], [0], [1], [0, 0, 1, 1], [], []>} : vector<256x64xbf16>, vector<64x128xbf16>, vector<256x128xf32> -> vector<256x128xf32>
    %c0_25 = arith.constant 0 : index
    %c0_26 = arith.constant 0 : index
    %33 = vector.load %arg11[%c0_25, %c0_26] : memref<1x128xf32, #tpu.memory_space<vmem>>, vector<1x128xf32>
    %34 = vector.broadcast %33 : vector<1x128xf32> to vector<256x128xf32>
    %35 = arith.addf %32, %34 : vector<256x128xf32>
    %36 = math.tanh %35 : vector<256x128xf32>
    %37 = arith.truncf %36 : vector<256x128xf32> to vector<256x128xbf16>
    %c0_27 = arith.constant 0 : index
    %c0_28 = arith.constant 0 : index
    %38 = vector.load %arg12[%c0_27, %c0_28] : memref<128x300xbf16, #tpu.memory_space<vmem>>, vector<128x300xbf16>
    %cst_29 = arith.constant dense<0.000000e+00> : vector<256x300xf32>
    %39 = tpu.matmul %37, %38, %cst_29 {dimension_numbers = #tpu.dot_dimension_numbers<[1], [0], [0], [1], [0, 0, 1, 1], [], []>} : vector<256x128xbf16>, vector<128x300xbf16>, vector<256x300xf32> -> vector<256x300xf32>
    %c0_30 = arith.constant 0 : index
    %c0_31 = arith.constant 0 : index
    %40 = vector.load %arg13[%c0_30, %c0_31] : memref<1x300xf32, #tpu.memory_space<vmem>>, vector<1x300xf32>
    %41 = vector.broadcast %40 : vector<1x300xf32> to vector<256x300xf32>
    %42 = arith.addf %39, %41 : vector<256x300xf32>
    %43 = arith.negf %42 : vector<256x300xf32>
    %44 = math.exp %43 : vector<256x300xf32>
    %cst_32 = arith.constant 1.000000e+00 : f32
    %45 = vector.broadcast %cst_32 : f32 to vector<256x300xf32>
    %46 = arith.addf %45, %44 : vector<256x300xf32>
    %47 = arith.divf %45, %46 : vector<256x300xf32>
    %c0_33 = arith.constant 0 : index
    %c0_34 = arith.constant 0 : index
    %48 = vector.load %arg15[%c0_33, %c0_34] : memref<256x300xf32, #tpu.memory_space<vmem>>, vector<256x300xf32>
    tpu.vector_store %arg15[%c0_33, %c0_34], %47 {strides = array<i32>} : memref<256x300xf32, #tpu.memory_space<vmem>>, vector<256x300xf32>,
    return
  }
  func.func @transform_0(%arg0: i32) -> (i32, i32) {
    %c0_i32 = arith.constant 0 : i32
    %c0_i32_0 = arith.constant 0 : i32
    return %arg0, %c0_i32 : i32, i32
  }
  func.func @transform_1(%arg0: i32) -> (i32, i32) {
    %c0_i32 = arith.constant 0 : i32
    %c0_i32_0 = arith.constant 0 : i32
    %c0_i32_1 = arith.constant 0 : i32
    return %c0_i32, %c0_i32_0 : i32, i32
  }
  func.func @transform_2(%arg0: i32) -> (i32, i32) {
    %c0_i32 = arith.constant 0 : i32
    %c0_i32_0 = arith.constant 0 : i32
    %c0_i32_1 = arith.constant 0 : i32
    return %c0_i32, %c0_i32_0 : i32, i32
  }
  func.func @transform_3(%arg0: i32) -> (i32, i32) {
    %c0_i32 = arith.constant 0 : i32
    %c0_i32_0 = arith.constant 0 : i32
    %c0_i32_1 = arith.constant 0 : i32
    return %c0_i32, %c0_i32_0 : i32, i32
  }
  func.func @transform_4(%arg0: i32) -> (i32, i32) {
    %c0_i32 = arith.constant 0 : i32
    %c0_i32_0 = arith.constant 0 : i32
    %c0_i32_1 = arith.constant 0 : i32
    return %c0_i32, %c0_i32_0 : i32, i32
  }
  func.func @transform_5(%arg0: i32) -> (i32, i32) {
    %c0_i32 = arith.constant 0 : i32
    %c0_i32_0 = arith.constant 0 : i32
    %c0_i32_1 = arith.constant 0 : i32
    return %c0_i32, %c0_i32_0 : i32, i32
  }
  func.func @transform_6(%arg0: i32) -> (i32, i32) {
    %c0_i32 = arith.constant 0 : i32
    %c0_i32_0 = arith.constant 0 : i32
    %c0_i32_1 = arith.constant 0 : i32
    return %c0_i32, %c0_i32_0 : i32, i32
  }
  func.func @transform_7(%arg0: i32) -> (i32, i32) {
    %c0_i32 = arith.constant 0 : i32
    %c0_i32_0 = arith.constant 0 : i32
    %c0_i32_1 = arith.constant 0 : i32
    return %c0_i32, %c0_i32_0 : i32, i32
  }
  func.func @transform_8(%arg0: i32) -> (i32, i32) {
    %c0_i32 = arith.constant 0 : i32
    %c0_i32_0 = arith.constant 0 : i32
    %c0_i32_1 = arith.constant 0 : i32
    return %c0_i32, %c0_i32_0 : i32, i32
  }
  func.func @transform_9(%arg0: i32) -> (i32, i32) {
    %c0_i32 = arith.constant 0 : i32
    %c0_i32_0 = arith.constant 0 : i32
    %c0_i32_1 = arith.constant 0 : i32
    return %c0_i32, %c0_i32_0 : i32, i32
  }
  func.func @transform_10(%arg0: i32) -> (i32, i32) {
    %c0_i32 = arith.constant 0 : i32
    %c0_i32_0 = arith.constant 0 : i32
    %c0_i32_1 = arith.constant 0 : i32
    return %c0_i32, %c0_i32_0 : i32, i32
  }
  func.func @transform_11(%arg0: i32) -> (i32, i32) {
    %c0_i32 = arith.constant 0 : i32
    %c0_i32_0 = arith.constant 0 : i32
    %c0_i32_1 = arith.constant 0 : i32
    return %c0_i32, %c0_i32_0 : i32, i32
  }
  func.func @transform_12(%arg0: i32) -> (i32, i32) {
    %c0_i32 = arith.constant 0 : i32
    %c0_i32_0 = arith.constant 0 : i32
    %c0_i32_1 = arith.constant 0 : i32
    return %c0_i32, %c0_i32_0 : i32, i32
  }
  func.func @transform_13(%arg0: i32) -> (i32, i32) {
    %c0_i32 = arith.constant 0 : i32
    %c0_i32_0 = arith.constant 0 : i32
    return %arg0, %c0_i32 : i32, i32
  }
  func.func @transform_14(%arg0: i32) -> (i32, i32) {
    %c0_i32 = arith.constant 0 : i32
    %c0_i32_0 = arith.constant 0 : i32
    return %arg0, %c0_i32 : i32, i32
  }
}

</mosaic_0001>

<bundles_post_ra>
// kernel: autoencoder_forward.1
= control target key start
LH: loop header
LB: loop body
LE: loop exit
PB: predicated region body
PF: predicated region fallthrough
CT: control target
= control target key end

     0   :  { %s5700_s29 = smov 0   ;;  %s8175_s0 = inlined_call_operand.vmem [shape: f32[512,300], index: 0, kind: input, shape index: {}]   ;;  %s8176_s1 = inlined_call_operand.vmem [shape: bf16[300,128], index: 1, kind: input, shape index: {}]   ;;  %s8177_s2 = inlined_call_operand.vmem [shape: f32[1,128], index: 2, kind: input, shape index: {}]   ;;  %s8178_s3 = inlined_call_operand.vmem [shape: bf16[128,64], index: 3, kind: input, shape index: {}]   ;;  %s8179_s4 = inlined_call_operand.vmem [shape: f32[1,64], index: 4, kind: input, shape index: {}]   ;;  %s8180_s5 = inlined_call_operand.vmem [shape: bf16[64,128], index: 5, kind: input, shape index: {}]   ;;  %s8181_s6 = inlined_call_operand.vmem [shape: f32[1,128], index: 6, kind: input, shape index: {}]   ;;  %s8182_s7 = inlined_call_operand.vmem [shape: bf16[128,64], index: 7, kind: input, shape index: {}]   ;;  %s8183_s8 = inlined_call_operand.vmem [shape: f32[1,64], index: 8, kind: input, shape index: {}]   ;;  %s8184_s9 = inlined_call_operand.vmem [shape: bf16[64,128], index: 9, kind: input, shape index: {}]   ;;  %s8185_s10 = inlined_call_operand.vmem [shape: f32[1,128], index: 10, kind: input, shape index: {}]   ;;  %s8186_s11 = inlined_call_operand.vmem [shape: bf16[128,300], index: 11, kind: input, shape index: {}]   ;;  %s8187_s12 = inlined_call_operand.vmem [shape: f32[1,300], index: 12, kind: input, shape index: {}]   ;;  %s8188_s13 = inlined_call_operand.vmem [shape: f32[512,10], index: 13, kind: output, shape index: {0}]   ;;  %s8189_s14 = inlined_call_operand.vmem [shape: f32[512,300], index: 14, kind: output, shape index: {1}]  }
   0x1 LB: > { %s4459_s30 = sadd.s32 4294967295, %s5623_s29   ;;  %p4463_p0 = scmp.ge.s32.totalorder %s5623_s29, 1  ;;  %s5623_s29 = sphi %s5700_s29, %s25_s29  }
   0x2   : > { %p417_p1 = scmp.lt.s32.totalorder %s5623_s29, 3 }
   0x4   : > { %p418_p2 = pnand %p4463_p0, %p417_p1 }
   0x5   : > { %s4464_s21 = sshll.u32 (!%p418_p2), %s4459_s30, 5 }
   0x6   : > { %421 = sbr.rel (%p418_p2) target bundleno = 1468 (0x5bc), region = 72  ;;  %p471_p3 = scmp.lt.s32.totalorder (!%p418_p2), %s4464_s21, 63 }
   0xb   : > { %v4891_v0 = vld [vmem:[%s8176_s1 + $0x38] sm:$0xff]  ;;  %v4890_v1 = vld [vmem:[%s8176_s1 + $0x30] sm:$0xff]  ;;  %v4889_v2 = vld [vmem:[%s8176_s1 + $0x28] sm:$0xff]  ;;  %s8349_s21 = smov (!%p471_p3, %s4464_s21), 63  ;;  %vm839_vm0 = vcmask 1045504   ;;  %vm790_vm1 = vcmask 359424  }
   0xc   : > { %4951 = vmatpush.bf16.msra.mxu1 %v4891_v0  ;;  %843 = vmatpush.bf16.msra.mxu0 %v4891_v0  ;;  %v4888_v3 = vld [vmem:[%s8176_s1 + $0x20] sm:$0xff]  ;;  %v4887_v4 = vld [vmem:[%s8176_s1 + $0x18] sm:$0xff]  ;;  %v4886_v5 = vld [vmem:[%s8176_s1 + $0x10] sm:$0xff]  ;;  %s4962_s28 = smul.u32 24, %s8349_s21  ;;  %vm1399_vm2 = vcmask 523264   ;;  %s4467_s19 = sshll.u32 %s8349_s21, 3 }
   0xd   : > { %v4885_v6 = vld [vmem:[%s8176_s1 + $0x8] sm:$0xff]  ;;  %v4884_v7 = vld [vmem:[%s8176_s1] sm:$0xff]  ;;  %v4899_v10 = vld [vmem:[%s8176_s1 + $0x78] sm:$0xff]  ;;  %s6128_s26 = scalar_lea.vmem %s8188_s13, %s4467_s19  ;;  %vm1537_vm3 = vcmask 80896  }
   0xe   : > { %s5737_s18 = scalar_lea.vmem %s8175_s0, %s4962_s28  ;;  %v4898_v12 = vld [vmem:[%s8176_s1 + $0x70] sm:$0xff]  ;;  %v4897_v13 = vld [vmem:[%s8176_s1 + $0x68] sm:$0xff]  ;;  %v4896_v17 = vld [vmem:[%s8176_s1 + $0x60] sm:$0xff] }
   0xf   : > { %v539_v8 = vld [vmem:[%s5737_s18 + $0x180] sm:$0xff]  ;;  %v542_v9 = vld [vmem:[%s5737_s18 + $0x198] sm:$0xff]  ;;  %v545_v14 = vld [vmem:[%s5737_s18 + $0x1b0] sm:$0xff] }
  0x10   : > { %4952 = vmatpush.bf16.msra.mxu1 %v4890_v1  ;;  %844 = vmatpush.bf16.msra.mxu0 %v4890_v1  ;;  %v611_v11 = vpack.c.bf16 %v542_v9, %v539_v8  ;;  %v548_v15 = vld [vmem:[%s5737_s18 + $0x1c8] sm:$0xff]  ;;  %v551_v18 = vld [vmem:[%s5737_s18 + $0x1e0] sm:$0xff]  ;;  %v554_v19 = vld [vmem:[%s5737_s18 + $0x1f8] sm:$0xff] }
  0x11   : > { %v614_v16 = vpack.c.bf16 %v548_v15, %v545_v14  ;;  %v617_v20 = vpack.c.bf16 %v554_v19, %v551_v18  ;;  %v4895_v21 = vld [vmem:[%s8176_s1 + $0x58] sm:$0xff]  ;;  %v557_v22 = vld [vmem:[%s5737_s18 + $0x210] sm:$0xff]  ;;  %v560_v23 = vld [vmem:[%s5737_s18 + $0x228] sm:$0xff] }
  0x12   : > { %v620_v24 = vpack.c.bf16 %v560_v23, %v557_v22  ;;  %v4894_v25 = vld [vmem:[%s8176_s1 + $0x50] sm:$0xff]  ;;  %v563_v26 = vld [vmem:[%s5737_s18 + $0x240] sm:$0xff]  ;;  %v566_v27 = vld [vmem:[%s5737_s18 + $0x258] sm:$0xff] }
  0x13   : > { %v623_v28 = vpack.c.bf16 %v566_v27, %v563_v26  ;;  %v4893_v29 = vld [vmem:[%s8176_s1 + $0x48] sm:$0xff]  ;;  %v4544_v30 = vld [vmem:[%s8176_s1 + $0x90] sm:$0xf]  ;;  %v4902_v31 = vld [vmem:[%s8176_s1 + $0x90] sm:$0x30] }
  0x14   : > { %4953 = vmatpush.bf16.msra.mxu1 %v4889_v2  ;;  %845 = vmatpush.bf16.msra.mxu0 %v4889_v2  ;;  %v4545_v32 = vor.u32 %v4902_v31, %v4544_v30  ;;  %v4901_v34 = vld [vmem:[%s8176_s1 + $0x88] sm:$0xff]  ;;  %v569_v35 = vld [vmem:[%s5737_s18 + $0x270] sm:$0xff]  ;;  %v4900_v38 = vld [vmem:[%s8176_s1 + $0x80] sm:$0xff] }
  0x15   : > { %v572_v36 = vld [vmem:[%s5737_s18 + $0x288] sm:$0xff]  ;;  %v4892_v39 = vld [vmem:[%s8176_s1 + $0x40] sm:$0xff]  ;;  %v493_v40 = vld [vmem:[%s5737_s18 + $0x10] sm:$0xff] }
  0x16   : > { %v841_v33 = vsel %vm839_vm0, %v4545_v32, 0  ;;  %v626_v37 = vpack.c.bf16 %v572_v36, %v569_v35  ;;  %v496_v41 = vld [vmem:[%s5737_s18 + $0x28] sm:$0xff]  ;;  %v491_v43 = vld [vmem:[%s5737_s18] sm:$0xff]  ;;  %v494_v44 = vld [vmem:[%s5737_s18 + $0x18] sm:$0xff] }
  0x17   : > { %1026 = vmatpush.bf16.msra.mxu2 %v841_v33  ;;  %4959 = vmatpush.bf16.msra.mxu3 %v841_v33  ;;  %v589_v42 = vpack.c.bf16 %v496_v41, %v493_v40  ;;  %v587_v45 = vpack.c.bf16 %v494_v44, %v491_v43  ;;  %v575_v46 = vld [vmem:[%s5737_s18 + $0x2a0] sm:$0xff]  ;;  %v578_v47 = vld [vmem:[%s5737_s18 + $0x2b8] sm:$0xff]  ;;  %v497_v52 = vld [vmem:[%s5737_s18 + $0x30] sm:$0xff] }
  0x18   : > { %4954 = vmatpush.bf16.msra.mxu1 %v4888_v3  ;;  %846 = vmatpush.bf16.msra.mxu0 %v4888_v3  ;;  %v629_v48 = vpack.c.bf16 %v578_v47, %v575_v46  ;;  %v499_v49 = vld [vmem:[%s5737_s18 + $0x40] sm:$0xff]  ;;  %v502_v50 = vld [vmem:[%s5737_s18 + $0x58] sm:$0xff]  ;;  %v500_v53 = vld [vmem:[%s5737_s18 + $0x48] sm:$0xff] }
  0x19   : > { %v592_v51 = vpack.c.bf16 %v502_v50, %v499_v49  ;;  %v590_v54 = vpack.c.bf16 %v500_v53, %v497_v52  ;;  %v581_v55 = vld [vmem:[%s5737_s18 + $0x2d0] sm:$0xff]  ;;  %v584_v56 = vld [vmem:[%s5737_s18 + $0x2e8] sm:$0xff]  ;;  %v503_v61 = vld [vmem:[%s5737_s18 + $0x60] sm:$0xff] }
  0x1a   : > { %v632_v57 = vpack.c.bf16 %v584_v56, %v581_v55  ;;  %v505_v58 = vld [vmem:[%s5737_s18 + $0x70] sm:$0xff]  ;;  %v508_v59 = vld [vmem:[%s5737_s18 + $0x88] sm:$0xff]  ;;  %v506_v62 = vld [vmem:[%s5737_s18 + $0x78] sm:$0xff] }
  0x1b   : > { %1027 = vmatpush.bf16.msra.mxu2 %v4901_v34  ;;  %4960 = vmatpush.bf16.msra.mxu3 %v4901_v34  ;;  %v595_v60 = vpack.c.bf16 %v508_v59, %v505_v58  ;;  %v593_v63 = vpack.c.bf16 %v506_v62, %v503_v61  ;;  %v547_v0 = vld [vmem:[%s5737_s18 + $0x1c0] sm:$0xff]  ;;  %v550_v1 = vld [vmem:[%s5737_s18 + $0x1d8] sm:$0xff]  ;;  %v492_v3 = vld [vmem:[%s5737_s18 + $0x8] sm:$0xff] }
  0x1c   : > { %4955 = vmatpush.bf16.msra.mxu1 %v4887_v4  ;;  %847 = vmatpush.bf16.msra.mxu0 %v4887_v4  ;;  %v616_v2 = vpack.c.bf16 %v550_v1, %v547_v0  ;;  %v495_v4 = vld [vmem:[%s5737_s18 + $0x20] sm:$0xff]  ;;  %v514_v9 = vld [vmem:[%s5737_s18 + $0xb8] sm:$0xff]  ;;  %v553_v15 = vld [vmem:[%s5737_s18 + $0x1f0] sm:$0xff] }
  0x1d   : > { %v511_v8 = vld [vmem:[%s5737_s18 + $0xa0] sm:$0xff]  ;;  %v498_v18 = vld [vmem:[%s5737_s18 + $0x38] sm:$0xff]  ;;  %v501_v19 = vld [vmem:[%s5737_s18 + $0x50] sm:$0xff] }
  0x1e   : > { %v4909_v22 = vld [vmem:[%s8178_s3 + $0x30] sm:$0xff]  ;;  %v515_v26 = vld [vmem:[%s5737_s18 + $0xc0] sm:$0xff]  ;;  %v518_v27 = vld [vmem:[%s5737_s18 + $0xd8] sm:$0xff] }
  0x1f   : > { %1028 = vmatpush.bf16.msra.mxu2 %v4900_v38  ;;  %4961 = vmatpush.bf16.msra.mxu3 %v4900_v38  ;;  %v517_v23 = vld [vmem:[%s5737_s18 + $0xd0] sm:$0xff]  ;;  %v559_v30 = vld [vmem:[%s5737_s18 + $0x220] sm:$0xff]  ;;  %v562_v31 = vld [vmem:[%s5737_s18 + $0x238] sm:$0xff] }
  0x20   : > { %4956 = vmatpush.bf16.msra.mxu1 %v4886_v5  ;;  %848 = vmatpush.bf16.msra.mxu0 %v4886_v5  ;;  %v588_v5 = vpack.c.bf16 %v495_v4, %v492_v3  ;;  %v622_v32 = vpack.c.bf16 %v562_v31, %v559_v30  ;;  %v504_v33 = vld [vmem:[%s5737_s18 + $0x68] sm:$0xff]  ;;  %v507_v34 = vld [vmem:[%s5737_s18 + $0x80] sm:$0xff]  ;;  %v521_v41 = vld [vmem:[%s5737_s18 + $0xf0] sm:$0xff] }
  0x21   : > { %v594_v35 = vpack.c.bf16 %v507_v34, %v504_v33  ;;  %v523_v38 = vld [vmem:[%s5737_s18 + $0x100] sm:$0xff]  ;;  %v568_v46 = vld [vmem:[%s5737_s18 + $0x268] sm:$0xff]  ;;  %v513_v49 = vld [vmem:[%s5737_s18 + $0xb0] sm:$0xff] }
  0x22   : > { %4546 = vmatmul.msk.bf16.vlgmr.msra.gmra.mxu2 %vm790_vm1, %v589_v42  ;;  %4555 = vmatmul.msk.bf16.vlgmr.msra.gmra.mxu3 %vm790_vm1, %v616_v2  ;;  %v524_v42 = vld [vmem:[%s5737_s18 + $0x108] sm:$0xff]  ;;  %v4907_v52 = vld [vmem:[%s8178_s3 + $0x20] sm:$0xff]  ;;  %v529_v53 = vld [vmem:[%s5737_s18 + $0x130] sm:$0xff] }
  0x23   : > { %v602_v43 = vpack.c.bf16 %v524_v42, %v521_v41  ;;  %v527_v56 = vld [vmem:[%s5737_s18 + $0x120] sm:$0xff]  ;;  %v574_v61 = vld [vmem:[%s5737_s18 + $0x298] sm:$0xff]  ;;  %v516_v0 = vld [vmem:[%s5737_s18 + $0xc8] sm:$0xff] }
  0x24   : > { %4957 = vmatpush.bf16.msra.mxu1 %v4885_v6  ;;  %849 = vmatpush.bf16.msra.mxu0 %v4885_v6  ;;  %v4906_v62 = vld [vmem:[%s8178_s3 + $0x18] sm:$0xff]  ;;  %v519_v1 = vld [vmem:[%s5737_s18 + $0xe0] sm:$0xff]  ;;  %v528_v31 = vld [vmem:[%s5737_s18 + $0x128] sm:$0xff] }
  0x25   : > { %v600_v2 = vpack.c.bf16 %v519_v1, %v516_v0  ;;  %v535_v4 = vld [vmem:[%s5737_s18 + $0x160] sm:$0xff]  ;;  %v534_v41 = vld [vmem:[%s5737_s18 + $0x158] sm:$0xff]  ;;  %v537_v42 = vld [vmem:[%s5737_s18 + $0x170] sm:$0xff] }
  0x28   : > { %4958 = vmatpush.bf16.msra.mxu1 %v4884_v7  ;;  %850 = vmatpush.bf16.msra.mxu0 %v4884_v7  ;;  %v4910_v7 = vld [vmem:[%s8178_s3 + $0x38] sm:$0xff] }
  0x29   : > { %1226 = vmatpush.bf16.msrb.mxu3 %v4910_v7 }
  0x2b   : > { %891 = vmatmul.bf16.vlgmr.msra.gmra.mxu1 %v611_v11  ;;  %851 = vmatmul.bf16.vlgmr.msra.gmra.mxu0 %v587_v45  ;;  %v509_v11 = vld [vmem:[%s5737_s18 + $0x90] sm:$0xff] }
  0x2c   : > { %932 = vmatpush.bf16.msrb.mxu1 %v4899_v10  ;;  %v598_v10 = vpack.c.bf16 %v514_v9, %v511_v8  ;;  %v565_v45 = vld [vmem:[%s5737_s18 + $0x250] sm:$0xff]  ;;  %v536_v9 = vld [vmem:[%s5737_s18 + $0x168] sm:$0xff] }
  0x2d   : > { %1227 = vmatpush.bf16.msrb.mxu3 %v4909_v22  ;;  %v625_v47 = vpack.c.bf16 %v568_v46, %v565_v45  ;;  %v533_v8 = vld [vmem:[%s5737_s18 + $0x150] sm:$0xff]  ;;  %v609_v45 = vpack.c.bf16 %v537_v42, %v534_v41 }
  0x2e   : > { %v541_v22 = vld [vmem:[%s5737_s18 + $0x190] sm:$0xff] }
  0x30   : > { %933 = vmatpush.bf16.msrb.mxu1 %v4898_v12  ;;  %v512_v12 = vld [vmem:[%s5737_s18 + $0xa8] sm:$0xff] }
  0x32   : > { %4547 = vmatmul.msk.bf16.gmra.mxu2 %vm790_vm1, %v592_v51 }
  0x34   : > { %934 = vmatpush.bf16.msrb.mxu1 %v4897_v13  ;;  %v596_v13 = vpack.c.bf16 %v512_v12, %v509_v11  ;;  %v4905_v12 = vld [vmem:[%s8178_s3 + $0x10] sm:$0xff] }
  0x38   : > { %935 = vmatpush.bf16.msrb.mxu1 %v4896_v17 }
  0x3b   : > { %896 = vmatmul.bf16.gmra.mxu1 %v614_v16  ;;  %856 = vmatmul.bf16.gmra.mxu0 %v590_v54  ;;  %v556_v16 = vld [vmem:[%s5737_s18 + $0x208] sm:$0xff] }
  0x3c   : > { %936 = vmatpush.bf16.msrb.mxu1 %v4895_v21  ;;  %v619_v17 = vpack.c.bf16 %v556_v16, %v553_v15  ;;  %v532_v54 = vld [vmem:[%s5737_s18 + $0x148] sm:$0xff] }
  0x3d   : > { %v607_v55 = vpack.c.bf16 %v532_v54, %v529_v53  ;;  %v580_v15 = vld [vmem:[%s5737_s18 + $0x2c8] sm:$0xff]  ;;  %v4914_v54 = vld [vmem:[%s8180_s5 + $0x18] sm:$0xff] }
  0x3e   : > { %4556 = vmatmul.msk.bf16.gmra.mxu3 %vm790_vm1, %v619_v17  ;;  %v522_v17 = vld [vmem:[%s5737_s18 + $0xf8] sm:$0xff]  ;;  %1452 = vmatpush.bf16.msrb.mxu2 %v4914_v54 }
  0x40   : > { %937 = vmatpush.bf16.msrb.mxu1 %v4894_v25 }
  0x42   : > { %4548 = vmatmul.msk.bf16.gmra.mxu2 %vm790_vm1, %v595_v60  ;;  %v571_v60 = vld [vmem:[%s5737_s18 + $0x280] sm:$0xff] }
  0x44   : > { %938 = vmatpush.bf16.msrb.mxu1 %v4893_v29 }
  0x48   : > { %939 = vmatpush.bf16.msrb.mxu1 %v4892_v39  ;;  %v526_v39 = vld [vmem:[%s5737_s18 + $0x118] sm:$0xff] }
  0x49   : > { %v604_v40 = vpack.c.bf16 %v526_v39, %v523_v38 }
  0x4b   : > { %901 = vmatmul.bf16.gmra.mxu1 %v617_v20  ;;  %861 = vmatmul.bf16.gmra.mxu0 %v593_v63  ;;  %v591_v20 = vpack.c.bf16 %v501_v19, %v498_v18  ;;  %v628_v63 = vpack.c.bf16 %v574_v61, %v571_v60  ;;  %v525_v18 = vld [vmem:[%s5737_s18 + $0x110] sm:$0xff] }
  0x4c   : > { %v603_v19 = vpack.c.bf16 %v525_v18, %v522_v17 }
  0x4e   : > { %4557 = vmatmul.msk.bf16.gmra.mxu3 %vm790_vm1, %v622_v32  ;;  %v531_v32 = vld [vmem:[%s5737_s18 + $0x140] sm:$0xff] }
  0x4f   : > { %v606_v34 = vpack.c.bf16 %v531_v32, %v528_v31  ;;  %v552_v32 = vld [vmem:[%s5737_s18 + $0x1e8] sm:$0xff] }
  0x52   : > { %4549 = vmatmul.msk.bf16.gmra.mxu2 %vm790_vm1, %v598_v10  ;;  %v608_v10 = vpack.c.bf16 %v536_v9, %v533_v8  ;;  %v549_v8 = vld [vmem:[%s5737_s18 + $0x1d0] sm:$0xff] }
  0x5b   : > { %906 = vmatmul.bf16.gmra.mxu1 %v620_v24  ;;  %866 = vmatmul.bf16.gmra.mxu0 %v596_v13  ;;  %v520_v24 = vld [vmem:[%s5737_s18 + $0xe8] sm:$0xff]  ;;  %v577_v13 = vld [vmem:[%s5737_s18 + $0x2b0] sm:$0xff] }
  0x5c   : > { %v601_v25 = vpack.c.bf16 %v520_v24, %v517_v23  ;;  %v631_v16 = vpack.c.bf16 %v580_v15, %v577_v13  ;;  %v544_v23 = vld [vmem:[%s5737_s18 + $0x1a8] sm:$0xff] }
  0x5d   : > { %v613_v24 = vpack.c.bf16 %v544_v23, %v541_v22 }
  0x5e   : > { %4558 = vmatmul.msk.bf16.gmra.mxu3 %vm790_vm1, %v625_v47 }
  0x62   : > { %4550 = vmatmul.msk.bf16.gmra.mxu2 %vm790_vm1, %v601_v25 }
  0x6b   : > { %911 = vmatmul.bf16.gmra.mxu1 %v623_v28  ;;  %v599_v28 = vpack.c.bf16 %v518_v27, %v515_v26  ;;  %v4904_v26 = vld [vmem:[%s8178_s3 + $0x8] sm:$0xff]  ;;  %v583_v27 = vld [vmem:[%s5737_s18 + $0x2e0] sm:$0xff] }
  0x6d   : > { %871 = vmatmul.bf16.gmra.mxu0 %v599_v28  ;;  %v586_v28 = vld [vmem:[%s5737_s18 + $0x2f8] sm:$0xff] }
  0x6e   : > { %4559 = vmatmul.msk.bf16.gmra.mxu3 %vm790_vm1, %v628_v63  ;;  %v634_v30 = vpack.c.bf16 %v586_v28, %v583_v27 }
  0x72   : > { %4551 = vmatmul.msk.bf16.gmra.mxu2 %vm790_vm1, %v604_v40 }
  0x7b   : > { %916 = vmatmul.bf16.gmra.mxu1 %v626_v37  ;;  %v4908_v37 = vld [vmem:[%s8178_s3 + $0x28] sm:$0xff] }
  0x7c   : > { %1228 = vmatpush.bf16.msrb.mxu3 %v4908_v37 }
  0x7d   : > { %876 = vmatmul.bf16.gmra.mxu0 %v602_v43  ;;  %v4903_v43 = vld [vmem:[%s8178_s3] sm:$0xff] }
  0x7e   : > { %4560 = vmatmul.msk.bf16.gmra.mxu3 %vm790_vm1, %v631_v16 }
  0x80   : > { %1229 = vmatpush.bf16.msrb.mxu3 %v4907_v52  ;;  %v543_v52 = vld [vmem:[%s5737_s18 + $0x1a0] sm:$0xff] }
  0x82   : > { %4552 = vmatmul.msk.bf16.gmra.mxu2 %vm790_vm1, %v607_v55  ;;  %v5938_v55 = vld [vmem:[%s8177_s2] ss:$0 sm:$0xff] }
  0x84   : > { %1230 = vmatpush.bf16.msrb.mxu3 %v4906_v62 }
  0x88   : > { %1231 = vmatpush.bf16.msrb.mxu3 %v4905_v12 }
  0x8b   : > { %921 = vmatmul.bf16.gmra.mxu1 %v629_v48  ;;  %v510_v48 = vld [vmem:[%s5737_s18 + $0x98] sm:$0xff] }
  0x8c   : > { %v597_v50 = vpack.c.bf16 %v513_v49, %v510_v48  ;;  %1232 = vmatpush.bf16.msrb.mxu3 %v4904_v26 }
  0x8e   : > { %4561 = vmatmul.msk.bf16.gmra.mxu3 %vm790_vm1, %v634_v30 }
  0x90   : > { %1233 = vmatpush.bf16.msrb.mxu3 %v4903_v43 }
  0x9b   : > { %926 = vmatmul.bf16.gmra.mxu1 %v632_v57  ;;  %v530_v57 = vld [vmem:[%s5737_s18 + $0x138] sm:$0xff] }
  0x9c   : > { %v605_v58 = vpack.c.bf16 %v530_v57, %v527_v56 }
  0x9e   : > { %881 = vmatmul.bf16.gmra.mxu0 %v605_v58 }
  0xa5   : > { %v1030_v37 = vpop.f32.mrf.mxu2 }
  0xa8   : > { %v5814_v6 = vpop.f32.mrf.mxu1  ;;  %v852_v33 = vpop.f32.mrf.mxu0 }
  0xa9   : > { %v853_v58 = vadd.f32 %v5938_v55, %v852_v33  ;;  %v555_v33 = vld [vmem:[%s5737_s18 + $0x200] sm:$0xff] }
  0xab   : > { %940 = vmatmul.bf16.vlgmr.msrb.gmra.mxu1 %v588_v5  ;;  %v538_v5 = vld [vmem:[%s5737_s18 + $0x178] sm:$0xff] }
  0xac   : > { %v610_v7 = vpack.c.bf16 %v538_v5, %v535_v4 }
  0xad   : > { %v1032_v40 = vpop.f32.mrf.mxu2 }
  0xae   : > { %4553 = vmatmul.msk.bf16.gmra.mxu2 %vm790_vm1, %v610_v7  ;;  %886 = vmatmul.bf16.gmra.mxu0 %v608_v10  ;;  %v546_v7 = vld [vmem:[%s5737_s18 + $0x1b8] sm:$0xff]  ;;  %v5944_v10 = vpop.f32.mrf.mxu3 }
  0xaf   : > { %v615_v9 = vpack.c.bf16 %v549_v8, %v546_v7 }
  0xb0   : > { %v5824_v14 = vpop.f32.mrf.mxu1  ;;  %v854_v39 = vpop.f32.mrf.mxu0 }
  0xb1   : > { %v855_v63 = vadd.f32 %v5938_v55, %v854_v39 }
  0xb5   : > { %v1035_v48 = vpop.f32.mrf.mxu2 }
  0xb6   : > { %v5948_v28 = vpop.f32.mrf.mxu3 }
  0xb8   : > { %v5831_v21 = vpop.f32.mrf.mxu1  ;;  %v857_v47 = vpop.f32.mrf.mxu0 }
  0xb9   : > { %v858_v12 = vadd.f32 %v5938_v55, %v857_v47 }
  0xbb   : > { %945 = vmatmul.bf16.gmra.mxu1 %v591_v20 }
  0xbd   : > { %v1037_v56 = vpop.f32.mrf.mxu2 }
  0xbe   : > { %4554 = vmatmul.msk.bf16.gmra.mxu2 %vm790_vm1, %v613_v24 }
  0xc0   : > { %v5841_v29 = vpop.f32.mrf.mxu1  ;;  %v859_v53 = vpop.f32.mrf.mxu0 }
  0xc1   : > { %v860_v23 = vadd.f32 %v5938_v55, %v859_v53  ;;  %v5953_v43 = vpop.f32.mrf.mxu3 }
  0xc8   : > { %v5848_v36 = vpop.f32.mrf.mxu1  ;;  %v862_v62 = vpop.f32.mrf.mxu0 }
  0xc9   : > { %v863_v39 = vadd.f32 %v5938_v55, %v862_v62  ;;  %v5961_v62 = vpop.f32.mrf.mxu3 }
  0xcb   : > { %950 = vmatmul.bf16.gmra.mxu1 %v594_v35 }
  0xd0   : > { %v5858_v44 = vpop.f32.mrf.mxu1  ;;  %v864_v15 = vpop.f32.mrf.mxu0 }
  0xd1   : > { %v865_v53 = vadd.f32 %v5938_v55, %v864_v15 }
  0xd8   : > { %v5865_v51 = vpop.f32.mrf.mxu1  ;;  %v867_v30 = vpop.f32.mrf.mxu0 }
  0xdb   : > { %955 = vmatmul.bf16.gmra.mxu1 %v597_v50  ;;  %v540_v50 = vld [vmem:[%s5737_s18 + $0x188] sm:$0xff] }
  0xdc   : > { %v612_v57 = vpack.c.bf16 %v543_v52, %v540_v50  ;;  %v4913_v50 = vld [vmem:[%s8180_s5 + $0x10] sm:$0xff] }
  0xdd   : > { %1453 = vmatpush.bf16.msrb.mxu2 %v4913_v50 }
  0xe0   : > { %v5875_v59 = vpop.f32.mrf.mxu1 }
  0xe8   : > { %v5885_v3 = vpop.f32.mrf.mxu1 }
  0xeb   : > { %960 = vmatmul.bf16.gmra.mxu1 %v600_v2  ;;  %v1040_v2 = vpop.f32.mrf.mxu2 }
  0xf0   : > { %v5892_v11 = vpop.f32.mrf.mxu1 }
  0xf3   : > { %v1042_v17 = vpop.f32.mrf.mxu2 }
  0xf8   : > { %v5902_v20 = vpop.f32.mrf.mxu1 }
  0xfb   : > { %965 = vmatmul.bf16.gmra.mxu1 %v603_v19 }
 0x100   : > { %v5907_v25 = vpop.f32.mrf.mxu1 }
 0x108   : > { %v5917_v35 = vpop.f32.mrf.mxu1 }
 0x10b   : > { %970 = vmatmul.bf16.gmra.mxu1 %v606_v34  ;;  %v1045_v34 = vpop.f32.mrf.mxu2 }
 0x110   : > { %v5919_v38 = vpop.f32.mrf.mxu1 }
 0x113   : > { %v1047_v52 = vpop.f32.mrf.mxu2 }
 0x118   : > { %v5926_v46 = vpop.f32.mrf.mxu1 }
 0x11b   : > { %975 = vmatmul.bf16.gmra.mxu1 %v609_v45 }
 0x120   : > { %v5928_v49 = vpop.f32.mrf.mxu1 }
 0x128   : > { %v941_v60 = vpop.f32.mrf.mxu1 }
 0x129   : > { %v942_v61 = vadd.f32 %v941_v60, %v853_v58  ;;  %v558_v60 = vld [vmem:[%s5737_s18 + $0x218] sm:$0xff] }
 0x12b   : > { %980 = vmatmul.bf16.gmra.mxu1 %v612_v57  ;;  %v1031_v0 = vadd.f32 %v1030_v37, %v942_v61  ;;  %v618_v37 = vpack.c.bf16 %v555_v33, %v552_v32  ;;  %v561_v61 = vld [vmem:[%s5737_s18 + $0x230] sm:$0xff] }
 0x12d   : > { %4976 = vtanh.f32 %v1031_v0  ;;  %v621_v0 = vpack.c.bf16 %v561_v61, %v558_v60 }
 0x130   : > { %v943_v1 = vpop.f32.mrf.mxu1 }
 0x131   : > { %v944_v4 = vadd.f32 %v943_v1, %v855_v63  ;;  %v868_v1 = vadd.f32 %v5938_v55, %v867_v30 }
 0x133   : > { %v1033_v5 = vadd.f32 %v1032_v40, %v944_v4  ;;  %v4977_v16 = vpop.eup %4976 }
 0x135   : > { %4978 = vtanh.f32 %v1033_v5  ;;  %v1050_v5 = vpop.f32.mrf.mxu2 }
 0x138   : > { %v946_v13 = vpop.f32.mrf.mxu1 }
 0x139   : > { %v947_v19 = vadd.f32 %v946_v13, %v858_v12  ;;  %v5965_v13 = vpop.f32.mrf.mxu3 }
 0x13b   : > { %v4979_v18 = vpop.eup %4978  ;;  %985 = vmatmul.bf16.gmra.mxu1 %v615_v9  ;;  %v1036_v24 = vadd.f32 %v1035_v48, %v947_v19  ;;  %v869_v48 = vpop.f32.mrf.mxu0 }
 0x13c   : > { %v1142_v22 = vpack.c.bf16 %v4979_v18, %v4977_v16  ;;  %v870_v12 = vadd.f32 %v5938_v55, %v869_v48 }
 0x13d   : > { %4980 = vtanh.f32 %v1036_v24  ;;  %v1052_v19 = vpop.f32.mrf.mxu2  ;;  %v567_v24 = vld [vmem:[%s5737_s18 + $0x260] sm:$0xff] }
 0x13e   : > { %1234 = vmatmul.bf16.vlgmr.msrb.gmra.mxu3 %v1142_v22 }
 0x140   : > { %v948_v26 = vpop.f32.mrf.mxu1 }
 0x141   : > { %v949_v27 = vadd.f32 %v948_v26, %v860_v23  ;;  %v564_v23 = vld [vmem:[%s5737_s18 + $0x248] sm:$0xff] }
 0x142   : > { %v624_v26 = vpack.c.bf16 %v567_v24, %v564_v23 }
 0x143   : > { %v1038_v31 = vadd.f32 %v1037_v56, %v949_v27  ;;  %v4981_v41 = vpop.eup %4980  ;;  %v872_v63 = vpop.f32.mrf.mxu0 }
 0x144   : > { %v873_v27 = vadd.f32 %v5938_v55, %v872_v63 }
 0x145   : > { %4982 = vtanh.f32 %v1038_v31  ;;  %v5970_v31 = vpop.f32.mrf.mxu3 }
 0x148   : > { %v951_v40 = vpop.f32.mrf.mxu1 }
 0x149   : > { %v952_v45 = vadd.f32 %v951_v40, %v863_v39  ;;  %v1055_v40 = vpop.f32.mrf.mxu2 }
 0x14b   : > { %v4983_v42 = vpop.eup %4982  ;;  %990 = vmatmul.bf16.gmra.mxu1 %v618_v37  ;;  %v1041_v54 = vadd.f32 %v1040_v2, %v952_v45 }
 0x14c   : > { %v1143_v47 = vpack.c.bf16 %v4983_v42, %v4981_v41  ;;  %v4912_v41 = vld [vmem:[%s8180_s5 + $0x8] sm:$0xff] }
 0x14d   : > { %4984 = vtanh.f32 %v1041_v54  ;;  %1454 = vmatpush.bf16.msrb.mxu2 %v4912_v41  ;;  %v570_v54 = vld [vmem:[%s5737_s18 + $0x278] sm:$0xff] }
 0x14e   : > { %1239 = vmatmul.bf16.gmra.mxu3 %v1143_v47 }
 0x150   : > { %v953_v56 = vpop.f32.mrf.mxu1 }
 0x151   : > { %v954_v57 = vadd.f32 %v953_v56, %v865_v53  ;;  %v573_v56 = vld [vmem:[%s5737_s18 + $0x290] sm:$0xff] }
 0x153   : > { %v1043_v58 = vadd.f32 %v1042_v17, %v954_v57  ;;  %v4985_v7 = vpop.eup %4984  ;;  %v874_v17 = vpop.f32.mrf.mxu0 }
 0x154   : > { %v875_v42 = vadd.f32 %v5938_v55, %v874_v17  ;;  %v1057_v57 = vpop.f32.mrf.mxu2  ;;  %v576_v17 = vld [vmem:[%s5737_s18 + $0x2a8] sm:$0xff] }
 0x155   : > { %4986 = vtanh.f32 %v1043_v58  ;;  %v627_v58 = vpack.c.bf16 %v573_v56, %v570_v54  ;;  %v4911_v54 = vld [vmem:[%s8180_s5] sm:$0xff] }
 0x156   : > { %1455 = vmatpush.bf16.msrb.mxu2 %v4911_v54 }
 0x158   : > { %v956_v4 = vpop.f32.mrf.mxu1 }
 0x159   : > { %v957_v2 = vadd.f32 %v956_v4, %v868_v1 }
 0x15b   : > { %v4987_v8 = vpop.eup %4986  ;;  %995 = vmatmul.bf16.gmra.mxu1 %v621_v0  ;;  %v1046_v15 = vadd.f32 %v1045_v34, %v957_v2  ;;  %v877_v33 = vpop.f32.mrf.mxu0 }
 0x15c   : > { %v1144_v9 = vpack.c.bf16 %v4987_v8, %v4985_v7  ;;  %v878_v60 = vadd.f32 %v5938_v55, %v877_v33 }
 0x15d   : > { %4988 = vtanh.f32 %v1046_v15 }
 0x15e   : > { %1244 = vmatmul.bf16.gmra.mxu3 %v1144_v9 }
 0x160   : > { %v958_v16 = vpop.f32.mrf.mxu1 }
 0x161   : > { %v959_v18 = vadd.f32 %v958_v16, %v870_v12  ;;  %v1060_v12 = vpop.f32.mrf.mxu2 }
 0x163   : > { %v1048_v22 = vadd.f32 %v1047_v52, %v959_v18  ;;  %v4989_v32 = vpop.eup %4988  ;;  %v5976_v52 = vpop.f32.mrf.mxu3  ;;  %v579_v18 = vld [vmem:[%s5737_s18 + $0x2c0] sm:$0xff] }
 0x164   : > { %v879_v53 = vpop.f32.mrf.mxu0 }
 0x165   : > { %4990 = vtanh.f32 %v1048_v22  ;;  %v880_v8 = vadd.f32 %v5938_v55, %v879_v53  ;;  %v630_v22 = vpack.c.bf16 %v579_v18, %v576_v17  ;;  %v585_v53 = vld [vmem:[%s5737_s18 + $0x2f0] sm:$0xff] }
 0x168   : > { %v961_v30 = vpop.f32.mrf.mxu1 }
 0x169   : > { %v962_v34 = vadd.f32 %v961_v30, %v873_v27  ;;  %v1062_v30 = vpop.f32.mrf.mxu2 }
 0x16b   : > { %v4991_v37 = vpop.eup %4990  ;;  %1000 = vmatmul.bf16.gmra.mxu1 %v624_v26  ;;  %v1051_v45 = vadd.f32 %v1050_v5, %v962_v34  ;;  %v5981_v5 = vpop.f32.mrf.mxu3 }
 0x16c   : > { %v1145_v39 = vpack.c.bf16 %v4991_v37, %v4989_v32  ;;  %v882_v7 = vpop.f32.mrf.mxu0 }
 0x16d   : > { %4992 = vtanh.f32 %v1051_v45  ;;  %v883_v23 = vadd.f32 %v5938_v55, %v882_v7 }
 0x16e   : > { %1249 = vmatmul.bf16.gmra.mxu3 %v1145_v39 }
 0x170   : > { %v963_v47 = vpop.f32.mrf.mxu1 }
 0x171   : > { %v964_v48 = vadd.f32 %v963_v47, %v875_v42 }
 0x173   : > { %v1053_v50 = vadd.f32 %v1052_v19, %v964_v48  ;;  %v4993_v63 = vpop.eup %4992  ;;  %v5986_v19 = vpop.f32.mrf.mxu3 }
 0x174   : > { %v884_v24 = vpop.f32.mrf.mxu0  ;;  %v1065_v48 = vpop.f32.mrf.mxu2 }
 0x175   : > { %4994 = vtanh.f32 %v1053_v50  ;;  %v885_v34 = vadd.f32 %v5938_v55, %v884_v24  ;;  %v582_v50 = vld [vmem:[%s5737_s18 + $0x2d8] sm:$0xff]  ;;  %s6529_s18 = scalar_lea.vmem %s8189_s14, %s4962_s28 }
 0x176   : > { %v633_v56 = vpack.c.bf16 %v585_v53, %v582_v50 }
 0x178   : > { %v966_v61 = vpop.f32.mrf.mxu1 }
 0x179   : > { %v967_v1 = vadd.f32 %v966_v61, %v878_v60 }
 0x17b   : > { %v4995_v0 = vpop.eup %4994  ;;  %1005 = vmatmul.bf16.gmra.mxu1 %v627_v58  ;;  %v1056_v2 = vadd.f32 %v1055_v40, %v967_v1  ;;  %v5990_v42 = vpop.f32.mrf.mxu3 }
 0x17c   : > { %v1146_v4 = vpack.c.bf16 %v4995_v0, %v4993_v63  ;;  %v887_v45 = vpop.f32.mrf.mxu0  ;;  %v1067_v7 = vpop.f32.mrf.mxu2 }
 0x17d   : > { %4996 = vtanh.f32 %v1056_v2 }
 0x17e   : > { %1254 = vmatmul.bf16.gmra.mxu3 %v1146_v4 }
 0x180   : > { %v968_v9 = vpop.f32.mrf.mxu1 }
 0x181   : > { %v969_v15 = vadd.f32 %v968_v9, %v880_v8 }
 0x183   : > { %v1058_v16 = vadd.f32 %v1057_v57, %v969_v15  ;;  %v4997_v27 = vpop.eup %4996  ;;  %v888_v57 = vadd.f32 %v5938_v55, %v887_v45  ;;  %v5998_v63 = vpop.f32.mrf.mxu3 }
 0x184   : > { %v889_v0 = vpop.f32.mrf.mxu0  ;;  %v1070_v17 = vpop.f32.mrf.mxu2 }
 0x185   : > { %4998 = vtanh.f32 %v1058_v16  ;;  %v890_v8 = vadd.f32 %v5938_v55, %v889_v0 }
 0x188   : > { %v971_v26 = vpop.f32.mrf.mxu1 }
 0x189   : > { %v972_v33 = vadd.f32 %v971_v26, %v883_v23  ;;  %v893_v23 = vadd.f32 %v5938_v55, %v5814_v6 }
 0x18b   : > { %v4999_v32 = vpop.eup %4998  ;;  %1010 = vmatmul.bf16.gmra.mxu1 %v630_v22  ;;  %v1061_v39 = vadd.f32 %v1060_v12, %v972_v33  ;;  %v6001_v16 = vpop.f32.mrf.mxu3 }
 0x18c   : > { %v1147_v37 = vpack.c.bf16 %v4999_v32, %v4997_v27 }
 0x18d   : > { %5000 = vtanh.f32 %v1061_v39  ;;  %v1072_v39 = vpop.f32.mrf.mxu2 }
 0x18e   : > { %1259 = vmatmul.bf16.gmra.mxu3 %v1147_v37 }
 0x190   : > { %v973_v40 = vpop.f32.mrf.mxu1 }
 0x191   : > { %v974_v41 = vadd.f32 %v973_v40, %v885_v34 }
 0x193   : > { %v1063_v47 = vadd.f32 %v1062_v30, %v974_v41  ;;  %v5001_v60 = vpop.eup %5000  ;;  %v895_v30 = vadd.f32 %v5938_v55, %v5824_v14  ;;  %v6007_v32 = vpop.f32.mrf.mxu3  ;;  %v900_v14 = vadd.f32 %v5938_v55, %v5841_v29 }
 0x195   : > { %5002 = vtanh.f32 %v1063_v47  ;;  %v898_v47 = vadd.f32 %v5938_v55, %v5831_v21  ;;  %v4922_v21 = vld [vmem:[%s8182_s7 + $0x38] sm:$0xff] }
 0x196   : > { %1654 = vmatpush.bf16.msrb.mxu0 %v4922_v21 }
 0x198   : > { %v976_v58 = vpop.f32.mrf.mxu1 }
 0x199   : > { %v977_v1 = vadd.f32 %v976_v58, %v888_v57 }
 0x19b   : > { %v5003_v61 = vpop.eup %5002  ;;  %1015 = vmatmul.bf16.gmra.mxu1 %v633_v56  ;;  %v1066_v2 = vadd.f32 %v1065_v48, %v977_v1  ;;  %v6009_v45 = vpop.f32.mrf.mxu3 }
 0x19c   : > { %v1148_v4 = vpack.c.bf16 %v5003_v61, %v5001_v60  ;;  %v6020_v61 = vld [vmem:[%s8179_s4] ss:$0 sm:$0xff] }
 0x19d   : > { %5004 = vtanh.f32 %v1066_v2 }
 0x19e   : > { %1264 = vmatmul.bf16.gmra.mxu3 %v1148_v4 }
 0x1a0   : > { %v978_v9 = vpop.f32.mrf.mxu1 }
 0x1a1   : > { %v979_v12 = vadd.f32 %v978_v9, %v890_v8  ;;  %v905_v9 = vadd.f32 %v5938_v55, %v5858_v44  ;;  %v4926_v44 = vld [vmem:[%s8184_s9 + $0x18] sm:$0xff] }
 0x1a2   : > { %1879 = vmatpush.bf16.msra.mxu1 %v4926_v44 }
 0x1a3   : > { %v1068_v15 = vadd.f32 %v1067_v7, %v979_v12  ;;  %v5005_v22 = vpop.eup %5004 }
 0x1a5   : > { %5006 = vtanh.f32 %v1068_v15 }
 0x1a8   : > { %v981_v18 = vpop.f32.mrf.mxu1 }
 0x1a9   : > { %v982_v26 = vadd.f32 %v981_v18, %v893_v23 }
 0x1ab   : > { %v5007_v24 = vpop.eup %5006  ;;  %v1071_v33 = vadd.f32 %v1070_v17, %v982_v26  ;;  %v4921_v26 = vld [vmem:[%s8182_s7 + $0x30] sm:$0xff] }
 0x1ac   : > { %v1149_v27 = vpack.c.bf16 %v5007_v24, %v5005_v22  ;;  %1655 = vmatpush.bf16.msrb.mxu0 %v4921_v26 }
 0x1ad   : > { %5008 = vtanh.f32 %v1071_v33  ;;  %v908_v33 = vadd.f32 %v5938_v55, %v5865_v51 }
 0x1ae   : > { %1269 = vmatmul.bf16.gmra.mxu3 %v1149_v27 }
 0x1b0   : > { %v983_v37 = vpop.f32.mrf.mxu1 }
 0x1b1   : > { %v984_v34 = vadd.f32 %v983_v37, %v895_v30 }
 0x1b3   : > { %v1073_v40 = vadd.f32 %v1072_v39, %v984_v34  ;;  %v5009_v6 = vpop.eup %5008 }
 0x1b5   : > { %5010 = vtanh.f32 %v1073_v40 }
 0x1b8   : > { %v986_v41 = vpop.f32.mrf.mxu1 }
 0x1b9   : > { %v987_v50 = vadd.f32 %v986_v41, %v898_v47  ;;  %v910_v41 = vadd.f32 %v5938_v55, %v5875_v59 }
 0x1bb   : > { %v5011_v48 = vpop.eup %5010  ;;  %v1076_v54 = vadd.f32 %v5944_v10, %v987_v50 }
 0x1bc   : > { %v1150_v53 = vpack.c.bf16 %v5011_v48, %v5009_v6 }
 0x1bd   : > { %5012 = vtanh.f32 %v1076_v54 }
 0x1be   : > { %1274 = vmatmul.bf16.gmra.mxu3 %v1150_v53 }
 0x1c0   : > { %v988_v56 = vpop.f32.mrf.mxu1 }
 0x1c1   : > { %v989_v57 = vadd.f32 %v988_v56, %v900_v14  ;;  %v1235_v58 = vpop.f32.mrf.mxu3  ;;  %v4920_v56 = vld [vmem:[%s8182_s7 + $0x28] sm:$0xff] }
 0x1c2   : > { %v1236_v29 = vadd.f32 %v6020_v61, %v1235_v58  ;;  %1656 = vmatpush.bf16.msrb.mxu0 %v4920_v56 }
 0x1c3   : > { %v1078_v60 = vadd.f32 %v5948_v28, %v989_v57  ;;  %v5013_v1 = vpop.eup %5012  ;;  %v903_v28 = vadd.f32 %v5938_v55, %v5848_v36 }
 0x1c5   : > { %5014 = vtanh.f32 %v1078_v60  ;;  %v913_v60 = vadd.f32 %v5938_v55, %v5885_v3 }
 0x1c6   : > { %5016 = vtanh.f32 %v1236_v29 }
 0x1c8   : > { %v991_v10 = vpop.f32.mrf.mxu1 }
 0x1c9   : > { %v1237_v0 = vpop.f32.mrf.mxu3  ;;  %v992_v8 = vadd.f32 %v991_v10, %v903_v28 }
 0x1ca   : > { %v1238_v4 = vadd.f32 %v6020_v61, %v1237_v0  ;;  %v915_v0 = vadd.f32 %v5938_v55, %v5892_v11 }
 0x1cb   : > { %v5015_v7 = vpop.eup %5014  ;;  %v1081_v12 = vadd.f32 %v5953_v43, %v992_v8 }
 0x1cc   : > { %5018 = vtanh.f32 %v1238_v4  ;;  %v1151_v2 = vpack.c.bf16 %v5015_v7, %v5013_v1  ;;  %v5017_v17 = vpop.eup %5016 }
 0x1cd   : > { %5020 = vtanh.f32 %v1081_v12  ;;  %v4919_v12 = vld [vmem:[%s8182_s7 + $0x20] sm:$0xff] }
 0x1ce   : > { %1279 = vmatmul.bf16.gmra.mxu3 %v1151_v2  ;;  %1657 = vmatpush.bf16.msrb.mxu0 %v4919_v12 }
 0x1d0   : > { %v993_v15 = vpop.f32.mrf.mxu1 }
 0x1d1   : > { %v994_v18 = vadd.f32 %v993_v15, %v905_v9  ;;  %v1240_v22 = vpop.f32.mrf.mxu3 }
 0x1d2   : > { %v5019_v23 = vpop.eup %5018  ;;  %v1241_v43 = vadd.f32 %v6020_v61, %v1240_v22 }
 0x1d3   : > { %v1083_v36 = vadd.f32 %v5961_v62, %v994_v18  ;;  %v1347_v24 = vpack.c.bf16 %v5019_v23, %v5017_v17  ;;  %v5021_v62 = vpop.eup %5020  ;;  %v918_v18 = vadd.f32 %v5938_v55, %v5902_v20 }
 0x1d5   : > { %5022 = vtanh.f32 %v1083_v36  ;;  %4610 = vmatmul.msk.bf16.vlgmr.msrb.gmra.mxu2 %vm1399_vm2, %v1347_v24  ;;  %v920_v24 = vadd.f32 %v5938_v55, %v5907_v25 }
 0x1d6   : > { %5024 = vtanh.f32 %v1241_v43 }
 0x1d8   : > { %v996_v27 = vpop.f32.mrf.mxu1 }
 0x1d9   : > { %v1242_v30 = vpop.f32.mrf.mxu3  ;;  %v997_v39 = vadd.f32 %v996_v27, %v908_v33 }
 0x1da   : > { %v1243_v37 = vadd.f32 %v6020_v61, %v1242_v30 }
 0x1db   : > { %v5023_v34 = vpop.eup %5022  ;;  %v1086_v6 = vadd.f32 %v5965_v13, %v997_v39 }
 0x1dc   : > { %5026 = vtanh.f32 %v1243_v37  ;;  %v1152_v40 = vpack.c.bf16 %v5023_v34, %v5021_v62  ;;  %v5025_v48 = vpop.eup %5024  ;;  %v4918_v37 = vld [vmem:[%s8182_s7 + $0x18] sm:$0xff] }
 0x1dd   : > { %5028 = vtanh.f32 %v1086_v6  ;;  %1658 = vmatpush.bf16.msrb.mxu0 %v4918_v37 }
 0x1de   : > { %1284 = vmatmul.bf16.gmra.mxu3 %v1152_v40  ;;  %v923_v40 = vadd.f32 %v5938_v55, %v5917_v35 }
 0x1e0   : > { %v998_v47 = vpop.f32.mrf.mxu1 }
 0x1e1   : > { %v999_v50 = vadd.f32 %v998_v47, %v910_v41  ;;  %v1245_v53 = vpop.f32.mrf.mxu3 }
 0x1e2   : > { %v5027_v14 = vpop.eup %5026  ;;  %v1246_v59 = vadd.f32 %v6020_v61, %v1245_v53 }
 0x1e3   : > { %v1088_v51 = vadd.f32 %v5970_v31, %v999_v50  ;;  %v1348_v54 = vpack.c.bf16 %v5027_v14, %v5025_v48  ;;  %v5029_v58 = vpop.eup %5028  ;;  %v925_v48 = vadd.f32 %v5938_v55, %v5919_v38  ;;  %v4925_v38 = vld [vmem:[%s8184_s9 + $0x10] sm:$0xff] }
 0x1e4   : > { %1880 = vmatpush.bf16.msra.mxu1 %v4925_v38  ;;  %v4778_v38 = vld [vmem:[%s8186_s11 + $0xb4] sm:$0xf0] }
 0x1e5   : > { %5030 = vtanh.f32 %v1088_v51  ;;  %4611 = vmatmul.msk.bf16.gmra.mxu2 %vm1399_vm2, %v1348_v54 }
 0x1e6   : > { %5032 = vtanh.f32 %v1246_v59 }
 0x1e8   : > { %v1001_v13 = vpop.f32.mrf.mxu1 }
 0x1e9   : > { %v1247_v57 = vpop.f32.mrf.mxu3  ;;  %v1002_v29 = vadd.f32 %v1001_v13, %v913_v60  ;;  %v4917_v13 = vld [vmem:[%s8182_s7 + $0x10] sm:$0xff]  ;;  %v928_v60 = vadd.f32 %v5938_v55, %v5926_v46 }
 0x1ea   : > { %v1248_v31 = vadd.f32 %v6020_v61, %v1247_v57  ;;  %1659 = vmatpush.bf16.msrb.mxu0 %v4917_v13 }
 0x1eb   : > { %v5031_v21 = vpop.eup %5030  ;;  %v1091_v1 = vadd.f32 %v5976_v52, %v1002_v29 }
 0x1ec   : > { %5034 = vtanh.f32 %v1248_v31  ;;  %v1153_v10 = vpack.c.bf16 %v5031_v21, %v5029_v58  ;;  %v5033_v4 = vpop.eup %5032 }
 0x1ed   : > { %5036 = vtanh.f32 %v1091_v1 }
 0x1ee   : > { %1289 = vmatmul.bf16.gmra.mxu3 %v1153_v10 }
 0x1f0   : > { %v1003_v28 = vpop.f32.mrf.mxu1 }
 0x1f1   : > { %v1004_v7 = vadd.f32 %v1003_v28, %v915_v0  ;;  %v1250_v8 = vpop.f32.mrf.mxu3  ;;  %v930_v0 = vadd.f32 %v5938_v55, %v5928_v49 }
 0x1f2   : > { %v5035_v2 = vpop.eup %5034  ;;  %v1251_v11 = vadd.f32 %v6020_v61, %v1250_v8 }
 0x1f3   : > { %v1093_v3 = vadd.f32 %v5981_v5, %v1004_v7  ;;  %v1349_v9 = vpack.c.bf16 %v5035_v2, %v5033_v4  ;;  %v5037_v17 = vpop.eup %5036 }
 0x1f5   : > { %5038 = vtanh.f32 %v1093_v3  ;;  %4612 = vmatmul.msk.bf16.gmra.mxu2 %vm1399_vm2, %v1349_v9  ;;  %v4916_v9 = vld [vmem:[%s8182_s7 + $0x8] sm:$0xff] }
 0x1f6   : > { %5040 = vtanh.f32 %v1251_v11  ;;  %1660 = vmatpush.bf16.msrb.mxu0 %v4916_v9 }
 0x1f8   : > { %v1006_v52 = vpop.f32.mrf.mxu1 }
 0x1f9   : > { %v1252_v15 = vpop.f32.mrf.mxu3  ;;  %v1007_v23 = vadd.f32 %v1006_v52, %v918_v18 }
 0x1fa   : > { %v1253_v5 = vadd.f32 %v6020_v61, %v1252_v15 }
 0x1fb   : > { %v5039_v22 = vpop.eup %5038  ;;  %v1096_v26 = vadd.f32 %v5986_v19, %v1007_v23 }
 0x1fc   : > { %5042 = vtanh.f32 %v1253_v5  ;;  %v1154_v36 = vpack.c.bf16 %v5039_v22, %v5037_v17  ;;  %v5041_v43 = vpop.eup %5040  ;;  %v4915_v5 = vld [vmem:[%s8182_s7] sm:$0xff] }
 0x1fd   : > { %5044 = vtanh.f32 %v1096_v26  ;;  %1661 = vmatpush.bf16.msrb.mxu0 %v4915_v5  ;;  %v4946_v5 = vld [vmem:[%s8186_s11 + $0x98] sm:$0xf0] }
 0x1fe   : > { %1294 = vmatmul.bf16.gmra.mxu3 %v1154_v36 }
 0x200   : > { %v1008_v44 = vpop.f32.mrf.mxu1 }
 0x201   : > { %v1009_v27 = vadd.f32 %v1008_v44, %v920_v24  ;;  %v1255_v30 = vpop.f32.mrf.mxu3 }
 0x202   : > { %v5043_v62 = vpop.eup %5042  ;;  %v1256_v25 = vadd.f32 %v6020_v61, %v1255_v30 }
 0x203   : > { %v1098_v20 = vadd.f32 %v5990_v42, %v1009_v27  ;;  %v1350_v33 = vpack.c.bf16 %v5043_v62, %v5041_v43  ;;  %v5045_v39 = vpop.eup %5044 }
 0x205   : > { %5046 = vtanh.f32 %v1098_v20  ;;  %4613 = vmatmul.msk.bf16.gmra.mxu2 %vm1399_vm2, %v1350_v33 }
 0x206   : > { %5048 = vtanh.f32 %v1256_v25 }
 0x208   : > { %v1011_v19 = vpop.f32.mrf.mxu1 }
 0x209   : > { %v1257_v34 = vpop.f32.mrf.mxu3  ;;  %v1012_v6 = vadd.f32 %v1011_v19, %v923_v40  ;;  %v6119_v19 = vld [vmem:[%s8181_s6] ss:$0 sm:$0xff] }
 0x20a   : > { %v1258_v42 = vadd.f32 %v6020_v61, %v1257_v34  ;;  %v4924_v34 = vld [vmem:[%s8184_s9 + $0x8] sm:$0xff] }
 0x20b   : > { %v5047_v41 = vpop.eup %5046  ;;  %v1101_v50 = vadd.f32 %v5998_v63, %v1012_v6  ;;  %1881 = vmatpush.bf16.msra.mxu1 %v4924_v34 }
 0x20c   : > { %5050 = vtanh.f32 %v1258_v42  ;;  %v1155_v47 = vpack.c.bf16 %v5047_v41, %v5045_v39  ;;  %v5049_v14 = vpop.eup %5048 }
 0x20d   : > { %5052 = vtanh.f32 %v1101_v50 }
 0x20e   : > { %1299 = vmatmul.bf16.gmra.mxu3 %v1155_v47 }
 0x210   : > { %v1013_v53 = vpop.f32.mrf.mxu1 }
 0x211   : > { %v1014_v51 = vadd.f32 %v1013_v53, %v925_v48  ;;  %v1260_v54 = vpop.f32.mrf.mxu3 }
 0x212   : > { %v5051_v56 = vpop.eup %5050  ;;  %v1261_v63 = vadd.f32 %v6020_v61, %v1260_v54 }
 0x213   : > { %v1103_v35 = vadd.f32 %v6001_v16, %v1014_v51  ;;  %v1351_v59 = vpack.c.bf16 %v5051_v56, %v5049_v14  ;;  %v5053_v16 = vpop.eup %5052  ;;  %v4776_v56 = vld [vmem:[%s8186_s11 + $0xa8] sm:$0xf] }
 0x215   : > { %5054 = vtanh.f32 %v1103_v35  ;;  %4614 = vmatmul.msk.bf16.gmra.mxu2 %vm1399_vm2, %v1351_v59  ;;  %v4949_v35 = vld [vmem:[%s8186_s11 + $0xb0] sm:$0xf0]  ;;  %v4948_v59 = vld [vmem:[%s8186_s11 + $0xac] sm:$0xf] }
 0x216   : > { %5056 = vtanh.f32 %v1261_v63  ;;  %v4777_v13 = vor.u32 %v4949_v35, %v4776_v56 }
 0x218   : > { %v1016_v57 = vpop.f32.mrf.mxu1  ;;  %2180 = vmatpush.bf16.msra.mxu3 %v4777_v13 }
 0x219   : > { %v1262_v58 = vpop.f32.mrf.mxu3  ;;  %v1017_v29 = vadd.f32 %v1016_v57, %v928_v60  ;;  %v4781_v57 = vor.u32 %v4948_v59, %v4778_v38 }
 0x21a   : > { %v1263_v31 = vadd.f32 %v6020_v61, %v1262_v58 }
 0x21b   : > { %v5055_v21 = vpop.eup %5054  ;;  %v1106_v1 = vadd.f32 %v6007_v32, %v1017_v29  ;;  %2269 = vmatpush.bf16.msra.mxu2 %v4781_v57  ;;  %v4950_v29 = vld [vmem:[%s8186_s11 + $0xb8] sm:$0xf0]  ;;  %v4943_v57 = vld [vmem:[%s8186_s11 + $0x80] sm:$0xf0] }
 0x21c   : > { %5058 = vtanh.f32 %v1263_v31  ;;  %v1156_v10 = vpack.c.bf16 %v5055_v21, %v5053_v16  ;;  %v5057_v4 = vpop.eup %5056  ;;  %v4784_v21 = vld [vmem:[%s8186_s11 + $0xb0] sm:$0xf] }
 0x21d   : > { %5060 = vtanh.f32 %v1106_v1 }
 0x21e   : > { %1304 = vmatmul.bf16.gmra.mxu3 %v1156_v10  ;;  %v4785_v10 = vor.u32 %v4950_v29, %v4784_v21 }
 0x220   : > { %v1018_v28 = vpop.f32.mrf.mxu1  ;;  %2358 = vmatpush.bf16.msra.mxu0 %v4785_v10 }
 0x221   : > { %v1019_v7 = vadd.f32 %v1018_v28, %v930_v0  ;;  %v1265_v8 = vpop.f32.mrf.mxu3 }
 0x222   : > { %v5059_v2 = vpop.eup %5058  ;;  %v1266_v49 = vadd.f32 %v6020_v61, %v1265_v8 }
 0x223   : > { %v1108_v46 = vadd.f32 %v6009_v45, %v1019_v7  ;;  %v1352_v3 = vpack.c.bf16 %v5059_v2, %v5057_v4  ;;  %v5061_v32 = vpop.eup %5060 }
 0x225   : > { %5062 = vtanh.f32 %v1108_v46  ;;  %4615 = vmatmul.msk.bf16.gmra.mxu2 %vm1399_vm2, %v1352_v3 }
 0x226   : > { %5064 = vtanh.f32 %v1266_v49 }
 0x229   : > { %v1267_v55 = vpop.f32.mrf.mxu3 }
 0x22a   : > { %v1268_v12 = vadd.f32 %v6020_v61, %v1267_v55 }
 0x22b   : > { %v5063_v11 = vpop.eup %5062 }
 0x22c   : > { %5066 = vtanh.f32 %v1268_v12  ;;  %v1157_v45 = vpack.c.bf16 %v5063_v11, %v5061_v32  ;;  %v5065_v52 = vpop.eup %5064 }
 0x22e   : > { %1309 = vmatmul.bf16.gmra.mxu3 %v1157_v45 }
 0x231   : > { %v1270_v15 = vpop.f32.mrf.mxu3 }
 0x232   : > { %v5067_v17 = vpop.eup %5066  ;;  %v1271_v22 = vadd.f32 %v6020_v61, %v1270_v15 }
 0x233   : > { %v1353_v18 = vpack.c.bf16 %v5067_v17, %v5065_v52 }
 0x234   : > { %5068 = vtanh.f32 %v1271_v22  ;;  %v4945_v22 = vld [vmem:[%s8186_s11 + $0x94] sm:$0xf] }
 0x235   : > { %4616 = vmatmul.msk.bf16.gmra.mxu2 %vm1399_vm2, %v1353_v18  ;;  %v4764_v18 = vld [vmem:[%s8186_s11 + $0x90] sm:$0xf] }
 0x239   : > { %v1272_v23 = vpop.f32.mrf.mxu3 }
 0x23a   : > { %v1273_v36 = vadd.f32 %v6020_v61, %v1272_v23  ;;  %v5069_v24 = vpop.eup %5068  ;;  %v4765_v23 = vor.u32 %v4946_v5, %v4764_v18 }
 0x23c   : > { %5070 = vtanh.f32 %v1273_v36  ;;  %v4766_v36 = vld [vmem:[%s8186_s11 + $0x9c] sm:$0xf0]  ;;  %2181 = vmatpush.bf16.msra.mxu3 %v4765_v23 }
 0x241   : > { %v1275_v26 = vpop.f32.mrf.mxu3 }
 0x242   : > { %v5071_v44 = vpop.eup %5070  ;;  %v1276_v27 = vadd.f32 %v6020_v61, %v1275_v26  ;;  %v4769_v26 = vor.u32 %v4945_v22, %v4766_v36  ;;  %v4940_v36 = vld [vmem:[%s8186_s11 + $0x68] sm:$0xf0] }
 0x243   : > { %v1354_v43 = vpack.c.bf16 %v5071_v44, %v5069_v24 }
 0x244   : > { %5072 = vtanh.f32 %v1276_v27  ;;  %2270 = vmatpush.bf16.msra.mxu2 %v4769_v26 }
 0x245   : > { %4617 = vmatmul.msk.bf16.gmra.mxu2 %vm1399_vm2, %v1354_v43 }
 0x249   : > { %v1277_v30 = vpop.f32.mrf.mxu3 }
 0x24a   : > { %v1278_v62 = vadd.f32 %v6020_v61, %v1277_v30  ;;  %v5073_v20 = vpop.eup %5072 }
 0x24c   : > { %5074 = vtanh.f32 %v1278_v62  ;;  %v4772_v62 = vld [vmem:[%s8186_s11 + $0x98] sm:$0xf] }
 0x251   : > { %v1280_v33 = vpop.f32.mrf.mxu3 }
 0x252   : > { %v5075_v37 = vpop.eup %5074  ;;  %v1281_v39 = vadd.f32 %v6020_v61, %v1280_v33 }
 0x253   : > { %v1355_v25 = vpack.c.bf16 %v5075_v37, %v5073_v20  ;;  %v4947_v20 = vld [vmem:[%s8186_s11 + $0xa0] sm:$0xf0] }
 0x254   : > { %5076 = vtanh.f32 %v1281_v39  ;;  %v4773_v33 = vor.u32 %v4947_v20, %v4772_v62 }
 0x255   : > { %4618 = vmatmul.msk.bf16.gmra.mxu2 %vm1399_vm2, %v1355_v25 }
 0x256   : > { %2359 = vmatpush.bf16.msra.mxu0 %v4773_v33 }
 0x258   : > { %v1457_v40 = vpop.f32.mrf.mxu2 }
 0x259   : > { %v1458_v42 = vadd.f32 %v6119_v19, %v1457_v40  ;;  %v1282_v41 = vpop.f32.mrf.mxu3 }
 0x25a   : > { %v1283_v6 = vadd.f32 %v6020_v61, %v1282_v41  ;;  %v5077_v48 = vpop.eup %5076 }
 0x25b   : > { %1538 = vst.msk [vmem:[%s6128_s26] sm:$0xff] %vm1537_vm3, %v1458_v42 }
 0x25c   : > { %5078 = vtanh.f32 %v1283_v6  ;;  %v4923_v6 = vld [vmem:[%s8184_s9] sm:$0xff] }
 0x25d   : > { %1882 = vmatpush.bf16.msra.mxu1 %v4923_v6 }
 0x260   : > { %v1459_v47 = vpop.f32.mrf.mxu2 }
 0x261   : > { %v1460_v50 = vadd.f32 %v6119_v19, %v1459_v47  ;;  %v1285_v53 = vpop.f32.mrf.mxu3 }
 0x262   : > { %v5079_v14 = vpop.eup %5078  ;;  %v1286_v63 = vadd.f32 %v6020_v61, %v1285_v53 }
 0x263   : > { %1539 = vst.msk [vmem:[%s6128_s26 + $0x8] sm:$0xff] %vm1537_vm3, %v1460_v50  ;;  %v1570_v51 = vpack.c.bf16 %v1460_v50, %v1458_v42  ;;  %v1356_v54 = vpack.c.bf16 %v5079_v14, %v5077_v48 }
 0x264   : > { %5080 = vtanh.f32 %v1286_v63  ;;  %v4752_v63 = vld [vmem:[%s8186_s11 + $0x78] sm:$0xf] }
 0x265   : > { %4619 = vmatmul.msk.bf16.gmra.mxu2 %vm1399_vm2, %v1356_v54  ;;  %1662 = vmatmul.bf16.vlgmr.msrb.gmra.mxu0 %v1570_v51 }
 0x268   : > { %v1462_v58 = vpop.f32.mrf.mxu2 }
 0x269   : > { %v1463_v16 = vadd.f32 %v6119_v19, %v1462_v58  ;;  %v1287_v60 = vpop.f32.mrf.mxu3  ;;  %v4942_v58 = vld [vmem:[%s8186_s11 + $0x7c] sm:$0xf] }
 0x26a   : > { %v1288_v31 = vadd.f32 %v6020_v61, %v1287_v60  ;;  %v5081_v1 = vpop.eup %5080  ;;  %v4754_v60 = vld [vmem:[%s8186_s11 + $0x84] sm:$0xf0] }
 0x26b   : > { %1540 = vst.msk [vmem:[%s6128_s26 + $0x10] sm:$0xff] %vm1537_vm3, %v1463_v16  ;;  %v4757_v21 = vor.u32 %v4942_v58, %v4754_v60  ;;  %v4938_v58 = vld [vmem:[%s8186_s11 + $0x58] sm:$0xf0] }
 0x26c   : > { %5082 = vtanh.f32 %v1288_v31 }
 0x26d   : > { %2271 = vmatpush.bf16.msra.mxu2 %v4757_v21 }
 0x270   : > { %v1464_v0 = vpop.f32.mrf.mxu2 }
 0x271   : > { %v1465_v28 = vadd.f32 %v6119_v19, %v1464_v0  ;;  %v1290_v4 = vpop.f32.mrf.mxu3 }
 0x272   : > { %v5083_v7 = vpop.eup %5082  ;;  %v1291_v46 = vadd.f32 %v6020_v61, %v1290_v4  ;;  %v4944_v4 = vld [vmem:[%s8186_s11 + $0x88] sm:$0xf0] }
 0x273   : > { %1541 = vst.msk [vmem:[%s6128_s26 + $0x18] sm:$0xff] %vm1537_vm3, %v1465_v28  ;;  %v1357_v8 = vpack.c.bf16 %v5083_v7, %v5081_v1  ;;  %v1571_v2 = vpack.c.bf16 %v1465_v28, %v1463_v16  ;;  %v4753_v16 = vor.u32 %v4943_v57, %v4752_v63  ;;  %v4760_v28 = vld [vmem:[%s8186_s11 + $0x80] sm:$0xf]  ;;  %v4736_v57 = vld [vmem:[%s8186_s11 + $0x50] sm:$0xf] }
 0x274   : > { %5084 = vtanh.f32 %v1291_v46  ;;  %v4761_v7 = vor.u32 %v4944_v4, %v4760_v28 }
 0x275   : > { %4620 = vmatmul.msk.bf16.gmra.mxu2 %vm1399_vm2, %v1357_v8  ;;  %1667 = vmatmul.bf16.gmra.mxu0 %v1571_v2 }
 0x276   : > { %2182 = vmatpush.bf16.msra.mxu3 %v4753_v16  ;;  %2360 = vmatpush.bf16.msra.mxu0 %v4761_v7  ;;  %v4737_v16 = vor.u32 %v4938_v58, %v4736_v57 }
 0x278   : > { %v1467_v3 = vpop.f32.mrf.mxu2 }
 0x279   : > { %v1468_v9 = vadd.f32 %v6119_v19, %v1467_v3  ;;  %v1292_v49 = vpop.f32.mrf.mxu3 }
 0x27a   : > { %v1293_v55 = vadd.f32 %v6020_v61, %v1292_v49  ;;  %v5085_v12 = vpop.eup %5084 }
 0x27b   : > { %1542 = vst.msk [vmem:[%s6128_s26 + $0x20] sm:$0xff] %vm1537_vm3, %v1468_v9 }
 0x27c   : > { %5086 = vtanh.f32 %v1293_v55 }
 0x280   : > { %v1469_v32 = vpop.f32.mrf.mxu2 }
 0x281   : > { %v1470_v11 = vadd.f32 %v6119_v19, %v1469_v32  ;;  %v1295_v45 = vpop.f32.mrf.mxu3 }
 0x282   : > { %v5087_v52 = vpop.eup %5086  ;;  %v1296_v24 = vadd.f32 %v6020_v61, %v1295_v45 }
 0x283   : > { %1543 = vst.msk [vmem:[%s6128_s26 + $0x28] sm:$0xff] %vm1537_vm3, %v1470_v11  ;;  %v1358_v15 = vpack.c.bf16 %v5087_v52, %v5085_v12  ;;  %v1572_v17 = vpack.c.bf16 %v1470_v11, %v1468_v9 }
 0x284   : > { %5088 = vtanh.f32 %v1296_v24  ;;  %v4939_v24 = vld [vmem:[%s8186_s11 + $0x64] sm:$0xf] }
 0x285   : > { %4621 = vmatmul.msk.bf16.gmra.mxu2 %vm1399_vm2, %v1358_v15  ;;  %1672 = vmatmul.bf16.gmra.mxu0 %v1572_v17 }
 0x288   : > { %v1472_v44 = vpop.f32.mrf.mxu2 }
 0x289   : > { %v1473_v43 = vadd.f32 %v6119_v19, %v1472_v44  ;;  %v1297_v27 = vpop.f32.mrf.mxu3  ;;  %v4742_v44 = vld [vmem:[%s8186_s11 + $0x6c] sm:$0xf0] }
 0x28a   : > { %v1298_v30 = vadd.f32 %v6020_v61, %v1297_v27  ;;  %v5089_v25 = vpop.eup %5088 }
 0x28b   : > { %1544 = vst.msk [vmem:[%s6128_s26 + $0x30] sm:$0xff] %vm1537_vm3, %v1473_v43 }
 0x28c   : > { %5090 = vtanh.f32 %v1298_v30 }
 0x290   : > { %v1474_v37 = vpop.f32.mrf.mxu2 }
 0x291   : > { %v1475_v34 = vadd.f32 %v6119_v19, %v1474_v37  ;;  %v1300_v39 = vpop.f32.mrf.mxu3  ;;  %v4748_v37 = vld [vmem:[%s8186_s11 + $0x68] sm:$0xf] }
 0x292   : > { %v5091_v40 = vpop.eup %5090  ;;  %v1301_v47 = vadd.f32 %v6020_v61, %v1300_v39 }
 0x293   : > { %1545 = vst.msk [vmem:[%s6128_s26 + $0x38] sm:$0xff] %vm1537_vm3, %v1475_v34  ;;  %v1359_v42 = vpack.c.bf16 %v5091_v40, %v5089_v25  ;;  %v1573_v41 = vpack.c.bf16 %v1475_v34, %v1473_v43  ;;  %v4745_v43 = vor.u32 %v4939_v24, %v4742_v44  ;;  %v4941_v25 = vld [vmem:[%s8186_s11 + $0x70] sm:$0xf0]  ;;  %v4724_v24 = vld [vmem:[%s8186_s11 + $0x38] sm:$0xf] }
 0x294   : > { %5092 = vtanh.f32 %v1301_v47  ;;  %v4749_v34 = vor.u32 %v4941_v25, %v4748_v37 }
 0x295   : > { %4622 = vmatmul.msk.bf16.gmra.mxu2 %vm1399_vm2, %v1359_v42  ;;  %1677 = vmatmul.bf16.gmra.mxu0 %v1573_v41 }
 0x296   : > { %2272 = vmatpush.bf16.msra.mxu2 %v4745_v43  ;;  %2361 = vmatpush.bf16.msra.mxu0 %v4749_v34 }
 0x298   : > { %v1477_v48 = vpop.f32.mrf.mxu2 }
 0x299   : > { %v1478_v50 = vadd.f32 %v6119_v19, %v1477_v48  ;;  %v1302_v53 = vpop.f32.mrf.mxu3  ;;  %v6282_v48 = vld [vmem:[%s8183_s8] ss:$0 sm:$0xff] }
 0x29a   : > { %v1303_v14 = vadd.f32 %v6020_v61, %v1302_v53  ;;  %v5093_v54 = vpop.eup %5092  ;;  %v4937_v53 = vld [vmem:[%s8186_s11 + $0x50] sm:$0xf0]  ;;  %2362 = vmatpush.bf16.msra.mxu0 %v4737_v16 }
 0x29b   : > { %1546 = vst.msk [vmem:[%s6128_s26 + $0x40] sm:$0xff] %vm1537_vm3, %v1478_v50 }
 0x29c   : > { %5094 = vtanh.f32 %v1303_v14  ;;  %v4936_v14 = vld [vmem:[%s8186_s11 + $0x4c] sm:$0xf] }
 0x2a0   : > { %v1479_v51 = vpop.f32.mrf.mxu2 }
 0x2a1   : > { %v1480_v56 = vadd.f32 %v6119_v19, %v1479_v51  ;;  %v1305_v35 = vpop.f32.mrf.mxu3 }
 0x2a2   : > { %v5095_v59 = vpop.eup %5094  ;;  %v1306_v31 = vadd.f32 %v6020_v61, %v1305_v35 }
 0x2a3   : > { %1547 = vst.msk [vmem:[%s6128_s26 + $0x48] sm:$0xff] %vm1537_vm3, %v1480_v56  ;;  %v1574_v13 = vpack.c.bf16 %v1480_v56, %v1478_v50  ;;  %v1360_v38 = vpack.c.bf16 %v5095_v59, %v5093_v54  ;;  %v4728_v50 = vld [vmem:[%s8186_s11 + $0x48] sm:$0xf]  ;;  %v4730_v54 = vld [vmem:[%s8186_s11 + $0x54] sm:$0xf0] }
 0x2a4   : > { %5096 = vtanh.f32 %v1306_v31  ;;  %v4729_v51 = vor.u32 %v4937_v53, %v4728_v50  ;;  %v4733_v59 = vor.u32 %v4936_v14, %v4730_v54  ;;  %v4704_v54 = vld [vmem:[%s8186_s11 + $0x18] sm:$0xf] }
 0x2a5   : > { %4623 = vmatmul.msk.bf16.gmra.mxu2 %vm1399_vm2, %v1360_v38  ;;  %1682 = vmatmul.bf16.gmra.mxu0 %v1574_v13 }
 0x2a6   : > { %2273 = vmatpush.bf16.msra.mxu2 %v4733_v59 }
 0x2a8   : > { %v1482_v29 = vpop.f32.mrf.mxu2 }
 0x2a9   : > { %v1483_v10 = vadd.f32 %v6119_v19, %v1482_v29  ;;  %v1307_v0 = vpop.f32.mrf.mxu3 }
 0x2aa   : > { %v1308_v1 = vadd.f32 %v6020_v61, %v1307_v0  ;;  %v5097_v2 = vpop.eup %5096 }
 0x2ab   : > { %1548 = vst.msk [vmem:[%s6128_s26 + $0x50] sm:$0xff] %vm1537_vm3, %v1483_v10 }
 0x2ac   : > { %5098 = vtanh.f32 %v1308_v1 }
 0x2b0   : > { %v1484_v8 = vpop.f32.mrf.mxu2 }
 0x2b1   : > { %v1485_v46 = vadd.f32 %v6119_v19, %v1484_v8  ;;  %v1310_v3 = vpop.f32.mrf.mxu3 }
 0x2b2   : > { %v5099_v9 = vpop.eup %5098  ;;  %v1311_v32 = vadd.f32 %v6020_v61, %v1310_v3 }
 0x2b3   : > { %1549 = vst.msk [vmem:[%s6128_s26 + $0x58] sm:$0xff] %vm1537_vm3, %v1485_v46  ;;  %v1575_v49 = vpack.c.bf16 %v1485_v46, %v1483_v10  ;;  %v1361_v55 = vpack.c.bf16 %v5099_v9, %v5097_v2 }
 0x2b4   : > { %5100 = vtanh.f32 %v1311_v32 }
 0x2b5   : > { %4624 = vmatmul.msk.bf16.gmra.mxu2 %vm1399_vm2, %v1361_v55  ;;  %1687 = vmatmul.bf16.gmra.mxu0 %v1575_v49 }
 0x2b8   : > { %v1487_v12 = vpop.f32.mrf.mxu2 }
 0x2b9   : > { %v1488_v11 = vadd.f32 %v6119_v19, %v1487_v12  ;;  %v1312_v45 = vpop.f32.mrf.mxu3 }
 0x2ba   : > { %v1313_v52 = vadd.f32 %v6020_v61, %v1312_v45  ;;  %v5101_v17 = vpop.eup %5100  ;;  %v4740_v61 = vld [vmem:[%s8186_s11 + $0x60] sm:$0xf]  ;;  %v4934_v45 = vld [vmem:[%s8186_s11 + $0x38] sm:$0xf0] }
 0x2bb   : > { %1550 = vst.msk [vmem:[%s6128_s26 + $0x60] sm:$0xff] %vm1537_vm3, %v1488_v11  ;;  %v4741_v26 = vor.u32 %v4940_v36, %v4740_v61 }
 0x2bc   : > { %5102 = vtanh.f32 %v1313_v52  ;;  %v4933_v52 = vld [vmem:[%s8186_s11 + $0x34] sm:$0xf] }
 0x2bd   : > { %2183 = vmatpush.bf16.msra.mxu3 %v4741_v26  ;;  %v4935_v26 = vld [vmem:[%s8186_s11 + $0x40] sm:$0xf0] }
 0x2be   : > { %v4725_v44 = vor.u32 %v4935_v26, %v4724_v24 }
 0x2c0   : > { %v1489_v15 = vpop.f32.mrf.mxu2  ;;  %2363 = vmatpush.bf16.msra.mxu0 %v4725_v44 }
 0x2c1   : > { %v1490_v18 = vadd.f32 %v6119_v19, %v1489_v15  ;;  %2184 = vmatpush.bf16.msra.mxu3 %v4729_v51 }
 0x2c2   : > { %v5103_v5 = vpop.eup %5102 }
 0x2c3   : > { %1551 = vst.msk [vmem:[%s6128_s26 + $0x68] sm:$0xff] %vm1537_vm3, %v1490_v18  ;;  %v1576_v22 = vpack.c.bf16 %v1490_v18, %v1488_v11  ;;  %v1362_v23 = vpack.c.bf16 %v5103_v5, %v5101_v17  ;;  %v4716_v11 = vld [vmem:[%s8186_s11 + $0x30] sm:$0xf]  ;;  %v4718_v17 = vld [vmem:[%s8186_s11 + $0x3c] sm:$0xf0] }
 0x2c4   : > { %v4717_v15 = vor.u32 %v4934_v45, %v4716_v11 }
 0x2c5   : > { %4625 = vmatmul.msk.bf16.gmra.mxu2 %vm1399_vm2, %v1362_v23  ;;  %1692 = vmatmul.bf16.gmra.mxu0 %v1576_v22  ;;  %v4721_v22 = vor.u32 %v4933_v52, %v4718_v17  ;;  %v4692_v17 = vld [vmem:[%s8186_s11] sm:$0xf] }
 0x2c6   : > { %2185 = vmatpush.bf16.msra.mxu3 %v4717_v15 }
 0x2c7   : > { %2274 = vmatpush.bf16.msra.mxu2 %v4721_v22 }
 0x2c8   : > { %v1492_v27 = vpop.f32.mrf.mxu2 }
 0x2c9   : > { %v1493_v30 = vadd.f32 %v6119_v19, %v1492_v27 }
 0x2cb   : > { %1552 = vst.msk [vmem:[%s6128_s26 + $0x70] sm:$0xff] %vm1537_vm3, %v1493_v30 }
 0x2d0   : > { %v1494_v62 = vpop.f32.mrf.mxu2 }
 0x2d1   : > { %v1495_v20 = vadd.f32 %v6119_v19, %v1494_v62 }
 0x2d3   : > { %1553 = vst.msk [vmem:[%s6128_s26 + $0x78] sm:$0xff] %vm1537_vm3, %v1495_v20  ;;  %v1577_v33 = vpack.c.bf16 %v1495_v20, %v1493_v30 }
 0x2d5   : > { %1697 = vmatmul.bf16.gmra.mxu0 %v1577_v33 }
 0x2d8   : > { %v1497_v39 = vpop.f32.mrf.mxu2 }
 0x2d9   : > { %v1498_v40 = vadd.f32 %v6119_v19, %v1497_v39 }
 0x2db   : > { %1554 = vst.msk [vmem:[%s6128_s26 + $0x80] sm:$0xff] %vm1537_vm3, %v1498_v40 }
 0x2e0   : > { %v1499_v42 = vpop.f32.mrf.mxu2 }
 0x2e1   : > { %v1500_v41 = vadd.f32 %v6119_v19, %v1499_v42 }
 0x2e2   : > { %v1663_v6 = vpop.f32.mrf.mxu0 }
 0x2e3   : > { %1555 = vst.msk [vmem:[%s6128_s26 + $0x88] sm:$0xff] %vm1537_vm3, %v1500_v41  ;;  %v1578_v47 = vpack.c.bf16 %v1500_v41, %v1498_v40  ;;  %v1664_v56 = vadd.f32 %v6282_v48, %v1663_v6 }
 0x2e5   : > { %1702 = vmatmul.bf16.gmra.mxu0 %v1578_v47  ;;  %5104 = vtanh.f32 %v1664_v56  ;;  %v4931_v56 = vld [vmem:[%s8186_s11 + $0x20] sm:$0xf0] }
 0x2e6   : > { %v4705_v59 = vor.u32 %v4931_v56, %v4704_v54 }
 0x2e8   : > { %v1502_v35 = vpop.f32.mrf.mxu2  ;;  %2186 = vmatpush.bf16.msra.mxu3 %v4705_v59 }
 0x2e9   : > { %v1503_v13 = vadd.f32 %v6119_v19, %v1502_v35  ;;  %v4930_v35 = vld [vmem:[%s8186_s11 + $0x1c] sm:$0xf] }
 0x2ea   : > { %v1665_v38 = vpop.f32.mrf.mxu0 }
 0x2eb   : > { %1556 = vst.msk [vmem:[%s6128_s26 + $0x90] sm:$0xff] %vm1537_vm3, %v1503_v13  ;;  %v1666_v63 = vadd.f32 %v6282_v48, %v1665_v38  ;;  %v5105_v21 = vpop.eup %5104 }
 0x2ed   : > { %5106 = vtanh.f32 %v1666_v63 }
 0x2f0   : > { %v1504_v60 = vpop.f32.mrf.mxu2 }
 0x2f1   : > { %v1505_v31 = vadd.f32 %v6119_v19, %v1504_v60 }
 0x2f2   : > { %v1668_v29 = vpop.f32.mrf.mxu0 }
 0x2f3   : > { %v5107_v10 = vpop.eup %5106  ;;  %1557 = vst.msk [vmem:[%s6128_s26 + $0x98] sm:$0xff] %vm1537_vm3, %v1505_v31  ;;  %v1579_v0 = vpack.c.bf16 %v1505_v31, %v1503_v13  ;;  %v1669_v28 = vadd.f32 %v6282_v48, %v1668_v29  ;;  %v4706_v13 = vld [vmem:[%s8186_s11 + $0x24] sm:$0xf0]  ;;  %v4712_v31 = vld [vmem:[%s8186_s11 + $0x20] sm:$0xf] }
 0x2f4   : > { %v1775_v1 = vpack.c.bf16 %v5107_v10, %v5105_v21  ;;  %v4709_v57 = vor.u32 %v4930_v35, %v4706_v13  ;;  %v4932_v21 = vld [vmem:[%s8186_s11 + $0x28] sm:$0xf0] }
 0x2f5   : > { %1707 = vmatmul.bf16.gmra.mxu0 %v1579_v0  ;;  %5108 = vtanh.f32 %v1669_v28  ;;  %v4713_v29 = vor.u32 %v4932_v21, %v4712_v31 }
 0x2f6   : > { %4674 = vmatmul.msk.bf16.vlgmr.msra.gmra.mxu1 %vm1399_vm2, %v1775_v1  ;;  %2275 = vmatpush.bf16.msra.mxu2 %v4709_v57 }
 0x2f7   : > { %2364 = vmatpush.bf16.msra.mxu0 %v4713_v29 }
 0x2f8   : > { %v1507_v4 = vpop.f32.mrf.mxu2 }
 0x2f9   : > { %v1508_v7 = vadd.f32 %v6119_v19, %v1507_v4 }
 0x2fa   : > { %v1670_v8 = vpop.f32.mrf.mxu0 }
 0x2fb   : > { %1558 = vst.msk [vmem:[%s6128_s26 + $0xa0] sm:$0xff] %vm1537_vm3, %v1508_v7  ;;  %v1671_v2 = vadd.f32 %v6282_v48, %v1670_v8  ;;  %v5109_v9 = vpop.eup %5108 }
 0x2fd   : > { %5110 = vtanh.f32 %v1671_v2 }
 0x300   : > { %v1509_v46 = vpop.f32.mrf.mxu2 }
 0x301   : > { %v1510_v3 = vadd.f32 %v6119_v19, %v1509_v46 }
 0x302   : > { %v1673_v49 = vpop.f32.mrf.mxu0 }
 0x303   : > { %v5111_v55 = vpop.eup %5110  ;;  %1559 = vst.msk [vmem:[%s6128_s26 + $0xa8] sm:$0xff] %vm1537_vm3, %v1510_v3  ;;  %v1580_v32 = vpack.c.bf16 %v1510_v3, %v1508_v7  ;;  %v1674_v18 = vadd.f32 %v6282_v48, %v1673_v49 }
 0x304   : > { %v1776_v12 = vpack.c.bf16 %v5111_v55, %v5109_v9 }
 0x305   : > { %1712 = vmatmul.bf16.gmra.mxu0 %v1580_v32  ;;  %5112 = vtanh.f32 %v1674_v18  ;;  %v4928_v18 = vld [vmem:[%s8186_s11 + $0x8] sm:$0xf0] }
 0x306   : > { %4675 = vmatmul.msk.bf16.gmra.mxu1 %vm1399_vm2, %v1776_v12  ;;  %v4693_v22 = vor.u32 %v4928_v18, %v4692_v17 }
 0x308   : > { %v1512_v5 = vpop.f32.mrf.mxu2  ;;  %2187 = vmatpush.bf16.msra.mxu3 %v4693_v22 }
 0x309   : > { %v1513_v23 = vadd.f32 %v6119_v19, %v1512_v5  ;;  %v4927_v5 = vld [vmem:[%s8186_s11 + $0x4] sm:$0xf] }
 0x30a   : > { %v1675_v61 = vpop.f32.mrf.mxu0 }
 0x30b   : > { %1560 = vst.msk [vmem:[%s6128_s26 + $0xb0] sm:$0xff] %vm1537_vm3, %v1513_v23  ;;  %v1676_v36 = vadd.f32 %v6282_v48, %v1675_v61  ;;  %v5113_v30 = vpop.eup %5112 }
 0x30d   : > { %5114 = vtanh.f32 %v1676_v36 }
 0x310   : > { %v1514_v43 = vpop.f32.mrf.mxu2 }
 0x311   : > { %v1515_v27 = vadd.f32 %v6119_v19, %v1514_v43 }
 0x312   : > { %v1678_v62 = vpop.f32.mrf.mxu0 }
 0x313   : > { %v5115_v20 = vpop.eup %5114  ;;  %1561 = vst.msk [vmem:[%s6128_s26 + $0xb8] sm:$0xff] %vm1537_vm3, %v1515_v27  ;;  %v1581_v33 = vpack.c.bf16 %v1515_v27, %v1513_v23  ;;  %v1679_v25 = vadd.f32 %v6282_v48, %v1678_v62  ;;  %v4694_v23 = vld [vmem:[%s8186_s11 + $0xc] sm:$0xf0]  ;;  %v4700_v27 = vld [vmem:[%s8186_s11 + $0x8] sm:$0xf] }
 0x314   : > { %v1777_v37 = vpack.c.bf16 %v5115_v20, %v5113_v30  ;;  %v4697_v24 = vor.u32 %v4927_v5, %v4694_v23  ;;  %v4929_v30 = vld [vmem:[%s8186_s11 + $0x10] sm:$0xf0] }
 0x315   : > { %1717 = vmatmul.bf16.gmra.mxu0 %v1581_v33  ;;  %5116 = vtanh.f32 %v1679_v25  ;;  %v4701_v62 = vor.u32 %v4929_v30, %v4700_v27 }
 0x316   : > { %4676 = vmatmul.msk.bf16.gmra.mxu1 %vm1399_vm2, %v1777_v37  ;;  %2276 = vmatpush.bf16.msra.mxu2 %v4697_v24 }
 0x317   : > { %2365 = vmatpush.bf16.msra.mxu0 %v4701_v62 }
 0x318   : > { %v1517_v34 = vpop.f32.mrf.mxu2 }
 0x319   : > { %v1518_v39 = vadd.f32 %v6119_v19, %v1517_v34 }
 0x31a   : > { %v1680_v40 = vpop.f32.mrf.mxu0 }
 0x31b   : > { %1562 = vst.msk [vmem:[%s6128_s26 + $0xc0] sm:$0xff] %vm1537_vm3, %v1518_v39  ;;  %v1681_v42 = vadd.f32 %v6282_v48, %v1680_v40  ;;  %v5117_v47 = vpop.eup %5116 }
 0x31d   : > { %5118 = vtanh.f32 %v1681_v42 }
 0x320   : > { %v1519_v41 = vpop.f32.mrf.mxu2 }
 0x321   : > { %v1520_v6 = vadd.f32 %v6119_v19, %v1519_v41 }
 0x322   : > { %v1683_v50 = vpop.f32.mrf.mxu0 }
 0x323   : > { %v5119_v53 = vpop.eup %5118  ;;  %1563 = vst.msk [vmem:[%s6128_s26 + $0xc8] sm:$0xff] %vm1537_vm3, %v1520_v6  ;;  %v1582_v14 = vpack.c.bf16 %v1520_v6, %v1518_v39  ;;  %v1684_v38 = vadd.f32 %v6282_v48, %v1683_v50 }
 0x324   : > { %v1778_v51 = vpack.c.bf16 %v5119_v53, %v5117_v47 }
 0x325   : > { %1722 = vmatmul.bf16.gmra.mxu0 %v1582_v14  ;;  %5120 = vtanh.f32 %v1684_v38  ;;  %v6427_v38 = vld [vmem:[%s8185_s10] ss:$0 sm:$0xff] }
 0x326   : > { %4677 = vmatmul.msk.bf16.gmra.mxu1 %vm1399_vm2, %v1778_v51 }
 0x328   : > { %v1522_v63 = vpop.f32.mrf.mxu2 }
 0x329   : > { %v1523_v58 = vadd.f32 %v6119_v19, %v1522_v63 }
 0x32a   : > { %v1685_v16 = vpop.f32.mrf.mxu0 }
 0x32b   : > { %1564 = vst.msk [vmem:[%s6128_s26 + $0xd0] sm:$0xff] %vm1537_vm3, %v1523_v58  ;;  %v1686_v60 = vadd.f32 %v6282_v48, %v1685_v16  ;;  %v5121_v1 = vpop.eup %5120 }
 0x32d   : > { %5122 = vtanh.f32 %v1686_v60 }
 0x330   : > { %v1524_v10 = vpop.f32.mrf.mxu2 }
 0x331   : > { %v1525_v0 = vadd.f32 %v6119_v19, %v1524_v10 }
 0x332   : > { %v1688_v28 = vpop.f32.mrf.mxu0 }
 0x333   : > { %v5123_v4 = vpop.eup %5122  ;;  %1565 = vst.msk [vmem:[%s6128_s26 + $0xd8] sm:$0xff] %vm1537_vm3, %v1525_v0  ;;  %v1583_v7 = vpack.c.bf16 %v1525_v0, %v1523_v58  ;;  %v1689_v2 = vadd.f32 %v6282_v48, %v1688_v28 }
 0x334   : > { %v1779_v8 = vpack.c.bf16 %v5123_v4, %v5121_v1 }
 0x335   : > { %1727 = vmatmul.bf16.gmra.mxu0 %v1583_v7  ;;  %5124 = vtanh.f32 %v1689_v2 }
 0x336   : > { %4678 = vmatmul.msk.bf16.gmra.mxu1 %vm1399_vm2, %v1779_v8 }
 0x338   : > { %v1527_v46 = vpop.f32.mrf.mxu2 }
 0x339   : > { %v1528_v3 = vadd.f32 %v6119_v19, %v1527_v46 }
 0x33a   : > { %v1690_v9 = vpop.f32.mrf.mxu0 }
 0x33b   : > { %1566 = vst.msk [vmem:[%s6128_s26 + $0xe0] sm:$0xff] %vm1537_vm3, %v1528_v3  ;;  %v1691_v49 = vadd.f32 %v6282_v48, %v1690_v9  ;;  %v5125_v12 = vpop.eup %5124 }
 0x33d   : > { %5126 = vtanh.f32 %v1691_v49 }
 0x340   : > { %v1529_v55 = vpop.f32.mrf.mxu2 }
 0x341   : > { %v1530_v32 = vadd.f32 %v6119_v19, %v1529_v55 }
 0x342   : > { %v1693_v11 = vpop.f32.mrf.mxu0 }
 0x343   : > { %v5127_v45 = vpop.eup %5126  ;;  %1567 = vst.msk [vmem:[%s6128_s26 + $0xe8] sm:$0xff] %vm1537_vm3, %v1530_v32  ;;  %v1584_v52 = vpack.c.bf16 %v1530_v32, %v1528_v3  ;;  %v1694_v61 = vadd.f32 %v6282_v48, %v1693_v11 }
 0x344   : > { %v1780_v15 = vpack.c.bf16 %v5127_v45, %v5125_v12 }
 0x345   : > { %1732 = vmatmul.bf16.gmra.mxu0 %v1584_v52  ;;  %5128 = vtanh.f32 %v1694_v61 }
 0x346   : > { %4679 = vmatmul.msk.bf16.gmra.mxu1 %vm1399_vm2, %v1780_v15 }
 0x348   : > { %v1532_v36 = vpop.f32.mrf.mxu2 }
 0x349   : > { %v1533_v26 = vadd.f32 %v6119_v19, %v1532_v36 }
 0x34a   : > { %v1695_v44 = vpop.f32.mrf.mxu0 }
 0x34b   : > { %1568 = vst.msk [vmem:[%s6128_s26 + $0xf0] sm:$0xff] %vm1537_vm3, %v1533_v26  ;;  %v1696_v43 = vadd.f32 %v6282_v48, %v1695_v44  ;;  %v5129_v37 = vpop.eup %5128 }
 0x34d   : > { %5130 = vtanh.f32 %v1696_v43 }
 0x350   : > { %v1534_v20 = vpop.f32.mrf.mxu2 }
 0x351   : > { %v1535_v33 = vadd.f32 %v6119_v19, %v1534_v20 }
 0x352   : > { %v1698_v25 = vpop.f32.mrf.mxu0 }
 0x353   : > { %v5131_v34 = vpop.eup %5130  ;;  %1569 = vst.msk [vmem:[%s6128_s26 + $0xf8] sm:$0xff] %vm1537_vm3, %v1535_v33  ;;  %v1585_v39 = vpack.c.bf16 %v1535_v33, %v1533_v26  ;;  %v1699_v42 = vadd.f32 %v6282_v48, %v1698_v25 }
 0x354   : > { %v1781_v40 = vpack.c.bf16 %v5131_v34, %v5129_v37 }
 0x355   : > { %1737 = vmatmul.bf16.gmra.mxu0 %v1585_v39  ;;  %5132 = vtanh.f32 %v1699_v42 }
 0x356   : > { %4680 = vmatmul.msk.bf16.gmra.mxu1 %vm1399_vm2, %v1781_v40 }
 0x35a   : > { %v1700_v41 = vpop.f32.mrf.mxu0 }
 0x35b   : > { %v1701_v6 = vadd.f32 %v6282_v48, %v1700_v41  ;;  %v5133_v47 = vpop.eup %5132 }
 0x35d   : > { %5134 = vtanh.f32 %v1701_v6 }
 0x362   : > { %v1703_v50 = vpop.f32.mrf.mxu0 }
 0x363   : > { %v5135_v19 = vpop.eup %5134  ;;  %v1704_v14 = vadd.f32 %v6282_v48, %v1703_v50 }
 0x364   : > { %v1782_v53 = vpack.c.bf16 %v5135_v19, %v5133_v47 }
 0x365   : > { %5136 = vtanh.f32 %v1704_v14 }
 0x366   : > { %4681 = vmatmul.msk.bf16.gmra.mxu1 %vm1399_vm2, %v1782_v53 }
 0x36a   : > { %v1705_v51 = vpop.f32.mrf.mxu0 }
 0x36b   : > { %v1706_v54 = vadd.f32 %v6282_v48, %v1705_v51  ;;  %v5137_v56 = vpop.eup %5136 }
 0x36d   : > { %5138 = vtanh.f32 %v1706_v54 }
 0x372   : > { %v1708_v35 = vpop.f32.mrf.mxu0 }
 0x373   : > { %v5139_v59 = vpop.eup %5138  ;;  %v1884_v13 = vpop.f32.mrf.mxu1  ;;  %v1709_v57 = vadd.f32 %v6282_v48, %v1708_v35 }
 0x374   : > { %v1783_v63 = vpack.c.bf16 %v5139_v59, %v5137_v56  ;;  %v1885_v58 = vadd.f32 %v6427_v38, %v1884_v13 }
 0x375   : > { %5140 = vtanh.f32 %v1709_v57 }
 0x376   : > { %4682 = vmatmul.msk.bf16.gmra.mxu1 %vm1399_vm2, %v1783_v63  ;;  %5142 = vtanh.f32 %v1885_v58 }
 0x37a   : > { %v1710_v16 = vpop.f32.mrf.mxu0 }
 0x37b   : > { %v1711_v60 = vadd.f32 %v6282_v48, %v1710_v16  ;;  %v1886_v31 = vpop.f32.mrf.mxu1  ;;  %v5141_v29 = vpop.eup %5140 }
 0x37c   : > { %v1887_v21 = vadd.f32 %v6427_v38, %v1886_v31  ;;  %v5143_v10 = vpop.eup %5142 }
 0x37d   : > { %5144 = vtanh.f32 %v1711_v60 }
 0x37e   : > { %5146 = vtanh.f32 %v1887_v21 }
 0x382   : > { %v1713_v0 = vpop.f32.mrf.mxu0 }
 0x383   : > { %v5145_v1 = vpop.eup %5144  ;;  %v1889_v28 = vpop.f32.mrf.mxu1  ;;  %v1714_v2 = vadd.f32 %v6282_v48, %v1713_v0 }
 0x384   : > { %v5147_v4 = vpop.eup %5146  ;;  %v1784_v7 = vpack.c.bf16 %v5145_v1, %v5141_v29  ;;  %v1890_v46 = vadd.f32 %v6427_v38, %v1889_v28 }
 0x385   : > { %v1996_v8 = vpack.c.bf16 %v5147_v4, %v5143_v10  ;;  %5148 = vtanh.f32 %v1714_v2 }
 0x386   : > { %4683 = vmatmul.msk.bf16.gmra.mxu1 %vm1399_vm2, %v1784_v7  ;;  %5150 = vtanh.f32 %v1890_v46 }
 0x387   : > { %2188 = vmatmul.bf16.vlgmr.msra.gmra.mxu3 %v1996_v8  ;;  %2277 = vmatmul.bf16.vlgmr.msra.gmra.mxu2 %v1996_v8 }
 0x388   : > { %2366 = vmatmul.bf16.vlgmr.msra.gmra.mxu0 %v1996_v8 }
 0x38a   : > { %v1715_v3 = vpop.f32.mrf.mxu0 }
 0x38b   : > { %v1716_v9 = vadd.f32 %v6282_v48, %v1715_v3  ;;  %v1891_v49 = vpop.f32.mrf.mxu1  ;;  %v5149_v32 = vpop.eup %5148 }
 0x38c   : > { %v1892_v55 = vadd.f32 %v6427_v38, %v1891_v49  ;;  %v5151_v12 = vpop.eup %5150 }
 0x38d   : > { %5152 = vtanh.f32 %v1716_v9 }
 0x38e   : > { %5154 = vtanh.f32 %v1892_v55 }
 0x392   : > { %v1718_v11 = vpop.f32.mrf.mxu0 }
 0x393   : > { %v5153_v45 = vpop.eup %5152  ;;  %v1894_v52 = vpop.f32.mrf.mxu1  ;;  %v1719_v5 = vadd.f32 %v6282_v48, %v1718_v11 }
 0x394   : > { %v5155_v15 = vpop.eup %5154  ;;  %v1785_v17 = vpack.c.bf16 %v5153_v45, %v5149_v32  ;;  %v1895_v22 = vadd.f32 %v6427_v38, %v1894_v52 }
 0x395   : > { %v1997_v18 = vpack.c.bf16 %v5155_v15, %v5151_v12  ;;  %5156 = vtanh.f32 %v1719_v5 }
 0x396   : > { %4684 = vmatmul.msk.bf16.gmra.mxu1 %vm1399_vm2, %v1785_v17  ;;  %5158 = vtanh.f32 %v1895_v22 }
 0x397   : > { %2193 = vmatmul.bf16.gmra.mxu3 %v1997_v18  ;;  %2282 = vmatmul.bf16.gmra.mxu2 %v1997_v18 }
 0x398   : > { %2371 = vmatmul.bf16.gmra.mxu0 %v1997_v18 }
 0x39a   : > { %v1720_v23 = vpop.f32.mrf.mxu0 }
 0x39b   : > { %v1721_v61 = vadd.f32 %v6282_v48, %v1720_v23  ;;  %v1896_v36 = vpop.f32.mrf.mxu1  ;;  %v5157_v26 = vpop.eup %5156 }
 0x39c   : > { %v1897_v24 = vadd.f32 %v6427_v38, %v1896_v36  ;;  %v5159_v44 = vpop.eup %5158 }
 0x39d   : > { %5160 = vtanh.f32 %v1721_v61 }
 0x39e   : > { %5162 = vtanh.f32 %v1897_v24 }
 0x3a2   : > { %v1723_v43 = vpop.f32.mrf.mxu0 }
 0x3a3   : > { %v5161_v27 = vpop.eup %5160  ;;  %v1899_v30 = vpop.f32.mrf.mxu1  ;;  %v1724_v37 = vadd.f32 %v6282_v48, %v1723_v43 }
 0x3a4   : > { %v5163_v62 = vpop.eup %5162  ;;  %v1786_v20 = vpack.c.bf16 %v5161_v27, %v5157_v26  ;;  %v1900_v25 = vadd.f32 %v6427_v38, %v1899_v30 }
 0x3a5   : > { %v1998_v33 = vpack.c.bf16 %v5163_v62, %v5159_v44  ;;  %5164 = vtanh.f32 %v1724_v37 }
 0x3a6   : > { %4685 = vmatmul.msk.bf16.gmra.mxu1 %vm1399_vm2, %v1786_v20  ;;  %5166 = vtanh.f32 %v1900_v25 }
 0x3a7   : > { %2198 = vmatmul.bf16.gmra.mxu3 %v1998_v33  ;;  %2287 = vmatmul.bf16.gmra.mxu2 %v1998_v33 }
 0x3a8   : > { %2376 = vmatmul.bf16.gmra.mxu0 %v1998_v33 }
 0x3aa   : > { %v1725_v34 = vpop.f32.mrf.mxu0 }
 0x3ab   : > { %v1726_v39 = vadd.f32 %v6282_v48, %v1725_v34  ;;  %v1901_v40 = vpop.f32.mrf.mxu1  ;;  %v5165_v41 = vpop.eup %5164  ;;  %v2044_v34 = vld [vmem:[%s8187_s12] sm:$0x7] }
 0x3ac   : > { %v1902_v42 = vadd.f32 %v6427_v38, %v1901_v40  ;;  %v5167_v6 = vpop.eup %5166 }
 0x3ad   : > { %5168 = vtanh.f32 %v1726_v39  ;;  %v6472_v39 = vperm.slane %v2044_v34, 2 }
 0x3ae   : > { %5170 = vtanh.f32 %v1902_v42 }
 0x3b2   : > { %v1728_v47 = vpop.f32.mrf.mxu0 }
 0x3b3   : > { %v5169_v50 = vpop.eup %5168  ;;  %v1904_v19 = vpop.f32.mrf.mxu1  ;;  %v1729_v54 = vadd.f32 %v6282_v48, %v1728_v47 }
 0x3b4   : > { %v5171_v53 = vpop.eup %5170  ;;  %v1787_v14 = vpack.c.bf16 %v5169_v50, %v5165_v41  ;;  %v1905_v56 = vadd.f32 %v6427_v38, %v1904_v19  ;;  %v6475_v19 = vperm.slane %v2044_v34, 0 }
 0x3b5   : > { %v1999_v51 = vpack.c.bf16 %v5171_v53, %v5167_v6  ;;  %5172 = vtanh.f32 %v1729_v54  ;;  %v6477_v53 = vperm.slane %v2044_v34, 1 }
 0x3b6   : > { %4686 = vmatmul.msk.bf16.gmra.mxu1 %vm1399_vm2, %v1787_v14  ;;  %5174 = vtanh.f32 %v1905_v56 }
 0x3b7   : > { %2203 = vmatmul.bf16.gmra.mxu3 %v1999_v51  ;;  %2292 = vmatmul.bf16.gmra.mxu2 %v1999_v51 }
 0x3b8   : > { %2381 = vmatmul.bf16.gmra.mxu0 %v1999_v51 }
 0x3ba   : > { %v1730_v35 = vpop.f32.mrf.mxu0 }
 0x3bb   : > { %v1731_v59 = vadd.f32 %v6282_v48, %v1730_v35  ;;  %v1906_v13 = vpop.f32.mrf.mxu1  ;;  %v5173_v57 = vpop.eup %5172 }
 0x3bc   : > { %v1907_v63 = vadd.f32 %v6427_v38, %v1906_v13  ;;  %v5175_v58 = vpop.eup %5174 }
 0x3bd   : > { %5176 = vtanh.f32 %v1731_v59 }
 0x3be   : > { %5178 = vtanh.f32 %v1907_v63 }
 0x3c2   : > { %v1733_v16 = vpop.f32.mrf.mxu0 }
 0x3c3   : > { %v5177_v60 = vpop.eup %5176  ;;  %v1909_v31 = vpop.f32.mrf.mxu1  ;;  %v1734_v0 = vadd.f32 %v6282_v48, %v1733_v16 }
 0x3c4   : > { %v5179_v21 = vpop.eup %5178  ;;  %v1788_v29 = vpack.c.bf16 %v5177_v60, %v5173_v57  ;;  %v1910_v1 = vadd.f32 %v6427_v38, %v1909_v31 }
 0x3c5   : > { %v2000_v10 = vpack.c.bf16 %v5179_v21, %v5175_v58  ;;  %5180 = vtanh.f32 %v1734_v0 }
 0x3c6   : > { %4687 = vmatmul.msk.bf16.gmra.mxu1 %vm1399_vm2, %v1788_v29  ;;  %5182 = vtanh.f32 %v1910_v1 }
 0x3c7   : > { %2208 = vmatmul.bf16.gmra.mxu3 %v2000_v10  ;;  %2297 = vmatmul.bf16.gmra.mxu2 %v2000_v10 }
 0x3c8   : > { %2386 = vmatmul.bf16.gmra.mxu0 %v2000_v10 }
 0x3ca   : > { %v1735_v28 = vpop.f32.mrf.mxu0 }
 0x3cb   : > { %v1736_v4 = vadd.f32 %v6282_v48, %v1735_v28  ;;  %v1911_v7 = vpop.f32.mrf.mxu1  ;;  %v5181_v2 = vpop.eup %5180 }
 0x3cc   : > { %v1912_v8 = vadd.f32 %v6427_v38, %v1911_v7  ;;  %v5183_v46 = vpop.eup %5182 }
 0x3cd   : > { %5184 = vtanh.f32 %v1736_v4 }
 0x3ce   : > { %5186 = vtanh.f32 %v1912_v8 }
 0x3d2   : > { %v1738_v3 = vpop.f32.mrf.mxu0 }
 0x3d3   : > { %v5185_v9 = vpop.eup %5184  ;;  %v1914_v49 = vpop.f32.mrf.mxu1  ;;  %v1739_v11 = vadd.f32 %v6282_v48, %v1738_v3 }
 0x3d4   : > { %v5187_v55 = vpop.eup %5186  ;;  %v1789_v32 = vpack.c.bf16 %v5185_v9, %v5181_v2  ;;  %v1915_v45 = vadd.f32 %v6427_v38, %v1914_v49 }
 0x3d5   : > { %v2001_v12 = vpack.c.bf16 %v5187_v55, %v5183_v46  ;;  %5188 = vtanh.f32 %v1739_v11 }
 0x3d6   : > { %4688 = vmatmul.msk.bf16.gmra.mxu1 %vm1399_vm2, %v1789_v32  ;;  %5190 = vtanh.f32 %v1915_v45 }
 0x3d7   : > { %2213 = vmatmul.bf16.gmra.mxu3 %v2001_v12  ;;  %2302 = vmatmul.bf16.gmra.mxu2 %v2001_v12 }
 0x3d8   : > { %2391 = vmatmul.bf16.gmra.mxu0 %v2001_v12 }
 0x3da   : > { %v1740_v52 = vpop.f32.mrf.mxu0 }
 0x3db   : > { %v1741_v15 = vadd.f32 %v6282_v48, %v1740_v52  ;;  %v1916_v17 = vpop.f32.mrf.mxu1  ;;  %v5189_v5 = vpop.eup %5188 }
 0x3dc   : > { %v1917_v18 = vadd.f32 %v6427_v38, %v1916_v17  ;;  %v5191_v22 = vpop.eup %5190 }
 0x3dd   : > { %5192 = vtanh.f32 %v1741_v15 }
 0x3de   : > { %5194 = vtanh.f32 %v1917_v18 }
 0x3e3   : > { %v5193_v23 = vpop.eup %5192  ;;  %v1919_v61 = vpop.f32.mrf.mxu1 }
 0x3e4   : > { %v5195_v36 = vpop.eup %5194  ;;  %v1790_v24 = vpack.c.bf16 %v5193_v23, %v5189_v5  ;;  %v1920_v48 = vadd.f32 %v6427_v38, %v1919_v61 }
 0x3e5   : > { %v2002_v26 = vpack.c.bf16 %v5195_v36, %v5191_v22 }
 0x3e6   : > { %4689 = vmatmul.msk.bf16.gmra.mxu1 %vm1399_vm2, %v1790_v24  ;;  %5196 = vtanh.f32 %v1920_v48 }
 0x3e7   : > { %2218 = vmatmul.bf16.gmra.mxu3 %v2002_v26  ;;  %2307 = vmatmul.bf16.gmra.mxu2 %v2002_v26 }
 0x3e8   : > { %2396 = vmatmul.bf16.gmra.mxu0 %v2002_v26 }
 0x3eb   : > { %v1921_v44 = vpop.f32.mrf.mxu1 }
 0x3ec   : > { %v1922_v43 = vadd.f32 %v6427_v38, %v1921_v44  ;;  %v5197_v27 = vpop.eup %5196 }
 0x3ee   : > { %5198 = vtanh.f32 %v1922_v43 }
 0x3f3   : > { %v1924_v30 = vpop.f32.mrf.mxu1 }
 0x3f4   : > { %v5199_v62 = vpop.eup %5198  ;;  %v1925_v33 = vadd.f32 %v6427_v38, %v1924_v30 }
 0x3f5   : > { %v2003_v20 = vpack.c.bf16 %v5199_v62, %v5197_v27 }
 0x3f6   : > { %5200 = vtanh.f32 %v1925_v33 }
 0x3f7   : > { %2223 = vmatmul.bf16.gmra.mxu3 %v2003_v20  ;;  %2312 = vmatmul.bf16.gmra.mxu2 %v2003_v20 }
 0x3f8   : > { %2401 = vmatmul.bf16.gmra.mxu0 %v2003_v20 }
 0x3fb   : > { %v1926_v37 = vpop.f32.mrf.mxu1 }
 0x3fc   : > { %v1927_v25 = vadd.f32 %v6427_v38, %v1926_v37  ;;  %v5201_v40 = vpop.eup %5200 }
 0x3fe   : > { %5202 = vtanh.f32 %v1927_v25 }
 0x403   : > { %v1929_v42 = vpop.f32.mrf.mxu1 }
 0x404   : > { %v5203_v41 = vpop.eup %5202  ;;  %v1930_v51 = vadd.f32 %v6427_v38, %v1929_v42 }
 0x405   : > { %v2367_v6 = vpop.f32.mrf.mxu0  ;;  %v2004_v47 = vpack.c.bf16 %v5203_v41, %v5201_v40 }
 0x406   : > { %v2368_v50 = vadd.f32 %v2367_v6, %v6472_v39 }
 0x407   : > { %2228 = vmatmul.bf16.gmra.mxu3 %v2004_v47  ;;  %2317 = vmatmul.bf16.gmra.mxu2 %v2004_v47 }
 0x408   : > { %v4788_v14 = vmul.f32 -1.442695, %v2368_v50  ;;  %2406 = vmatmul.bf16.gmra.mxu0 %v2004_v47 }
 0x40a   : > { %5204 = vpow2.f32 %v4788_v14  ;;  %v2189_v54 = vpop.f32.mrf.mxu3  ;;  %v2278_v56 = vpop.f32.mrf.mxu2 }
 0x40b   : > { %v2190_v35 = vadd.f32 %v2189_v54, %v6475_v19  ;;  %v2279_v59 = vadd.f32 %v2278_v56, %v6477_v53  ;;  %v1931_v13 = vpop.f32.mrf.mxu1  ;;  %5206 = vtanh.f32 %v1930_v51 }
 0x40c   : > { %v1932_v63 = vadd.f32 %v6427_v38, %v1931_v13 }
 0x40d   : > { %v4786_v57 = vmul.f32 -1.442695, %v2190_v35  ;;  %v4787_v58 = vmul.f32 -1.442695, %v2279_v59  ;;  %v2369_v16 = vpop.f32.mrf.mxu0 }
 0x40e   : > { %5208 = vtanh.f32 %v1932_v63  ;;  %v2370_v60 = vadd.f32 %v2369_v16, %v6472_v39 }
 0x40f   : > { %5210 = vpow2.f32 %v4786_v57 }
 0x410   : > { %v5205_v31 = vpop.eup %5204  ;;  %5212 = vpow2.f32 %v4787_v58  ;;  %v4791_v21 = vmul.f32 -1.442695, %v2370_v60 }
 0x411   : > { %v6484_v29 = vadd.f32 1.0, %v5205_v31  ;;  %v5207_v1 = vpop.eup %5206 }
 0x412   : > { %5214 = vpow2.f32 %v4791_v21  ;;  %v2191_v10 = vpop.f32.mrf.mxu3  ;;  %v2280_v0 = vpop.f32.mrf.mxu2 }
 0x413   : > { %5216 = vrcp.f32 %v6484_v29  ;;  %v1934_v28 = vpop.f32.mrf.mxu1  ;;  %v2192_v7 = vadd.f32 %v2191_v10, %v6475_v19  ;;  %v2281_v8 = vadd.f32 %v2280_v0, %v6477_v53  ;;  %v2870_v49 = vand.u32 2147483647, %v6484_v29 }
 0x414   : > { %v5209_v4 = vpop.eup %5208  ;;  %v1935_v32 = vadd.f32 %v6427_v38, %v1934_v28  ;;  %v2872_v18 = vand.u32 2147483648, %v6484_v29  ;;  %vm2866_vm4 = vweird.f32 %v6484_v29 }
 0x415   : > { %v5211_v2 = vpop.eup %5210  ;;  %v2372_v46 = vpop.f32.mrf.mxu0  ;;  %v2005_v3 = vpack.c.bf16 %v5209_v4, %v5207_v1  ;;  %v4789_v11 = vmul.f32 -1.442695, %v2192_v7  ;;  %v4790_v52 = vmul.f32 -1.442695, %v2281_v8  ;;  %vm6501_vm5 = vcmp.eq.f32.partialorder %v2870_v49, 8.507059e+37 }
 0x416   : > { %v5213_v9 = vpop.eup %5212  ;;  %v6490_v55 = vadd.f32 1.0, %v5211_v2  ;;  %v2373_v15 = vadd.f32 %v2372_v46, %v6472_v39  ;;  %v2873_v27 = vor.u32 1.1754944e-38, %v2872_v18 }
 0x417   : > { %v6493_v12 = vadd.f32 1.0, %v5213_v9  ;;  %2233 = vmatmul.bf16.gmra.mxu3 %v2005_v3  ;;  %2322 = vmatmul.bf16.gmra.mxu2 %v2005_v3 }
 0x418   : > { %v5215_v45 = vpop.eup %5214  ;;  %5218 = vrcp.f32 %v6490_v55  ;;  %2411 = vmatmul.bf16.gmra.mxu0 %v2005_v3  ;;  %v2840_v61 = vand.u32 2147483647, %v6490_v55  ;;  %v2842_v36 = vand.u32 2147483648, %v6490_v55  ;;  %v4794_v44 = vmul.f32 -1.442695, %v2373_v15 }
 0x419   : > { %v5217_v17 = vpop.eup %5216  ;;  %5220 = vrcp.f32 %v6493_v12  ;;  %v6507_v24 = vadd.f32 1.0, %v5215_v45  ;;  %vm2836_vm6 = vweird.f32 %v6490_v55  ;;  %v2855_v30 = vand.u32 2147483647, %v6493_v12 }
 0x41a   : > { %v2862_v5 = vmul.f32 %v5217_v17, %v6484_v29  ;;  %5222 = vtanh.f32 %v1935_v32  ;;  %v2194_v23 = vpop.f32.mrf.mxu3  ;;  %v2283_v26 = vpop.f32.mrf.mxu2  ;;  %vm2867_vm7 = vweird.f32 %v5217_v17  ;;  %vm2851_vm8 = vweird.f32 %v6493_v12 }
 0x41b   : > { %5224 = vpow2.f32 %v4789_v11  ;;  %v2195_v43 = vadd.f32 %v2194_v23, %v6475_v19  ;;  %v2284_v37 = vadd.f32 %v2283_v26, %v6477_v53  ;;  %vm6516_vm9 = vcmp.eq.f32.partialorder %v2840_v61, 8.507059e+37  ;;  %vm2868_vm10 = vmor %vm2866_vm4, %vm2867_vm7  ;;  %v1936_v4 = vpop.f32.mrf.mxu1 }
 0x41c   : > { %v2863_v48 = vsub.f32 1.0, %v2862_v5  ;;  %5226 = vpow2.f32 %v4790_v52  ;;  %v2857_v42 = vand.u32 2147483648, %v6493_v12  ;;  %v2843_v47 = vor.u32 1.1754944e-38, %v2842_v36 }
 0x41d   : > { %5228 = vrcp.f32 %v6507_v24  ;;  %v4792_v33 = vmul.f32 -1.442695, %v2195_v43  ;;  %v2915_v54 = vand.u32 2147483647, %v6507_v24  ;;  %v2917_v56 = vand.u32 2147483648, %v6507_v24  ;;  %v2374_v3 = vpop.f32.mrf.mxu0 }
 0x41e   : > { %v5219_v62 = vpop.eup %5218  ;;  %v2864_v20 = vmul.f32 %v5217_v17, %v2863_v48  ;;  %5230 = vpow2.f32 %v4794_v44  ;;  %v4793_v35 = vmul.f32 -1.442695, %v2284_v37  ;;  %vm6546_vm13 = vcmp.eq.f32.partialorder %v2855_v30, 8.507059e+37 }
 0x41f   : > { %v5221_v25 = vpop.eup %5220  ;;  %v2832_v34 = vmul.f32 %v5219_v62, %v6490_v55  ;;  %5232 = vpow2.f32 %v4792_v33  ;;  %vm2837_vm11 = vweird.f32 %v5219_v62  ;;  %v2858_v28 = vor.u32 1.1754944e-38, %v2857_v42 }
 0x420   : > { %v6521_v41 = vpop.eup %5222  ;;  %v2865_v6 = vadd.f32 %v5217_v17, %v2864_v20  ;;  %v2847_v50 = vmul.f32 %v5221_v25, %v6493_v12  ;;  %5234 = vpow2.f32 %v4793_v35  ;;  %vm2852_vm12 = vweird.f32 %v5221_v25  ;;  %vm2838_vm15 = vmor %vm2836_vm6, %vm2837_vm11 }
 0x421   : > { %v5225_v14 = vpop.eup %5224  ;;  %v2833_v51 = vsub.f32 1.0, %v2832_v34  ;;  %vm2911_vm14 = vweird.f32 %v6507_v24  ;;  %vm6554_vm0 = vcmp.eq.f32.partialorder %v2915_v54, 8.507059e+37  ;;  %vm2853_vm2 = vmor %vm2851_vm8, %vm2852_vm12  ;;  %v2918_v49 = vor.u32 1.1754944e-38, %v2917_v56 }
 0x422   : > { %v5227_v59 = vpop.eup %5226  ;;  %v2869_v13 = vsel %vm2868_vm10, %v5217_v17, %v2865_v6  ;;  %v2848_v63 = vsub.f32 1.0, %v2847_v50  ;;  %v6536_v57 = vadd.f32 1.0, %v5225_v14  ;;  %v1937_v61 = vadd.f32 %v6427_v38, %v1936_v4  ;;  %v2196_v20 = vpop.f32.mrf.mxu3 }
 0x423   : > { %v5229_v58 = vpop.eup %5228  ;;  %v2874_v16 = vsel %vm6501_vm5, %v2873_v27, %v2869_v13  ;;  %v2834_v60 = vmul.f32 %v5219_v62, %v2833_v51  ;;  %v6540_v31 = vadd.f32 1.0, %v5227_v59  ;;  %v2375_v36 = vadd.f32 %v2374_v3, %v6472_v39  ;;  %v2285_v33 = vpop.f32.mrf.mxu2 }
 0x424   : > { %4273 = vst.msk [vmem:[%s6529_s18 + $0x10] sm:$0xff] %vm790_vm1, %v2874_v16  ;;  %v2849_v21 = vmul.f32 %v5221_v25, %v2848_v63  ;;  %v2907_v29 = vmul.f32 %v5229_v58, %v6507_v24  ;;  %5236 = vrcp.f32 %v6536_v57  ;;  %v5231_v10 = vpop.eup %5230  ;;  %v2885_v55 = vand.u32 2147483647, %v6536_v57  ;;  %v1939_v51 = vpop.f32.mrf.mxu1 }
 0x425   : > { %v2835_v0 = vadd.f32 %v5219_v62, %v2834_v60  ;;  %v5233_v7 = vpop.eup %5232  ;;  %5238 = vrcp.f32 %v6540_v31  ;;  %v2887_v32 = vand.u32 2147483648, %v6536_v57  ;;  %vm2912_vm3 = vweird.f32 %v5229_v58  ;;  %v2377_v35 = vpop.f32.mrf.mxu0 }
 0x426   : > { %v2850_v8 = vadd.f32 %v5221_v25, %v2849_v21  ;;  %v2908_v2 = vsub.f32 1.0, %v2907_v29  ;;  %v5235_v15 = vpop.eup %5234  ;;  %v2900_v12 = vand.u32 2147483647, %v6540_v31  ;;  %v6570_v18 = vadd.f32 1.0, %v5231_v10  ;;  %vm2913_vm5 = vmor %vm2911_vm14, %vm2912_vm3 }
 0x427   : > { %v2839_v9 = vsel %vm2838_vm15, %v5219_v62, %v2835_v0  ;;  %v6572_v5 = vadd.f32 1.0, %v5233_v7  ;;  %vm2881_vm4 = vweird.f32 %v6536_v57  ;;  %vm6581_vm6 = vcmp.eq.f32.partialorder %v2885_v55, 8.507059e+37 }
 0x428   : > { %v2844_v11 = vsel %vm6516_vm9, %v2843_v47, %v2839_v9  ;;  %v2854_v45 = vsel %vm2853_vm2, %v5221_v25, %v2850_v8  ;;  %v2909_v52 = vmul.f32 %v5229_v58, %v2908_v2  ;;  %v2888_v44 = vor.u32 1.1754944e-38, %v2887_v32 }
 0x429   : > { %4271 = vst [vmem:[%s6529_s18] sm:$0xff] %v2844_v11  ;;  %v2859_v17 = vsel %vm6546_vm13, %v2858_v28, %v2854_v45  ;;  %vm2896_vm7 = vweird.f32 %v6540_v31  ;;  %5240 = vrcp.f32 %v6570_v18  ;;  %v6587_v43 = vadd.f32 1.0, %v5235_v15 }
 0x42a   : > { %v5237_v22 = vpop.eup %5236  ;;  %4272 = vst [vmem:[%s6529_s18 + $0x8] sm:$0xff] %v2859_v17  ;;  %v2910_v23 = vadd.f32 %v5229_v58, %v2909_v52  ;;  %v2902_v62 = vand.u32 2147483648, %v6540_v31  ;;  %v2962_v24 = vand.u32 2147483648, %v6570_v18  ;;  %5242 = vrcp.f32 %v6572_v5  ;;  %v2199_v52 = vpop.f32.mrf.mxu3 }
 0x42b   : > { %v2877_v26 = vmul.f32 %v5237_v22, %v6536_v57  ;;  %v5239_v27 = vpop.eup %5238  ;;  %vm6595_vm8 = vcmp.eq.f32.partialorder %v2900_v12, 8.507059e+37  ;;  %vm2882_vm9 = vweird.f32 %v5237_v22  ;;  %v2960_v42 = vand.u32 2147483647, %v6570_v18  ;;  %v2288_v15 = vpop.f32.mrf.mxu2 }
 0x42c   : > { %v2914_v30 = vsel %vm2913_vm5, %v5229_v58, %v2910_v23  ;;  %v2892_v34 = vmul.f32 %v5239_v27, %v6540_v31  ;;  %v2930_v6 = vand.u32 2147483647, %v6572_v5  ;;  %5244 = vtanh.f32 %v1937_v61  ;;  %vm2883_vm13 = vmor %vm2881_vm4, %vm2882_vm9 }
 0x42d   : > { %v2919_v37 = vsel %vm6554_vm0, %v2918_v49, %v2914_v30  ;;  %v2878_v25 = vsub.f32 1.0, %v2877_v26  ;;  %v2932_v14 = vand.u32 2147483648, %v6572_v5  ;;  %5246 = vrcp.f32 %v6587_v43 }
 0x42e   : > { %4276 = vst.msk [vmem:[%s6529_s18 + $0x28] sm:$0xff] %vm790_vm1, %v2919_v37  ;;  %v2893_v50 = vsub.f32 1.0, %v2892_v34  ;;  %vm2897_vm10 = vweird.f32 %v5239_v27  ;;  %v2903_v54 = vor.u32 1.1754944e-38, %v2902_v62  ;;  %vm2956_vm11 = vweird.f32 %v6570_v18  ;;  %v1941_v62 = vpop.f32.mrf.mxu1 }
 0x42f   : > { %v2879_v47 = vmul.f32 %v5237_v22, %v2878_v25  ;;  %v6606_v56 = vor.u32 1.1754944e-38, %v2962_v24  ;;  %v5241_v59 = vpop.eup %5240  ;;  %vm2926_vm12 = vweird.f32 %v6572_v5  ;;  %v4797_v58 = vmul.f32 -1.442695, %v2375_v36  ;;  %vm2898_vm2 = vmor %vm2896_vm7, %vm2897_vm10 }
 0x430   : > { %v2894_v63 = vmul.f32 %v5239_v27, %v2893_v50  ;;  %v6609_v16 = vpop.eup %5242  ;;  %v2952_v60 = vmul.f32 %v5241_v59, %v6570_v18  ;;  %vm6615_vm14 = vcmp.eq.f32.partialorder %v2960_v42, 8.507059e+37  ;;  %v2933_v29 = vor.u32 1.1754944e-38, %v2932_v14 }
 0x431   : > { %v2880_v13 = vadd.f32 %v5237_v22, %v2879_v47  ;;  %v2945_v10 = vand.u32 2147483647, %v6587_v43  ;;  %v2947_v0 = vand.u32 2147483648, %v6587_v43  ;;  %vm2957_vm15 = vweird.f32 %v5241_v59 }
 0x432   : > { %v2895_v28 = vadd.f32 %v5239_v27, %v2894_v63  ;;  %v2922_v4 = vmul.f32 %v6609_v16, %v6572_v5  ;;  %vm6623_vm0 = vcmp.eq.f32.partialorder %v2930_v6, 8.507059e+37  ;;  %v5245_v7 = vpop.eup %5244  ;;  %v2953_v2 = vsub.f32 1.0, %v2952_v60 }
 0x433   : > { %v2884_v1 = vsel %vm2883_vm13, %v5237_v22, %v2880_v13  ;;  %vm2941_vm3 = vweird.f32 %v6587_v43  ;;  %5248 = vpow2.f32 %v4797_v58  ;;  %v2197_v46 = vadd.f32 %v2196_v20, %v6475_v19  ;;  %v5247_v3 = vpop.eup %5246  ;;  %v2201_v58 = vpop.f32.mrf.mxu3 }
 0x434   : > { %v2889_v8 = vsel %vm6581_vm6, %v2888_v44, %v2884_v1  ;;  %v2899_v9 = vsel %vm2898_vm2, %v5239_v27, %v2895_v28  ;;  %v2923_v49 = vsub.f32 1.0, %v2922_v4  ;;  %vm2927_vm4 = vweird.f32 %v6609_v16  ;;  %vm6648_vm6 = vmor %vm2956_vm11, %vm2957_vm15 }
 0x435   : > { %4274 = vst [vmem:[%s6529_s18 + $0x18] sm:$0xff] %v2889_v8  ;;  %v2286_v55 = vadd.f32 %v2285_v33, %v6477_v53  ;;  %v2904_v32 = vsel %vm6595_vm8, %v2903_v54, %v2899_v9  ;;  %v2954_v31 = vmul.f32 %v5241_v59, %v2953_v2  ;;  %v2937_v11 = vmul.f32 %v5247_v3, %v6587_v43  ;;  %vm2928_vm7 = vmor %vm2926_vm12, %vm2927_vm4  ;;  %v2379_v33 = vpop.f32.mrf.mxu0 }
 0x436   : > { %v1940_v45 = vadd.f32 %v6427_v38, %v1939_v51  ;;  %4275 = vst [vmem:[%s6529_s18 + $0x20] sm:$0xff] %v2904_v32  ;;  %v2924_v17 = vmul.f32 %v6609_v16, %v2923_v49  ;;  %vm2942_vm5 = vweird.f32 %v5247_v3  ;;  %v4795_v12 = vmul.f32 -1.442695, %v2197_v46 }
 0x437   : > { %v4796_v22 = vmul.f32 -1.442695, %v2286_v55  ;;  %v2955_v23 = vadd.f32 %v5241_v59, %v2954_v31  ;;  %v2938_v61 = vsub.f32 1.0, %v2937_v11  ;;  %v2378_v36 = vadd.f32 %v2377_v35, %v6472_v39  ;;  %vm2943_vm8 = vmor %vm2941_vm3, %vm2942_vm5 }
 0x438   : > { %v2006_v26 = vpack.c.bf16 %v5245_v7, %v6521_v41  ;;  %v2925_v44 = vadd.f32 %v6609_v16, %v2924_v17  ;;  %5250 = vpow2.f32 %v4795_v12  ;;  %v2200_v27 = vadd.f32 %v2199_v52, %v6475_v19 }
 0x439   : > { %v2289_v30 = vadd.f32 %v2288_v15, %v6477_v53  ;;  %v5249_v24 = vpop.eup %5248  ;;  %v2959_v41 = vsel %vm6648_vm6, %v5241_v59, %v2955_v23  ;;  %v2939_v18 = vmul.f32 %v5247_v3, %v2938_v61  ;;  %5252 = vpow2.f32 %v4796_v22 }
 0x43a   : > { %v4800_v20 = vmul.f32 -1.442695, %v2378_v36  ;;  %2238 = vmatmul.bf16.gmra.mxu3 %v2006_v26  ;;  %2327 = vmatmul.bf16.gmra.mxu2 %v2006_v26  ;;  %v2964_v37 = vsel %vm6615_vm14, %v6606_v56, %v2959_v41  ;;  %v2929_v25 = vsel %vm2928_vm7, %v6609_v16, %v2925_v44  ;;  %v6665_v34 = vadd.f32 1.0, %v5249_v24  ;;  %v2290_v16 = vpop.f32.mrf.mxu2 }
 0x43b   : > { %2416 = vmatmul.bf16.gmra.mxu0 %v2006_v26  ;;  %v4798_v40 = vmul.f32 -1.442695, %v2200_v27  ;;  %4279 = vst.msk [vmem:[%s6529_s18 + $0x40] sm:$0xff] %vm790_vm1, %v2964_v37  ;;  %v2934_v5 = vsel %vm6623_vm0, %v2933_v29, %v2929_v25  ;;  %v2940_v42 = vadd.f32 %v5247_v3, %v2939_v18  ;;  %v4799_v6 = vmul.f32 -1.442695, %v2289_v30 }
 0x43c   : > { %5254 = vpow2.f32 %v4800_v20  ;;  %4277 = vst [vmem:[%s6529_s18 + $0x30] sm:$0xff] %v2934_v5  ;;  %vm2946_vm9 = vcmp.eq.f32.partialorder %v2945_v10, 8.507059e+37  ;;  %v2948_v47 = vor.u32 1.1754944e-38, %v2947_v0  ;;  %v1942_v14 = vadd.f32 %v6427_v38, %v1941_v62  ;;  %v1944_v0 = vpop.f32.mrf.mxu1 }
 0x43d   : > { %5256 = vrcp.f32 %v6665_v34  ;;  %v2944_v50 = vsel %vm2943_vm8, %v5247_v3, %v2940_v42  ;;  %v2380_v51 = vadd.f32 %v2379_v33, %v6472_v39  ;;  %v3007_v35 = vand.u32 2147483648, %v6665_v34  ;;  %v2382_v2 = vpop.f32.mrf.mxu0 }
 0x43e   : > { %5258 = vpow2.f32 %v4798_v40  ;;  %v5251_v54 = vpop.eup %5250  ;;  %v2949_v56 = vsel %vm2946_vm9, %v2948_v47, %v2944_v50  ;;  %v3005_v43 = vand.u32 2147483647, %v6665_v34  ;;  %vm3001_vm10 = vweird.f32 %v6665_v34  ;;  %v2204_v50 = vpop.f32.mrf.mxu3 }
 0x43f   : > { %5260 = vpow2.f32 %v4799_v6  ;;  %v5253_v59 = vpop.eup %5252  ;;  %4278 = vst [vmem:[%s6529_s18 + $0x38] sm:$0xff] %v2949_v56  ;;  %v6681_v13 = vadd.f32 1.0, %v5251_v54  ;;  %v4803_v21 = vmul.f32 -1.442695, %v2380_v51  ;;  %v3008_v10 = vor.u32 1.1754944e-38, %v3007_v35 }
 0x440   : > { %5262 = vtanh.f32 %v1940_v45  ;;  %v6683_v63 = vadd.f32 1.0, %v5253_v59  ;;  %vm6689_vm11 = vcmp.eq.f32.partialorder %v3005_v43, 8.507059e+37  ;;  %v2202_v7 = vadd.f32 %v2201_v58, %v6475_v19 }
 0x441   : > { %5264 = vtanh.f32 %v1942_v14  ;;  %v2975_v57 = vand.u32 2147483647, %v6681_v13  ;;  %v6696_v8 = vadd.f32 %v2290_v16, %v6477_v53  ;;  %v2977_v3 = vand.u32 2147483648, %v6681_v13 }
 0x442   : > { %v5255_v60 = vpop.eup %5254  ;;  %5266 = vrcp.f32 %v6681_v13  ;;  %v2992_v9 = vand.u32 2147483648, %v6683_v63  ;;  %v2990_v11 = vand.u32 2147483647, %v6683_v63  ;;  %v6708_v45 = vadd.f32 %v6427_v38, %v1944_v0 }
 0x443   : > { %v5257_v29 = vpop.eup %5256  ;;  %5268 = vrcp.f32 %v6683_v63  ;;  %v6700_v49 = vadd.f32 1.0, %v5255_v60  ;;  %vm2971_vm12 = vweird.f32 %v6681_v13  ;;  %v6717_v17 = vadd.f32 %v2382_v2, %v6472_v39  ;;  %v2293_v2 = vpop.f32.mrf.mxu2 }
 0x444   : > { %v5259_v1 = vpop.eup %5258  ;;  %v2997_v28 = vmul.f32 %v5257_v29, %v6665_v34  ;;  %5270 = vpow2.f32 %v4803_v21  ;;  %vm3002_vm13 = vweird.f32 %v5257_v29  ;;  %vm2986_vm14 = vweird.f32 %v6683_v63 }
 0x445   : > { %v5261_v46 = vpop.eup %5260  ;;  %v6702_v55 = vadd.f32 1.0, %v5259_v1  ;;  %5272 = vrcp.f32 %v6700_v49  ;;  %v3052_v23 = vand.u32 2147483648, %v6700_v49  ;;  %vm6723_vm15 = vcmp.eq.f32.partialorder %v2975_v57, 8.507059e+37  ;;  %vm3003_vm2 = vmor %vm3001_vm10, %vm3002_vm13 }
 0x446   : > { %v6704_v32 = vpop.eup %5262  ;;  %v2998_v31 = vsub.f32 1.0, %v2997_v28  ;;  %v6714_v15 = vadd.f32 1.0, %v5261_v46  ;;  %v2978_v26 = vor.u32 1.1754944e-38, %v2977_v3  ;;  %v2993_v48 = vor.u32 1.1754944e-38, %v2992_v9 }
 0x447   : > { %v6710_v52 = vpop.eup %5264  ;;  %5274 = vrcp.f32 %v6702_v55  ;;  %vm6728_vm0 = vcmp.eq.f32.partialorder %v2990_v11, 8.507059e+37  ;;  %v3050_v62 = vand.u32 2147483647, %v6700_v49  ;;  %v4801_v24 = vmul.f32 -1.442695, %v2202_v7 }
 0x448   : > { %v5267_v12 = vpop.eup %5266  ;;  %v2999_v22 = vmul.f32 %v5257_v29, %v2998_v31  ;;  %v3020_v18 = vand.u32 2147483647, %v6702_v55  ;;  %v3022_v20 = vand.u32 2147483648, %v6702_v55  ;;  %5276 = vrcp.f32 %v6714_v15 }
 0x449   : > { %v5269_v38 = vpop.eup %5268  ;;  %v2967_v61 = vmul.f32 %v5267_v12, %v6681_v13  ;;  %vm2972_vm3 = vweird.f32 %v5267_v12  ;;  %vm3046_vm4 = vweird.f32 %v6700_v49  ;;  %v3053_v40 = vor.u32 1.1754944e-38, %v3052_v23 }
 0x44a   : > { %v3000_v44 = vadd.f32 %v5257_v29, %v2999_v22  ;;  %v2982_v27 = vmul.f32 %v5269_v38, %v6683_v63  ;;  %v5271_v33 = vpop.eup %5270  ;;  %vm3016_vm5 = vweird.f32 %v6702_v55  ;;  %v3037_v6 = vand.u32 2147483648, %v6714_v15  ;;  %vm2973_vm9 = vmor %vm2971_vm12, %vm2972_vm3 }
 0x44b   : > { %v2968_v41 = vsub.f32 1.0, %v2967_v61  ;;  %v5273_v5 = vpop.eup %5272  ;;  %v6743_v47 = vadd.f32 1.0, %v5271_v33  ;;  %vm2987_vm6 = vweird.f32 %v5269_v38  ;;  %vm6748_vm7 = vcmp.eq.f32.partialorder %v3050_v62, 8.507059e+37 }
 0x44c   : > { %v3004_v37 = vsel %vm3003_vm2, %v5257_v29, %v3000_v44  ;;  %v2983_v25 = vsub.f32 1.0, %v2982_v27  ;;  %v3042_v54 = vmul.f32 %v5273_v5, %v6700_v49  ;;  %v3035_v35 = vand.u32 2147483647, %v6714_v15  ;;  %vm2988_vm13 = vmor %vm2986_vm14, %vm2987_vm6  ;;  %v2384_v44 = vpop.f32.mrf.mxu0  ;;  %v2206_v27 = vpop.f32.mrf.mxu3 }
 0x44d   : > { %v3009_v34 = vsel %vm6689_vm11, %v3008_v10, %v3004_v37  ;;  %v2969_v42 = vmul.f32 %v5267_v12, %v2968_v41  ;;  %v5275_v14 = vpop.eup %5274  ;;  %vm6754_vm8 = vcmp.eq.f32.partialorder %v3020_v18, 8.507059e+37  ;;  %v3023_v16 = vor.u32 1.1754944e-38, %v3022_v20 }
 0x44e   : > { %4282 = vst.msk [vmem:[%s6529_s18 + $0x58] sm:$0xff] %vm790_vm1, %v3009_v34  ;;  %v2984_v51 = vmul.f32 %v5269_v38, %v2983_v25  ;;  %v3012_v43 = vmul.f32 %v5275_v14, %v6702_v55  ;;  %v3043_v21 = vsub.f32 1.0, %v3042_v54  ;;  %vm3047_vm10 = vweird.f32 %v5273_v5  ;;  %v6763_v29 = vpop.eup %5276 }
 0x44f   : > { %v2970_v59 = vadd.f32 %v5267_v12, %v2969_v42  ;;  %vm3031_vm11 = vweird.f32 %v6714_v15  ;;  %5278 = vrcp.f32 %v6743_v47  ;;  %vm3017_vm2 = vweird.f32 %v5275_v14 }
 0x450   : > { %v2985_v60 = vadd.f32 %v5269_v38, %v2984_v51  ;;  %v3013_v0 = vsub.f32 1.0, %v3012_v43  ;;  %v3038_v13 = vor.u32 1.1754944e-38, %v3037_v6  ;;  %v3044_v4 = vmul.f32 %v5273_v5, %v3043_v21 }
 0x451   : > { %v2974_v10 = vsel %vm2973_vm9, %v5267_v12, %v2970_v59  ;;  %v3027_v57 = vmul.f32 %v6763_v29, %v6714_v15  ;;  %vm6772_vm12 = vcmp.eq.f32.partialorder %v3035_v35, 8.507059e+37  ;;  %v3095_v3 = vand.u32 2147483647, %v6743_v47 }
 0x452   : > { %v2979_v1 = vsel %vm6723_vm15, %v2978_v26, %v2974_v10  ;;  %v2989_v28 = vsel %vm2988_vm13, %v5269_v38, %v2985_v60  ;;  %v3014_v46 = vmul.f32 %v5275_v14, %v3013_v0  ;;  %v3097_v9 = vand.u32 2147483648, %v6743_v47  ;;  %vm3048_vm15 = vmor %vm3046_vm4, %vm3047_vm10 }
 0x453   : > { %4280 = vst [vmem:[%s6529_s18 + $0x48] sm:$0xff] %v2979_v1  ;;  %v2994_v63 = vsel %vm6728_vm0, %v2993_v48, %v2989_v28  ;;  %v3045_v31 = vadd.f32 %v5273_v5, %v3044_v4  ;;  %v3028_v11 = vsub.f32 1.0, %v3027_v57  ;;  %vm3032_vm14 = vweird.f32 %v6763_v29  ;;  %vm3018_vm0 = vmor %vm3016_vm5, %vm3017_vm2 }
 0x454   : > { %4281 = vst [vmem:[%s6529_s18 + $0x50] sm:$0xff] %v2994_v63  ;;  %5280 = vpow2.f32 %v4801_v24  ;;  %v3015_v12 = vadd.f32 %v5275_v14, %v3014_v46  ;;  %v4802_v22 = vmul.f32 -1.442695, %v6696_v8  ;;  %v4806_v23 = vmul.f32 -1.442695, %v6717_v17  ;;  %v1946_v8 = vpop.f32.mrf.mxu1  ;;  %vm3033_vm4 = vmor %vm3031_vm11, %vm3032_vm14 }
 0x455   : > { %5282 = vtanh.f32 %v6708_v45  ;;  %v5279_v38 = vpop.eup %5278  ;;  %v3049_v61 = vsel %vm3048_vm15, %v5273_v5, %v3045_v31  ;;  %v3029_v36 = vmul.f32 %v6763_v29, %v3028_v11  ;;  %v2007_v49 = vpack.c.bf16 %v6710_v52, %v6704_v32  ;;  %v6813_v24 = vld [vmem:[%s8185_s10] ss:$0 sm:$0xff] }
 0x456   : > { %v2205_v26 = vadd.f32 %v2204_v50, %v6475_v19  ;;  %v3054_v45 = vsel %vm6748_vm7, %v3053_v40, %v3049_v61  ;;  %v3019_v48 = vsel %vm3018_vm0, %v5275_v14, %v3015_v12  ;;  %v3087_v17 = vmul.f32 %v5279_v38, %v6743_v47  ;;  %v2295_v50 = vpop.f32.mrf.mxu2 }
 0x457   : > { %vm3092_vm3 = vweird.f32 %v5279_v38  ;;  %4285 = vst.msk [vmem:[%s6529_s18 + $0x70] sm:$0xff] %vm790_vm1, %v3054_v45  ;;  %v3024_v55 = vsel %vm6754_vm8, %v3023_v16, %v3019_v48  ;;  %v3030_v32 = vadd.f32 %v6763_v29, %v3029_v36  ;;  %5284 = vpow2.f32 %v4802_v22  ;;  %2243 = vmatmul.bf16.gmra.mxu3 %v2007_v49  ;;  %2332 = vmatmul.bf16.gmra.mxu2 %v2007_v49 }
 0x458   : > { %v4804_v52 = vmul.f32 -1.442695, %v2205_v26  ;;  %4283 = vst [vmem:[%s6529_s18 + $0x60] sm:$0xff] %v3024_v55  ;;  %v3088_v30 = vsub.f32 1.0, %v3087_v17  ;;  %5286 = vpow2.f32 %v4806_v23  ;;  %2421 = vmatmul.bf16.gmra.mxu0 %v2007_v49  ;;  %v2294_v62 = vadd.f32 %v2293_v2, %v6477_v53  ;;  %v2387_v17 = vpop.f32.mrf.mxu0 }
 0x459   : > { %v1947_v41 = vadd.f32 %v6813_v24, %v1946_v8  ;;  %v3034_v20 = vsel %vm3033_vm4, %v6763_v29, %v3030_v32  ;;  %v2385_v15 = vadd.f32 %v2384_v44, %v6472_v39  ;;  %v2207_v33 = vadd.f32 %v2206_v27, %v6475_v19 }
 0x45a   : > { %v5281_v18 = vpop.eup %5280  ;;  %5288 = vpow2.f32 %v4804_v52  ;;  %v3039_v25 = vsel %vm6772_vm12, %v3038_v13, %v3034_v20  ;;  %v3089_v40 = vmul.f32 %v5279_v38, %v3088_v30  ;;  %v4805_v34 = vmul.f32 -1.442695, %v2294_v62  ;;  %v2209_v62 = vpop.f32.mrf.mxu3 }
 0x45b   : > { %v6819_v37 = vpop.eup %5282  ;;  %v6823_v5 = vadd.f32 1.0, %v5281_v18  ;;  %4284 = vst [vmem:[%s6529_s18 + $0x68] sm:$0xff] %v3039_v25  ;;  %5290 = vtanh.f32 %v1947_v41  ;;  %v4809_v42 = vmul.f32 -1.442695, %v2385_v15  ;;  %v4807_v6 = vmul.f32 -1.442695, %v2207_v33 }
 0x45c   : > { %v3090_v14 = vadd.f32 %v5279_v38, %v3089_v40  ;;  %vm3091_vm5 = vweird.f32 %v6743_v47  ;;  %vm3096_vm7 = vcmp.eq.f32.partialorder %v3095_v3, 8.507059e+37  ;;  %v3098_v54 = vor.u32 1.1754944e-38, %v3097_v9  ;;  %v1949_v29 = vpop.f32.mrf.mxu1 }
 0x45d   : > { %5292 = vrcp.f32 %v6823_v5  ;;  %v5285_v51 = vpop.eup %5284  ;;  %vm3093_vm6 = vmor %vm3091_vm5, %vm3092_vm3  ;;  %v2296_v43 = vadd.f32 %v2295_v50, %v6477_v53  ;;  %v3065_v47 = vand.u32 2147483647, %v6823_v5  ;;  %v3067_v21 = vand.u32 2147483648, %v6823_v5 }
 0x45e   : > { %5294 = vpow2.f32 %v4805_v34  ;;  %v5287_v56 = vpop.eup %5286  ;;  %v3094_v35 = vsel %vm3093_vm6, %v5279_v38, %v3090_v14  ;;  %v6829_v59 = vadd.f32 1.0, %v5285_v51  ;;  %vm3061_vm8 = vweird.f32 %v6823_v5 }
 0x45f   : > { %5296 = vpow2.f32 %v4809_v42  ;;  %v3099_v16 = vsel %vm3096_vm7, %v3098_v54, %v3094_v35  ;;  %v6833_v60 = vadd.f32 1.0, %v5287_v56  ;;  %v4808_v28 = vmul.f32 -1.442695, %v2296_v43 }
 0x460   : > { %v5289_v58 = vpop.eup %5288  ;;  %5298 = vpow2.f32 %v4807_v6  ;;  %4288 = vst.msk [vmem:[%s6529_s18 + $0x88] sm:$0xff] %vm790_vm1, %v3099_v16  ;;  %v3082_v13 = vand.u32 2147483648, %v6829_v59  ;;  %vm6847_vm9 = vcmp.eq.f32.partialorder %v3065_v47, 8.507059e+37  ;;  %v3080_v2 = vand.u32 2147483647, %v6829_v59  ;;  %v6889_v6 = vpop.f32.mrf.mxu2 }
 0x461   : > { %5300 = vrcp.f32 %v6829_v59  ;;  %v6839_v10 = vpop.eup %5290  ;;  %v6844_v1 = vadd.f32 1.0, %v5289_v58  ;;  %v1950_v63 = vadd.f32 %v6813_v24, %v1949_v29  ;;  %v3068_v3 = vor.u32 1.1754944e-38, %v3067_v21 }
 0x462   : > { %5302 = vrcp.f32 %v6833_v60  ;;  %v3140_v9 = vand.u32 2147483647, %v6833_v60  ;;  %v3142_v31 = vand.u32 2147483648, %v6833_v60  ;;  %vm3076_vm10 = vweird.f32 %v6829_v59 }
 0x463   : > { %v5293_v0 = vpop.eup %5292  ;;  %5304 = vrcp.f32 %v6844_v1  ;;  %v3083_v61 = vor.u32 1.1754944e-38, %v3082_v13  ;;  %vm3136_vm13 = vweird.f32 %v6833_v60  ;;  %v3112_v36 = vand.u32 2147483648, %v6844_v1 }
 0x464   : > { %v5295_v4 = vpop.eup %5294  ;;  %v3057_v57 = vmul.f32 %v5293_v0, %v6823_v5  ;;  %vm3062_vm11 = vweird.f32 %v5293_v0  ;;  %5306 = vpow2.f32 %v4808_v28  ;;  %vm6864_vm2 = vcmp.eq.f32.partialorder %v3080_v2, 8.507059e+37  ;;  %v1951_v21 = vpop.f32.mrf.mxu1 }
 0x465   : > { %v5297_v46 = vpop.eup %5296  ;;  %v6857_v22 = vadd.f32 1.0, %v5295_v4  ;;  %v3110_v48 = vand.u32 2147483647, %v6844_v1  ;;  %vm6871_vm12 = vcmp.eq.f32.partialorder %v3140_v9, 8.507059e+37  ;;  %v3143_v55 = vor.u32 1.1754944e-38, %v3142_v31  ;;  %vm3063_vm15 = vmor %vm3061_vm8, %vm3062_vm11  ;;  %v2389_v31 = vpop.f32.mrf.mxu0 }
 0x466   : > { %v5299_v11 = vpop.eup %5298  ;;  %v3058_v12 = vsub.f32 1.0, %v3057_v57  ;;  %v6859_v23 = vadd.f32 1.0, %v5297_v46  ;;  %vm3106_vm14 = vweird.f32 %v6844_v1  ;;  %v3113_v20 = vor.u32 1.1754944e-38, %v3112_v36 }
 0x467   : > { %v5301_v38 = vpop.eup %5300  ;;  %5308 = vrcp.f32 %v6857_v22  ;;  %v6877_v30 = vadd.f32 1.0, %v5299_v11  ;;  %v3125_v15 = vand.u32 2147483647, %v6857_v22  ;;  %v2388_v33 = vadd.f32 %v2387_v17, %v6472_v39 }
 0x468   : > { %v5303_v49 = vpop.eup %5302  ;;  %v3059_v26 = vmul.f32 %v5293_v0, %v3058_v12  ;;  %v3072_v8 = vmul.f32 %v5301_v38, %v6829_v59  ;;  %5310 = vtanh.f32 %v1950_v63  ;;  %vm3077_vm0 = vweird.f32 %v5301_v38 }
 0x469   : > { %v3132_v44 = vmul.f32 %v5303_v49, %v6833_v60  ;;  %5312 = vrcp.f32 %v6859_v23  ;;  %v5305_v41 = vpop.eup %5304  ;;  %vm6885_vm3 = vcmp.eq.f32.partialorder %v3110_v48, 8.507059e+37  ;;  %vm3137_vm4 = vweird.f32 %v5303_v49  ;;  %vm3078_vm6 = vmor %vm3076_vm10, %vm3077_vm0 }
 0x46a   : > { %v3060_v32 = vadd.f32 %v5293_v0, %v3059_v26  ;;  %v3073_v52 = vsub.f32 1.0, %v3072_v8  ;;  %v3102_v34 = vmul.f32 %v5305_v41, %v6844_v1  ;;  %v5307_v5 = vpop.eup %5306  ;;  %vm3121_vm5 = vweird.f32 %v6857_v22 }
 0x46b   : > { %v3133_v18 = vsub.f32 1.0, %v3132_v44  ;;  %v3127_v35 = vand.u32 2147483648, %v6857_v22  ;;  %5314 = vrcp.f32 %v6877_v30  ;;  %vm6903_vm7 = vcmp.eq.f32.partialorder %v3125_v15, 8.507059e+37 }
 0x46c   : > { %v3064_v25 = vsel %vm3063_vm15, %v5293_v0, %v3060_v32  ;;  %v3074_v40 = vmul.f32 %v5301_v38, %v3073_v52  ;;  %v3103_v56 = vsub.f32 1.0, %v3102_v34  ;;  %vm3181_vm8 = vweird.f32 %v6859_v23  ;;  %v1954_v15 = vpop.f32.mrf.mxu1 }
 0x46d   : > { %v3069_v50 = vsel %vm6847_vm9, %v3068_v3, %v3064_v25  ;;  %v3134_v14 = vmul.f32 %v5303_v49, %v3133_v18  ;;  %v5309_v51 = vpop.eup %5308  ;;  %vm3138_vm9 = vmor %vm3136_vm13, %vm3137_vm4  ;;  %vm3107_vm10 = vweird.f32 %v5305_v41  ;;  %v3185_v13 = vand.u32 2147483647, %v6859_v23 }
 0x46e   : > { %4286 = vst [vmem:[%s6529_s18 + $0x78] sm:$0xff] %v3069_v50  ;;  %v3075_v54 = vadd.f32 %v5301_v38, %v3074_v40  ;;  %v6897_v43 = vpop.eup %5310  ;;  %v3117_v16 = vmul.f32 %v5309_v51, %v6857_v22  ;;  %v3104_v59 = vmul.f32 %v5305_v41, %v3103_v56  ;;  %vm3122_vm11 = vweird.f32 %v5309_v51  ;;  %vm3108_vm13 = vmor %vm3106_vm14, %vm3107_vm10 }
 0x46f   : > { %v3135_v58 = vadd.f32 %v5303_v49, %v3134_v14  ;;  %v5313_v29 = vpop.eup %5312  ;;  %v3187_v60 = vand.u32 2147483648, %v6859_v23  ;;  %v6923_v9 = vadd.f32 1.0, %v5307_v5  ;;  %v2210_v36 = vadd.f32 %v2209_v62, %v6475_v19 }
 0x470   : > { %v3079_v0 = vsel %vm3078_vm6, %v5301_v38, %v3075_v54  ;;  %v3118_v57 = vsub.f32 1.0, %v3117_v16  ;;  %v3177_v7 = vmul.f32 %v5313_v29, %v6859_v23  ;;  %v3105_v63 = vadd.f32 %v5305_v41, %v3104_v59 }
 0x471   : > { %v3084_v28 = vsel %vm6864_vm2, %v3083_v61, %v3079_v0  ;;  %v3139_v4 = vsel %vm3138_vm9, %v5303_v49, %v3135_v58  ;;  %vm3182_vm2 = vweird.f32 %v5313_v29  ;;  %v5315_v11 = vpop.eup %5314  ;;  %v4812_v38 = vmul.f32 -1.442695, %v2388_v33  ;;  %v2211_v49 = vpop.f32.mrf.mxu3 }
 0x472   : > { %4287 = vst [vmem:[%s6529_s18 + $0x80] sm:$0xff] %v3084_v28  ;;  %v3144_v2 = vsel %vm6871_vm12, %v3143_v55, %v3139_v4  ;;  %v3119_v46 = vmul.f32 %v5309_v51, %v3118_v57  ;;  %v3178_v3 = vsub.f32 1.0, %v3177_v7  ;;  %v3109_v12 = vsel %vm3108_vm13, %v5305_v41, %v3105_v63  ;;  %vm3123_vm12 = vmor %vm3121_vm5, %vm3122_vm11 }
 0x473   : > { %4291 = vst.msk [vmem:[%s6529_s18 + $0xa0] sm:$0xff] %vm790_vm1, %v3144_v2  ;;  %v2008_v61 = vpack.c.bf16 %v6839_v10, %v6819_v37  ;;  %v3114_v1 = vsel %vm6885_vm3, %v3113_v20, %v3109_v12  ;;  %v3147_v45 = vmul.f32 %v5315_v11, %v6877_v30  ;;  %v3128_v48 = vor.u32 1.1754944e-38, %v3127_v35  ;;  %v2300_v10 = vpop.f32.mrf.mxu2  ;;  %vm3183_vm15 = vmor %vm3181_vm8, %vm3182_vm2 }
 0x474   : > { %v3120_v26 = vadd.f32 %v5309_v51, %v3119_v46  ;;  %v3179_v8 = vmul.f32 %v5313_v29, %v3178_v3  ;;  %4289 = vst [vmem:[%s6529_s18 + $0x90] sm:$0xff] %v3114_v1  ;;  %vm6935_vm14 = vcmp.eq.f32.partialorder %v3185_v13, 8.507059e+37  ;;  %v3188_v37 = vor.u32 1.1754944e-38, %v3187_v60 }
 0x475   : > { %5316 = vrcp.f32 %v6923_v9  ;;  %2248 = vmatmul.bf16.gmra.mxu3 %v2008_v61  ;;  %2337 = vmatmul.bf16.gmra.mxu2 %v2008_v61  ;;  %v3148_v55 = vsub.f32 1.0, %v3147_v45  ;;  %v3155_v32 = vand.u32 2147483647, %v6877_v30  ;;  %v3157_v52 = vand.u32 2147483648, %v6877_v30 }
 0x476   : > { %v3124_v44 = vsel %vm3123_vm12, %v5309_v51, %v3120_v26  ;;  %v3180_v27 = vadd.f32 %v5313_v29, %v3179_v8  ;;  %2426 = vmatmul.bf16.gmra.mxu0 %v2008_v61  ;;  %5318 = vpow2.f32 %v4812_v38  ;;  %v4810_v62 = vmul.f32 -1.442695, %v2210_v36  ;;  %v2392_v51 = vpop.f32.mrf.mxu0  ;;  %v1956_v38 = vpop.f32.mrf.mxu1 }
 0x477   : > { %v3129_v22 = vsel %vm6903_vm7, %v3128_v48, %v3124_v44  ;;  %v3149_v18 = vmul.f32 %v5315_v11, %v3148_v55  ;;  %vm3152_vm0 = vweird.f32 %v5315_v11  ;;  %v2299_v20 = vadd.f32 %v6889_v6, %v6477_v53 }
 0x478   : > { %4290 = vst [vmem:[%s6529_s18 + $0x98] sm:$0xff] %v3129_v22  ;;  %v3184_v41 = vsel %vm3183_vm15, %v5313_v29, %v3180_v27  ;;  %vm3151_vm3 = vweird.f32 %v6877_v30  ;;  %5320 = vpow2.f32 %v4810_v62  ;;  %v1952_v23 = vadd.f32 %v6813_v24, %v1951_v21 }
 0x479   : > { %v3189_v33 = vsel %vm6935_vm14, %v3188_v37, %v3184_v41  ;;  %v3150_v25 = vadd.f32 %v5315_v11, %v3149_v18  ;;  %v4811_v40 = vmul.f32 -1.442695, %v2299_v20  ;;  %v2390_v34 = vadd.f32 %v2389_v31, %v6472_v39  ;;  %vm3153_vm4 = vmor %vm3151_vm3, %vm3152_vm0  ;;  %v2214_v47 = vpop.f32.mrf.mxu3 }
 0x47a   : > { %4294 = vst.msk [vmem:[%s6529_s18 + $0xb8] sm:$0xff] %vm790_vm1, %v3189_v33  ;;  %v2212_v42 = vadd.f32 %v2211_v49, %v6475_v19  ;;  %vm3156_vm5 = vcmp.eq.f32.partialorder %v3155_v32, 8.507059e+37  ;;  %v3158_v6 = vor.u32 1.1754944e-38, %v3157_v52  ;;  %5322 = vtanh.f32 %v1952_v23 }
 0x47b   : > { %v5317_v5 = vpop.eup %5316  ;;  %v3154_v50 = vsel %vm3153_vm4, %v5315_v11, %v3150_v25  ;;  %v3170_v14 = vand.u32 2147483647, %v6923_v9  ;;  %5324 = vpow2.f32 %v4811_v40  ;;  %v4815_v35 = vmul.f32 -1.442695, %v2390_v34  ;;  %v2303_v4 = vpop.f32.mrf.mxu2 }
 0x47c   : > { %v3162_v30 = vmul.f32 %v5317_v5, %v6923_v9  ;;  %v5319_v54 = vpop.eup %5318  ;;  %v3159_v56 = vsel %vm3156_vm5, %v3158_v6, %v3154_v50  ;;  %v4813_v58 = vmul.f32 -1.442695, %v2212_v42  ;;  %v2301_v16 = vadd.f32 %v2300_v10, %v6477_v53 }
 0x47d   : > { %4292 = vst [vmem:[%s6529_s18 + $0xa8] sm:$0xff] %v3159_v56  ;;  %v6962_v29 = vadd.f32 1.0, %v5319_v54  ;;  %v1955_v0 = vadd.f32 %v6813_v24, %v1954_v15  ;;  %vm3166_vm6 = vweird.f32 %v6923_v9  ;;  %v3172_v13 = vand.u32 2147483648, %v6923_v9 }
 0x47e   : > { %v3163_v21 = vsub.f32 1.0, %v3162_v30  ;;  %v5321_v59 = vpop.eup %5320  ;;  %5326 = vpow2.f32 %v4815_v35  ;;  %v2393_v28 = vadd.f32 %v2392_v51, %v6472_v39  ;;  %vm3167_vm7 = vweird.f32 %v5317_v5  ;;  %v2394_v40 = vpop.f32.mrf.mxu0 }
 0x47f   : > { %5328 = vrcp.f32 %v6962_v29  ;;  %v2215_v7 = vadd.f32 %v2214_v47, %v6475_v19  ;;  %vm6970_vm8 = vcmp.eq.f32.partialorder %v3170_v14, 8.507059e+37  ;;  %v6974_v60 = vadd.f32 1.0, %v5321_v59  ;;  %vm3168_vm9 = vmor %vm3166_vm6, %vm3167_vm7 }
 0x480   : > { %v3164_v57 = vmul.f32 %v5317_v5, %v3163_v21  ;;  %v5323_v2 = vpop.eup %5322  ;;  %5330 = vpow2.f32 %v4813_v58  ;;  %v4814_v46 = vmul.f32 -1.442695, %v2301_v16  ;;  %v2304_v12 = vadd.f32 %v2303_v4, %v6477_v53 }
 0x481   : > { %v5325_v3 = vpop.eup %5324  ;;  %5332 = vtanh.f32 %v1955_v0  ;;  %v2009_v11 = vpack.c.bf16 %v5323_v2, %v6897_v43  ;;  %v3173_v61 = vor.u32 1.1754944e-38, %v3172_v13  ;;  %v3230_v36 = vand.u32 2147483647, %v6962_v29 }
 0x482   : > { %v3165_v31 = vadd.f32 %v5317_v5, %v3164_v57  ;;  %5334 = vrcp.f32 %v6974_v60  ;;  %v4818_v49 = vmul.f32 -1.442695, %v2393_v28  ;;  %v3232_v26 = vand.u32 2147483648, %v6962_v29 }
 0x483   : > { %v6983_v8 = vadd.f32 1.0, %v5325_v3  ;;  %v4816_v45 = vmul.f32 -1.442695, %v2215_v7  ;;  %5336 = vpow2.f32 %v4814_v46  ;;  %v6988_v9 = vadd.f32 %v6813_v24, %v1956_v38 }
 0x484   : > { %v3169_v1 = vsel %vm3168_vm9, %v5317_v5, %v3165_v31  ;;  %v5327_v43 = vpop.eup %5326  ;;  %vm3226_vm10 = vweird.f32 %v6962_v29  ;;  %v3200_v37 = vand.u32 2147483647, %v6974_v60  ;;  %v4817_v10 = vmul.f32 -1.442695, %v2304_v12 }
 0x485   : > { %v3174_v48 = vsel %vm6970_vm8, %v3173_v61, %v3169_v1  ;;  %2253 = vmatmul.bf16.gmra.mxu3 %v2009_v11  ;;  %2342 = vmatmul.bf16.gmra.mxu2 %v2009_v11  ;;  %v5329_v17 = vpop.eup %5328  ;;  %5338 = vrcp.f32 %v6983_v8  ;;  %vm6995_vm11 = vcmp.eq.f32.partialorder %v3230_v36, 8.507059e+37  ;;  %v6999_v32 = vadd.f32 1.0, %v5327_v43 }
 0x486   : > { %4293 = vst [vmem:[%s6529_s18 + $0xb0] sm:$0xff] %v3174_v48  ;;  %2431 = vmatmul.bf16.gmra.mxu0 %v2009_v11  ;;  %v5331_v44 = vpop.eup %5330  ;;  %v3222_v27 = vmul.f32 %v5329_v17, %v6962_v29  ;;  %5340 = vpow2.f32 %v4818_v49  ;;  %v3233_v52 = vor.u32 1.1754944e-38, %v3232_v26  ;;  %v3202_v62 = vand.u32 2147483648, %v6974_v60 }
 0x487   : > { %v7001_v22 = vpop.eup %5332  ;;  %v7004_v41 = vadd.f32 1.0, %v5331_v44  ;;  %5342 = vpow2.f32 %v4816_v45  ;;  %v3215_v15 = vand.u32 2147483647, %v6983_v8  ;;  %v3217_v33 = vand.u32 2147483648, %v6983_v8  ;;  %v2216_v44 = vpop.f32.mrf.mxu3 }
 0x488   : > { %v5335_v18 = vpop.eup %5334  ;;  %v3223_v20 = vsub.f32 1.0, %v3222_v27  ;;  %5344 = vrcp.f32 %v6999_v32  ;;  %vm3196_vm13 = vweird.f32 %v6974_v60  ;;  %vm7011_vm2 = vcmp.eq.f32.partialorder %v3200_v37, 8.507059e+37 }
 0x489   : > { %v3192_v23 = vmul.f32 %v5335_v18, %v6974_v60  ;;  %5346 = vpow2.f32 %v4817_v10  ;;  %v5337_v34 = vpop.eup %5336  ;;  %vm3227_vm12 = vweird.f32 %v5329_v17  ;;  %v3277_v5 = vand.u32 2147483648, %v6999_v32 }
 0x48a   : > { %v3224_v42 = vmul.f32 %v5329_v17, %v3223_v20  ;;  %5348 = vrcp.f32 %v7004_v41  ;;  %v3203_v30 = vor.u32 1.1754944e-38, %v3202_v62  ;;  %vm3211_vm14 = vweird.f32 %v6983_v8  ;;  %vm3228_vm0 = vmor %vm3226_vm10, %vm3227_vm12 }
 0x48b   : > { %v5339_v6 = vpop.eup %5338  ;;  %v3193_v50 = vsub.f32 1.0, %v3192_v23  ;;  %v3275_v14 = vand.u32 2147483647, %v6999_v32  ;;  %vm7020_vm15 = vcmp.eq.f32.partialorder %v3215_v15, 8.507059e+37  ;;  %v3218_v58 = vor.u32 1.1754944e-38, %v3217_v33 }
 0x48c   : > { %v5341_v51 = vpop.eup %5340  ;;  %v3225_v54 = vadd.f32 %v5329_v17, %v3224_v42  ;;  %v3207_v56 = vmul.f32 %v5339_v6, %v6983_v8  ;;  %v7025_v16 = vadd.f32 %v2394_v40, %v6472_v39  ;;  %vm3197_vm3 = vweird.f32 %v5335_v18 }
 0x48d   : > { %v5343_v47 = vpop.eup %5342  ;;  %v3194_v21 = vmul.f32 %v5335_v18, %v3193_v50  ;;  %vm3271_vm4 = vweird.f32 %v6999_v32  ;;  %v7031_v0 = vadd.f32 1.0, %v5337_v34  ;;  %v3278_v4 = vor.u32 1.1754944e-38, %v3277_v5  ;;  %vm3198_vm7 = vmor %vm3196_vm13, %vm3197_vm3 }
 0x48e   : > { %v5345_v59 = vpop.eup %5344  ;;  %v3229_v13 = vsel %vm3228_vm0, %v5329_v17, %v3225_v54  ;;  %v3208_v28 = vsub.f32 1.0, %v3207_v56  ;;  %v3245_v57 = vand.u32 2147483647, %v7004_v41  ;;  %vm7037_vm5 = vcmp.eq.f32.partialorder %v3275_v14, 8.507059e+37 }
 0x48f   : > { %v5347_v7 = vpop.eup %5346  ;;  %v3234_v2 = vsel %vm6995_vm11, %v3233_v52, %v3229_v13  ;;  %v3195_v63 = vadd.f32 %v5335_v18, %v3194_v21  ;;  %v3267_v29 = vmul.f32 %v5345_v59, %v6999_v32  ;;  %vm3241_vm6 = vweird.f32 %v7004_v41  ;;  %v2305_v32 = vpop.f32.mrf.mxu2 }
 0x490   : > { %v7042_v3 = vadd.f32 1.0, %v5341_v51  ;;  %v5349_v31 = vpop.eup %5348  ;;  %4297 = vst.msk [vmem:[%s6529_s18 + $0xd0] sm:$0xff] %vm790_vm1, %v3234_v2  ;;  %v3209_v11 = vmul.f32 %v5339_v6, %v3208_v28  ;;  %vm3212_vm8 = vweird.f32 %v5339_v6  ;;  %v3247_v12 = vand.u32 2147483648, %v7004_v41  ;;  %v2397_v51 = vpop.f32.mrf.mxu0 }
 0x491   : > { %5350 = vrcp.f32 %v7031_v0  ;;  %v3199_v38 = vsel %vm3198_vm7, %v5335_v18, %v3195_v63  ;;  %v3268_v61 = vsub.f32 1.0, %v3267_v29  ;;  %v3237_v36 = vmul.f32 %v5349_v31, %v7004_v41  ;;  %vm3213_vm10 = vmor %vm3211_vm14, %vm3212_vm8 }
 0x492   : > { %v7052_v49 = vadd.f32 1.0, %v5343_v47  ;;  %v3204_v1 = vsel %vm7011_vm2, %v3203_v30, %v3199_v38  ;;  %v3210_v26 = vadd.f32 %v5339_v6, %v3209_v11  ;;  %vm3272_vm9 = vweird.f32 %v5345_v59  ;;  %v2219_v11 = vpop.f32.mrf.mxu3 }
 0x493   : > { %v7056_v45 = vadd.f32 1.0, %v5347_v7  ;;  %4295 = vst [vmem:[%s6529_s18 + $0xc0] sm:$0xff] %v3204_v1  ;;  %v3269_v60 = vmul.f32 %v5345_v59, %v3268_v61  ;;  %v3238_v43 = vsub.f32 1.0, %v3237_v36  ;;  %v3260_v48 = vand.u32 2147483647, %v7031_v0  ;;  %vm3273_vm13 = vmor %vm3271_vm4, %vm3272_vm9 }
 0x494   : > { %5352 = vrcp.f32 %v7042_v3  ;;  %v3214_v17 = vsel %vm3213_vm10, %v5339_v6, %v3210_v26  ;;  %vm3242_vm11 = vweird.f32 %v5349_v31  ;;  %v3262_v37 = vand.u32 2147483648, %v7031_v0 }
 0x495   : > { %v3322_v10 = vand.u32 2147483648, %v7042_v3  ;;  %v3219_v27 = vsel %vm7020_vm15, %v3218_v58, %v3214_v17  ;;  %v3270_v55 = vadd.f32 %v5345_v59, %v3269_v60  ;;  %v3239_v8 = vmul.f32 %v5349_v31, %v3238_v43  ;;  %vm3243_vm15 = vmor %vm3241_vm6, %vm3242_vm11 }
 0x496   : > { %5354 = vrcp.f32 %v7052_v49  ;;  %4296 = vst [vmem:[%s6529_s18 + $0xc8] sm:$0xff] %v3219_v27  ;;  %vm7072_vm2 = vcmp.eq.f32.partialorder %v3245_v57, 8.507059e+37  ;;  %v3248_v18 = vor.u32 1.1754944e-38, %v3247_v12  ;;  %vm3256_vm12 = vweird.f32 %v7031_v0  ;;  %v1959_v57 = vpop.f32.mrf.mxu1 }
 0x497   : > { %v5351_v52 = vpop.eup %5350  ;;  %v3320_v20 = vand.u32 2147483647, %v7042_v3  ;;  %v3274_v15 = vsel %vm3273_vm13, %v5345_v59, %v3270_v55  ;;  %v3240_v33 = vadd.f32 %v5349_v31, %v3239_v8  ;;  %vm7079_vm14 = vcmp.eq.f32.partialorder %v3260_v48, 8.507059e+37 }
 0x498   : > { %v3252_v23 = vmul.f32 %v5351_v52, %v7031_v0  ;;  %v3279_v40 = vsel %vm7037_vm5, %v3278_v4, %v3274_v15  ;;  %vm3316_vm0 = vweird.f32 %v7042_v3  ;;  %v3290_v34 = vand.u32 2147483647, %v7052_v49 }
 0x499   : > { %v3292_v42 = vand.u32 2147483648, %v7052_v49  ;;  %5356 = vrcp.f32 %v7056_v45  ;;  %4300 = vst.msk [vmem:[%s6529_s18 + $0xe8] sm:$0xff] %vm790_vm1, %v3279_v40  ;;  %v3244_v6 = vsel %vm3243_vm15, %v5349_v31, %v3240_v33  ;;  %v3263_v30 = vor.u32 1.1754944e-38, %v3262_v37  ;;  %v2308_v37 = vpop.f32.mrf.mxu2 }
 0x49a   : > { %v5353_v5 = vpop.eup %5352  ;;  %v3253_v50 = vsub.f32 1.0, %v3252_v23  ;;  %v3323_v14 = vor.u32 1.1754944e-38, %v3322_v10  ;;  %v3249_v41 = vsel %vm7072_vm2, %v3248_v18, %v3244_v6  ;;  %vm3257_vm3 = vweird.f32 %v5351_v52 }
 0x49b   : > { %v3312_v54 = vmul.f32 %v5353_v5, %v7042_v3  ;;  %vm7097_vm4 = vcmp.eq.f32.partialorder %v3320_v20, 8.507059e+37  ;;  %vm3286_vm5 = vweird.f32 %v7052_v49  ;;  %4298 = vst [vmem:[%s6529_s18 + $0xd8] sm:$0xff] %v3249_v41  ;;  %vm3317_vm6 = vweird.f32 %v5353_v5  ;;  %vm3258_vm8 = vmor %vm3256_vm12, %vm3257_vm3  ;;  %v2221_v41 = vpop.f32.mrf.mxu3 }
 0x49c   : > { %v5355_v35 = vpop.eup %5354  ;;  %v3254_v58 = vmul.f32 %v5351_v52, %v3253_v50  ;;  %v3305_v47 = vand.u32 2147483647, %v7056_v45  ;;  %5358 = vtanh.f32 %v6988_v9  ;;  %vm7106_vm7 = vcmp.eq.f32.partialorder %v3290_v34, 8.507059e+37  ;;  %vm3318_vm10 = vmor %vm3316_vm0, %vm3317_vm6 }
 0x49d   : > { %v3313_v21 = vsub.f32 1.0, %v3312_v54  ;;  %v3282_v59 = vmul.f32 %v5355_v35, %v7052_v49  ;;  %v3293_v28 = vor.u32 1.1754944e-38, %v3292_v42  ;;  %v4821_v4 = vmul.f32 -1.442695, %v7025_v16 }
 0x49e   : > { %v3255_v7 = vadd.f32 %v5351_v52, %v3254_v58  ;;  %v3307_v2 = vand.u32 2147483648, %v7056_v45  ;;  %v2217_v63 = vadd.f32 %v2216_v44, %v6475_v19  ;;  %v2306_v29 = vadd.f32 %v2305_v32, %v6477_v53  ;;  %v1961_v32 = vpop.f32.mrf.mxu1 }
 0x49f   : > { %v5357_v46 = vpop.eup %5356  ;;  %v3314_v9 = vmul.f32 %v5353_v5, %v3313_v21  ;;  %v3283_v31 = vsub.f32 1.0, %v3282_v59  ;;  %vm3287_vm9 = vweird.f32 %v5355_v35  ;;  %5360 = vpow2.f32 %v4821_v4 }
 0x4a0   : > { %v3259_v16 = vsel %vm3258_vm8, %v5351_v52, %v3255_v7  ;;  %v3297_v12 = vmul.f32 %v5357_v46, %v7056_v45  ;;  %v4819_v38 = vmul.f32 -1.442695, %v2217_v63  ;;  %v1960_v61 = vadd.f32 %v6813_v24, %v1959_v57  ;;  %vm3288_vm11 = vmor %vm3286_vm5, %vm3287_vm9  ;;  %v2399_v52 = vpop.f32.mrf.mxu0 }
 0x4a1   : > { %v3264_v36 = vsel %vm7079_vm14, %v3263_v30, %v3259_v16  ;;  %v3315_v1 = vadd.f32 %v5353_v5, %v3314_v9  ;;  %v3284_v26 = vmul.f32 %v5355_v35, %v3283_v31  ;;  %v4820_v60 = vmul.f32 -1.442695, %v2306_v29  ;;  %v7160_v21 = vpop.f32.mrf.mxu2 }
 0x4a2   : > { %v5359_v0 = vpop.eup %5358  ;;  %4299 = vst [vmem:[%s6529_s18 + $0xe0] sm:$0xff] %v3264_v36  ;;  %v3298_v43 = vsub.f32 1.0, %v3297_v12  ;;  %5362 = vpow2.f32 %v4819_v38  ;;  %v2398_v48 = vadd.f32 %v2397_v51, %v6472_v39  ;;  %v2220_v17 = vadd.f32 %v2219_v11, %v6475_v19 }
 0x4a3   : > { %v3319_v10 = vsel %vm3318_vm10, %v5353_v5, %v3315_v1  ;;  %v3285_v44 = vadd.f32 %v5355_v35, %v3284_v26  ;;  %5364 = vpow2.f32 %v4820_v60  ;;  %v2010_v27 = vpack.c.bf16 %v5359_v0, %v7001_v22 }
 0x4a4   : > { %v3324_v55 = vsel %vm7097_vm4, %v3323_v14, %v3319_v10  ;;  %v3299_v3 = vmul.f32 %v5357_v46, %v3298_v43  ;;  %vm3302_vm13 = vweird.f32 %v5357_v46  ;;  %v4824_v8 = vmul.f32 -1.442695, %v2398_v48 }
 0x4a5   : > { %v5361_v62 = vpop.eup %5360  ;;  %4303 = vst.msk [vmem:[%s6529_s18 + $0x100] sm:$0xff] %vm790_vm1, %v3324_v55  ;;  %v3289_v18 = vsel %vm3288_vm11, %v5355_v35, %v3285_v44  ;;  %vm3301_vm2 = vweird.f32 %v7056_v45  ;;  %2258 = vmatmul.bf16.gmra.mxu3 %v2010_v27  ;;  %2347 = vmatmul.bf16.gmra.mxu2 %v2010_v27  ;;  %v4822_v22 = vmul.f32 -1.442695, %v2220_v17  ;;  %v2309_v20 = vadd.f32 %v2308_v37, %v6477_v53  ;;  %v7201_v55 = vpop.f32.mrf.mxu3 }
 0x4a6   : > { %v3294_v49 = vsel %vm7106_vm7, %v3293_v28, %v3289_v18  ;;  %v3300_v15 = vadd.f32 %v5357_v46, %v3299_v3  ;;  %v7139_v33 = vadd.f32 1.0, %v5361_v62  ;;  %5366 = vpow2.f32 %v4824_v8  ;;  %2436 = vmatmul.bf16.gmra.mxu0 %v2010_v27  ;;  %vm3303_vm12 = vmor %vm3301_vm2, %vm3302_vm13 }
 0x4a7   : > { %4301 = vst [vmem:[%s6529_s18 + $0xf0] sm:$0xff] %v3294_v49  ;;  %v3308_v23 = vor.u32 1.1754944e-38, %v3307_v2  ;;  %5368 = vpow2.f32 %v4822_v22  ;;  %v4823_v25 = vmul.f32 -1.442695, %v2309_v20  ;;  %v2400_v40 = vadd.f32 %v2399_v52, %v6472_v39 }
 0x4a8   : > { %v5363_v34 = vpop.eup %5362  ;;  %v3304_v42 = vsel %vm3303_vm12, %v5357_v46, %v3300_v15  ;;  %vm3306_vm14 = vcmp.eq.f32.partialorder %v3305_v47, 8.507059e+37  ;;  %5370 = vrcp.f32 %v7139_v33  ;;  %v1962_v14 = vadd.f32 %v6813_v24, %v1961_v32  ;;  %v7172_v2 = vpop.f32.mrf.mxu0 }
 0x4a9   : > { %v5365_v5 = vpop.eup %5364  ;;  %v3309_v6 = vsel %vm3306_vm14, %v3308_v23, %v3304_v42  ;;  %v7147_v50 = vadd.f32 1.0, %v5363_v34  ;;  %5372 = vtanh.f32 %v1960_v61  ;;  %v4827_v51 = vmul.f32 -1.442695, %v2400_v40  ;;  %v2313_v34 = vpop.f32.mrf.mxu2 }
 0x4aa   : > { %4302 = vst [vmem:[%s6529_s18 + $0xf8] sm:$0xff] %v3309_v6  ;;  %v7150_v30 = vadd.f32 1.0, %v5365_v5  ;;  %5374 = vpow2.f32 %v4823_v25  ;;  %v3365_v45 = vand.u32 2147483647, %v7139_v33  ;;  %v3367_v56 = vand.u32 2147483648, %v7139_v33 }
 0x4ab   : > { %5376 = vrcp.f32 %v7147_v50  ;;  %v3337_v58 = vand.u32 2147483648, %v7147_v50  ;;  %vm3361_vm15 = vweird.f32 %v7139_v33  ;;  %v3335_v59 = vand.u32 2147483647, %v7147_v50 }
 0x4ac   : > { %v5367_v54 = vpop.eup %5366  ;;  %5378 = vrcp.f32 %v7150_v30  ;;  %v3350_v57 = vand.u32 2147483647, %v7150_v30  ;;  %v3352_v7 = vand.u32 2147483648, %v7150_v30  ;;  %vm7174_vm0 = vcmp.eq.f32.partialorder %v3365_v45, 8.507059e+37 }
 0x4ad   : > { %v5369_v35 = vpop.eup %5368  ;;  %v7158_v47 = vadd.f32 1.0, %v5367_v54  ;;  %5380 = vpow2.f32 %v4827_v51  ;;  %v3368_v46 = vor.u32 1.1754944e-38, %v3367_v56  ;;  %vm3331_vm3 = vweird.f32 %v7147_v50 }
 0x4ae   : > { %v5371_v24 = vpop.eup %5370  ;;  %v7164_v13 = vadd.f32 1.0, %v5369_v35  ;;  %5382 = vtanh.f32 %v1962_v14  ;;  %v3338_v11 = vor.u32 1.1754944e-38, %v3337_v58  ;;  %vm3346_vm4 = vweird.f32 %v7150_v30 }
 0x4af   : > { %v7166_v28 = vpop.eup %5372  ;;  %v3357_v4 = vmul.f32 %v5371_v24, %v7139_v33  ;;  %5384 = vrcp.f32 %v7158_v47  ;;  %v3412_v16 = vand.u32 2147483648, %v7158_v47  ;;  %vm3362_vm5 = vweird.f32 %v5371_v24 }
 0x4b0   : > { %v5375_v63 = vpop.eup %5374  ;;  %5386 = vrcp.f32 %v7164_v13  ;;  %vm7183_vm6 = vcmp.eq.f32.partialorder %v3335_v59, 8.507059e+37  ;;  %v3410_v36 = vand.u32 2147483647, %v7158_v47  ;;  %v2222_v1 = vadd.f32 %v2221_v41, %v6475_v19  ;;  %vm3363_vm13 = vmor %vm3361_vm15, %vm3362_vm5  ;;  %v2404_v56 = vpop.f32.mrf.mxu0 }
 0x4b1   : > { %v5377_v9 = vpop.eup %5376  ;;  %v3358_v31 = vsub.f32 1.0, %v3357_v4  ;;  %vm7190_vm7 = vcmp.eq.f32.partialorder %v3350_v57, 8.507059e+37  ;;  %v3353_v48 = vor.u32 1.1754944e-38, %v3352_v7  ;;  %v3380_v17 = vand.u32 2147483647, %v7164_v13 }
 0x4b2   : > { %v5379_v12 = vpop.eup %5378  ;;  %v3327_v38 = vmul.f32 %v5377_v9, %v7147_v50  ;;  %vm3332_vm8 = vweird.f32 %v5377_v9  ;;  %vm3406_vm9 = vweird.f32 %v7158_v47  ;;  %v3382_v44 = vand.u32 2147483648, %v7164_v13 }
 0x4b3   : > { %v5381_v26 = vpop.eup %5380  ;;  %v3359_v60 = vmul.f32 %v5371_v24, %v3358_v31  ;;  %v3342_v0 = vmul.f32 %v5379_v12, %v7150_v30  ;;  %v7199_v27 = vadd.f32 1.0, %v5375_v63  ;;  %vm3347_vm10 = vweird.f32 %v5379_v12  ;;  %vm3333_vm14 = vmor %vm3331_vm3, %vm3332_vm8 }
 0x4b4   : > { %v7195_v37 = vpop.eup %5382  ;;  %v3328_v10 = vsub.f32 1.0, %v3327_v38  ;;  %v3413_v62 = vor.u32 1.1754944e-38, %v3412_v16  ;;  %vm3376_vm11 = vweird.f32 %v7164_v13  ;;  %vm7208_vm2 = vcmp.eq.f32.partialorder %v3410_v36, 8.507059e+37  ;;  %vm3348_vm15 = vmor %vm3346_vm4, %vm3347_vm10 }
 0x4b5   : > { %v5385_v3 = vpop.eup %5384  ;;  %v3360_v8 = vadd.f32 %v5371_v24, %v3359_v60  ;;  %v3343_v52 = vsub.f32 1.0, %v3342_v0  ;;  %5388 = vrcp.f32 %v7199_v27  ;;  %v7213_v15 = vadd.f32 1.0, %v5381_v26 }
 0x4b6   : > { %v5387_v18 = vpop.eup %5386  ;;  %v3329_v22 = vmul.f32 %v5377_v9, %v3328_v10  ;;  %v3402_v20 = vmul.f32 %v5385_v3, %v7158_v47  ;;  %vm7216_vm12 = vcmp.eq.f32.partialorder %v3380_v17, 8.507059e+37  ;;  %v4825_v33 = vmul.f32 -1.442695, %v2222_v1  ;;  %v2226_v47 = vpop.f32.mrf.mxu3 }
 0x4b7   : > { %v3364_v23 = vsel %vm3363_vm13, %v5371_v24, %v3360_v8  ;;  %v3344_v25 = vmul.f32 %v5379_v12, %v3343_v52  ;;  %v3372_v32 = vmul.f32 %v5387_v18, %v7164_v13  ;;  %v2311_v14 = vadd.f32 %v7160_v21, %v6477_v53 }
 0x4b8   : > { %v3369_v42 = vsel %vm7174_vm0, %v3368_v46, %v3364_v23  ;;  %v3330_v5 = vadd.f32 %v5377_v9, %v3329_v22  ;;  %v3403_v6 = vsub.f32 1.0, %v3402_v20  ;;  %v3395_v54 = vand.u32 2147483647, %v7199_v27  ;;  %v2407_v8 = vpop.f32.mrf.mxu0 }
 0x4b9   : > { %4306 = vst.msk [vmem:[%s6529_s18 + $0x118] sm:$0xff] %vm790_vm1, %v3369_v42  ;;  %v3345_v51 = vadd.f32 %v5379_v12, %v3344_v25  ;;  %v3373_v41 = vsub.f32 1.0, %v3372_v32  ;;  %v3397_v45 = vand.u32 2147483648, %v7199_v27  ;;  %vm3407_vm0 = vweird.f32 %v5385_v3 }
 0x4ba   : > { %v3334_v35 = vsel %vm3333_vm14, %v5377_v9, %v3330_v5  ;;  %v3404_v58 = vmul.f32 %v5385_v3, %v3403_v6  ;;  %5390 = vrcp.f32 %v7213_v15  ;;  %vm3377_vm3 = vweird.f32 %v5387_v18  ;;  %vm3408_vm4 = vmor %vm3406_vm9, %vm3407_vm0 }
 0x4bb   : > { %v3339_v50 = vsel %vm7183_vm6, %v3338_v11, %v3334_v35  ;;  %v3349_v21 = vsel %vm3348_vm15, %v5379_v12, %v3345_v51  ;;  %v3374_v24 = vmul.f32 %v5387_v18, %v3373_v41  ;;  %v5389_v59 = vpop.eup %5388  ;;  %v3383_v7 = vor.u32 1.1754944e-38, %v3382_v44 }
 0x4bc   : > { %4304 = vst [vmem:[%s6529_s18 + $0x108] sm:$0xff] %v3339_v50  ;;  %v3354_v4 = vsel %vm7190_vm7, %v3353_v48, %v3349_v21  ;;  %v3405_v57 = vadd.f32 %v5385_v3, %v3404_v58  ;;  %vm3391_vm5 = vweird.f32 %v7199_v27  ;;  %v3387_v63 = vmul.f32 %v5389_v59, %v7199_v27  ;;  %vm3378_vm7 = vmor %vm3376_vm11, %vm3377_vm3  ;;  %v2315_v48 = vpop.f32.mrf.mxu2 }
 0x4bd   : > { %4305 = vst [vmem:[%s6529_s18 + $0x110] sm:$0xff] %v3354_v4  ;;  %v3375_v30 = vadd.f32 %v5387_v18, %v3374_v24  ;;  %vm7245_vm6 = vcmp.eq.f32.partialorder %v3395_v54, 8.507059e+37  ;;  %v3398_v46 = vor.u32 1.1754944e-38, %v3397_v45  ;;  %v3455_v31 = vand.u32 2147483647, %v7213_v15 }
 0x4be   : > { %v3409_v9 = vsel %vm3408_vm4, %v5385_v3, %v3405_v57  ;;  %5392 = vpow2.f32 %v4825_v33  ;;  %v4826_v11 = vmul.f32 -1.442695, %v2311_v14  ;;  %v3388_v38 = vsub.f32 1.0, %v3387_v63  ;;  %v2229_v5 = vpop.f32.mrf.mxu3 }
 0x4bf   : > { %v3414_v16 = vsel %vm7208_vm2, %v3413_v62, %v3409_v9  ;;  %v3379_v12 = vsel %vm3378_vm7, %v5387_v18, %v3375_v30  ;;  %vm3392_vm8 = vweird.f32 %v5389_v59  ;;  %v2403_v13 = vadd.f32 %v7172_v2, %v6472_v39 }
 0x4c0   : > { %v5391_v61 = vpop.eup %5390  ;;  %4309 = vst.msk [vmem:[%s6529_s18 + $0x130] sm:$0xff] %vm790_vm1, %v3414_v16  ;;  %v3384_v36 = vsel %vm7216_vm12, %v3383_v7, %v3379_v12  ;;  %5394 = vpow2.f32 %v4826_v11  ;;  %v2011_v1 = vpack.c.bf16 %v7195_v37, %v7166_v28  ;;  %v3389_v26 = vmul.f32 %v5389_v59, %v3388_v38  ;;  %vm3393_vm10 = vmor %vm3391_vm5, %vm3392_vm8 }
 0x4c1   : > { %4307 = vst [vmem:[%s6529_s18 + $0x120] sm:$0xff] %v3384_v36  ;;  %v3447_v60 = vmul.f32 %v5391_v61, %v7213_v15  ;;  %v3457_v0 = vand.u32 2147483648, %v7213_v15  ;;  %v2225_v43 = vadd.f32 %v7201_v55, %v6475_v19  ;;  %vm3452_vm9 = vweird.f32 %v5391_v61 }
 0x4c2   : > { %v4830_v17 = vmul.f32 -1.442695, %v2403_v13  ;;  %2263 = vmatmul.bf16.gmra.mxu3 %v2011_v1  ;;  %2352 = vmatmul.bf16.gmra.mxu2 %v2011_v1  ;;  %v2314_v10 = vadd.f32 %v2313_v34, %v6477_v53  ;;  %v2405_v2 = vadd.f32 %v2404_v56, %v6472_v39  ;;  %v3390_v44 = vadd.f32 %v5389_v59, %v3389_v26 }
 0x4c3   : > { %v3448_v28 = vsub.f32 1.0, %v3447_v60  ;;  %2441 = vmatmul.bf16.gmra.mxu0 %v2011_v1  ;;  %v4828_v37 = vmul.f32 -1.442695, %v2225_v43  ;;  %v2227_v3 = vadd.f32 %v2226_v47, %v6475_v19  ;;  %v2316_v18 = vadd.f32 %v2315_v48, %v6477_v53 }
 0x4c4   : > { %v5393_v52 = vpop.eup %5392  ;;  %5396 = vpow2.f32 %v4830_v17  ;;  %v4829_v55 = vmul.f32 -1.442695, %v2314_v10  ;;  %v4833_v62 = vmul.f32 -1.442695, %v2405_v2  ;;  %v3394_v22 = vsel %vm3393_vm10, %v5389_v59, %v3390_v44  ;;  %v2318_v4 = vpop.f32.mrf.mxu2 }
 0x4c5   : > { %v3449_v20 = vmul.f32 %v5391_v61, %v3448_v28  ;;  %v7274_v49 = vadd.f32 1.0, %v5393_v52  ;;  %5398 = vpow2.f32 %v4828_v37  ;;  %v3399_v25 = vsel %vm7245_vm6, %v3398_v46, %v3394_v22 }
 0x4c6   : > { %v5395_v23 = vpop.eup %5394  ;;  %5400 = vpow2.f32 %v4829_v55  ;;  %v2408_v32 = vadd.f32 %v2407_v8, %v6472_v39  ;;  %4308 = vst [vmem:[%s6529_s18 + $0x128] sm:$0xff] %v3399_v25  ;;  %vm3451_vm11 = vweird.f32 %v7213_v15  ;;  %v4831_v40 = vmul.f32 -1.442695, %v2227_v3 }
 0x4c7   : > { %v3450_v27 = vadd.f32 %v5391_v61, %v3449_v20  ;;  %5402 = vrcp.f32 %v7274_v49  ;;  %vm3453_vm13 = vmor %vm3451_vm11, %vm3452_vm9  ;;  %v3458_v33 = vor.u32 1.1754944e-38, %v3457_v0  ;;  %v7283_v34 = vadd.f32 1.0, %v5395_v23 }
 0x4c8   : > { %v4832_v42 = vmul.f32 -1.442695, %v2316_v18  ;;  %vm3456_vm2 = vcmp.eq.f32.partialorder %v3455_v31, 8.507059e+37  ;;  %5404 = vpow2.f32 %v4833_v62  ;;  %v3425_v41 = vand.u32 2147483647, %v7274_v49 }
 0x4c9   : > { %v3454_v6 = vsel %vm3453_vm13, %v5391_v61, %v3450_v27  ;;  %5406 = vrcp.f32 %v7283_v34  ;;  %v4836_v15 = vmul.f32 -1.442695, %v2408_v32  ;;  %v3427_v45 = vand.u32 2147483648, %v7274_v49 }
 0x4ca   : > { %v5397_v14 = vpop.eup %5396  ;;  %v3459_v51 = vsel %vm3456_vm2, %v3458_v33, %v3454_v6  ;;  %5408 = vpow2.f32 %v4831_v40  ;;  %v2230_v35 = vadd.f32 %v2229_v5, %v6475_v19  ;;  %v3440_v24 = vand.u32 2147483647, %v7283_v34 }
 0x4cb   : > { %v5399_v54 = vpop.eup %5398  ;;  %4312 = vst.msk [vmem:[%s6529_s18 + $0x148] sm:$0xff] %vm790_vm1, %v3459_v51  ;;  %v7290_v56 = vadd.f32 1.0, %v5397_v14  ;;  %5410 = vpow2.f32 %v4832_v42  ;;  %v3442_v59 = vand.u32 2147483648, %v7283_v34  ;;  %vm3421_vm12 = vweird.f32 %v7274_v49 }
 0x4cc   : > { %v5401_v58 = vpop.eup %5400  ;;  %v7293_v50 = vadd.f32 1.0, %v5399_v54  ;;  %vm7300_vm14 = vcmp.eq.f32.partialorder %v3425_v41, 8.507059e+37  ;;  %v3428_v63 = vor.u32 1.1754944e-38, %v3427_v45  ;;  %vm3436_vm15 = vweird.f32 %v7283_v34 }
 0x4cd   : > { %v5403_v21 = vpop.eup %5402  ;;  %5412 = vrcp.f32 %v7290_v56  ;;  %v7306_v29 = vmul.f32 -1.442695, %v2230_v35  ;;  %v3500_v31 = vand.u32 2147483647, %v7290_v56  ;;  %v7309_v11 = vadd.f32 1.0, %v5401_v58 }
 0x4ce   : > { %v3417_v57 = vmul.f32 %v5403_v21, %v7274_v49  ;;  %5414 = vpow2.f32 %v4836_v15  ;;  %v5405_v30 = vpop.eup %5404  ;;  %v7312_v47 = vadd.f32 %v2318_v4, %v6477_v53  ;;  %vm7315_vm0 = vcmp.eq.f32.partialorder %v3440_v24, 8.507059e+37 }
 0x4cf   : > { %5416 = vrcp.f32 %v7293_v50  ;;  %v5407_v46 = vpop.eup %5406  ;;  %v3443_v61 = vor.u32 1.1754944e-38, %v3442_v59  ;;  %v3502_v36 = vand.u32 2147483648, %v7290_v56  ;;  %vm3422_vm3 = vweird.f32 %v5403_v21 }
 0x4d0   : > { %v3418_v9 = vsub.f32 1.0, %v3417_v57  ;;  %v5409_v16 = vpop.eup %5408  ;;  %v3432_v12 = vmul.f32 %v5407_v46, %v7283_v34  ;;  %v3470_v26 = vand.u32 2147483647, %v7293_v50  ;;  %5418 = vrcp.f32 %v7309_v11  ;;  %vm3423_vm7 = vmor %vm3421_vm12, %vm3422_vm3  ;;  %v2409_v34 = vpop.f32.mrf.mxu0 }
 0x4d1   : > { %v5411_v13 = vpop.eup %5410  ;;  %vm3496_vm5 = vweird.f32 %v7290_v56  ;;  %v3472_v43 = vand.u32 2147483648, %v7293_v50  ;;  %v7324_v48 = vadd.f32 1.0, %v5405_v30  ;;  %vm7329_vm4 = vcmp.eq.f32.partialorder %v3500_v31, 8.507059e+37  ;;  %v2231_v31 = vpop.f32.mrf.mxu3 }
 0x4d2   : > { %v3419_v1 = vmul.f32 %v5403_v21, %v3418_v9  ;;  %v3433_v0 = vsub.f32 1.0, %v3432_v12  ;;  %vm3466_vm6 = vweird.f32 %v7293_v50  ;;  %v7334_v28 = vadd.f32 1.0, %v5409_v16 }
 0x4d3   : > { %v5413_v60 = vpop.eup %5412  ;;  %vm3437_vm8 = vweird.f32 %v5407_v46  ;;  %v3503_v8 = vor.u32 1.1754944e-38, %v3502_v36  ;;  %5420 = vrcp.f32 %v7324_v48  ;;  %vm7341_vm9 = vcmp.eq.f32.partialorder %v3470_v26, 8.507059e+37 }
 0x4d4   : > { %v7326_v17 = vpop.eup %5414  ;;  %v3420_v10 = vadd.f32 %v5403_v21, %v3419_v1  ;;  %v3492_v2 = vmul.f32 %v5413_v60, %v7290_v56  ;;  %v3434_v3 = vmul.f32 %v5407_v46, %v3433_v0  ;;  %v3485_v49 = vand.u32 2147483647, %v7309_v11  ;;  %vm3438_vm10 = vmor %vm3436_vm15, %vm3437_vm8  ;;  %v2320_v1 = vpop.f32.mrf.mxu2 }
 0x4d5   : > { %v5417_v37 = vpop.eup %5416  ;;  %v3487_v23 = vand.u32 2147483648, %v7309_v11  ;;  %vm3497_vm11 = vweird.f32 %v5413_v60  ;;  %5422 = vrcp.f32 %v7334_v28  ;;  %v3473_v33 = vor.u32 1.1754944e-38, %v3472_v43 }
 0x4d6   : > { %v3424_v52 = vsel %vm3423_vm7, %v5403_v21, %v3420_v10  ;;  %v3493_v55 = vsub.f32 1.0, %v3492_v2  ;;  %v3462_v62 = vmul.f32 %v5417_v37, %v7293_v50  ;;  %v3435_v20 = vadd.f32 %v5407_v46, %v3434_v3  ;;  %v5419_v25 = vpop.eup %5418  ;;  %vm3498_vm12 = vmor %vm3496_vm5, %vm3497_vm11 }
 0x4d7   : > { %v3429_v22 = vsel %vm7300_vm14, %v3428_v63, %v3424_v52  ;;  %v3477_v42 = vmul.f32 %v5419_v25, %v7309_v11  ;;  %vm3481_vm13 = vweird.f32 %v7309_v11  ;;  %vm3467_vm2 = vweird.f32 %v5417_v37 }
 0x4d8   : > { %4310 = vst [vmem:[%s6529_s18 + $0x138] sm:$0xff] %v3429_v22  ;;  %v3494_v32 = vmul.f32 %v5413_v60, %v3493_v55  ;;  %v3463_v27 = vsub.f32 1.0, %v3462_v62  ;;  %v3439_v40 = vsel %vm3438_vm10, %v5407_v46, %v3435_v20  ;;  %vm7360_vm14 = vcmp.eq.f32.partialorder %v3485_v49, 8.507059e+37  ;;  %v2412_v10 = vpop.f32.mrf.mxu0 }
 0x4d9   : > { %v3444_v5 = vsel %vm7315_vm0, %v3443_v61, %v3439_v40  ;;  %v5421_v51 = vpop.eup %5420  ;;  %v3478_v41 = vsub.f32 1.0, %v3477_v42  ;;  %v3488_v54 = vor.u32 1.1754944e-38, %v3487_v23  ;;  %v7364_v45 = vadd.f32 1.0, %v5411_v13  ;;  %vm3468_vm0 = vmor %vm3466_vm6, %vm3467_vm2  ;;  %v2234_v40 = vpop.f32.mrf.mxu3 }
 0x4da   : > { %v3495_v6 = vadd.f32 %v5413_v60, %v3494_v32  ;;  %v3464_v14 = vmul.f32 %v5417_v37, %v3463_v27  ;;  %4311 = vst [vmem:[%s6529_s18 + $0x140] sm:$0xff] %v3444_v5  ;;  %v3537_v21 = vmul.f32 %v5421_v51, %v7324_v48  ;;  %vm3541_vm15 = vweird.f32 %v7324_v48 }
 0x4db   : > { %v3479_v56 = vmul.f32 %v5419_v25, %v3478_v41  ;;  %vm3482_vm3 = vweird.f32 %v5419_v25  ;;  %v3545_v59 = vand.u32 2147483647, %v7324_v48  ;;  %v5423_v4 = vpop.eup %5422  ;;  %v3547_v30 = vand.u32 2147483648, %v7324_v48 }
 0x4dc   : > { %v3499_v35 = vsel %vm3498_vm12, %v5413_v60, %v3495_v6  ;;  %v3465_v58 = vadd.f32 %v5417_v37, %v3464_v14  ;;  %v3538_v7 = vsub.f32 1.0, %v3537_v21  ;;  %5424 = vrcp.f32 %v7364_v45  ;;  %vm3483_vm5 = vmor %vm3481_vm13, %vm3482_vm3  ;;  %v2323_v15 = vpop.f32.mrf.mxu2 }
 0x4dd   : > { %v3504_v24 = vsel %vm7329_vm4, %v3503_v8, %v3499_v35  ;;  %v3480_v46 = vadd.f32 %v5419_v25, %v3479_v56  ;;  %v3507_v50 = vmul.f32 %v5423_v4, %v7334_v28  ;;  %v3515_v9 = vand.u32 2147483647, %v7334_v28 }
 0x4de   : > { %4315 = vst.msk [vmem:[%s6529_s18 + $0x160] sm:$0xff] %vm790_vm1, %v3504_v24  ;;  %v3469_v57 = vsel %vm3468_vm0, %v5417_v37, %v3465_v58  ;;  %v3539_v16 = vmul.f32 %v5421_v51, %v3538_v7  ;;  %vm3542_vm4 = vweird.f32 %v5421_v51  ;;  %v3517_v12 = vand.u32 2147483648, %v7334_v28 }
 0x4df   : > { %v3474_v63 = vsel %vm7341_vm9, %v3473_v33, %v3469_v57  ;;  %v7386_v38 = vadd.f32 1.0, %v7326_v17  ;;  %v3484_v61 = vsel %vm3483_vm5, %v5419_v25, %v3480_v46  ;;  %v3508_v36 = vsub.f32 1.0, %v3507_v50  ;;  %vm3543_vm8 = vmor %vm3541_vm15, %vm3542_vm4 }
 0x4e0   : > { %4313 = vst [vmem:[%s6529_s18 + $0x150] sm:$0xff] %v3474_v63  ;;  %5426 = vpow2.f32 %v7306_v29  ;;  %v4835_v13 = vmul.f32 -1.442695, %v7312_v47  ;;  %v3489_v26 = vsel %vm7360_vm14, %v3488_v54, %v3484_v61  ;;  %v3540_v60 = vadd.f32 %v5421_v51, %v3539_v16 }
 0x4e1   : > { %vm3546_vm6 = vcmp.eq.f32.partialorder %v3545_v59, 8.507059e+37  ;;  %vm3511_vm7 = vweird.f32 %v7334_v28  ;;  %4314 = vst [vmem:[%s6529_s18 + $0x158] sm:$0xff] %v3489_v26  ;;  %v3548_v11 = vor.u32 1.1754944e-38, %v3547_v30  ;;  %v3509_v0 = vmul.f32 %v5423_v4, %v3508_v36  ;;  %v2236_v42 = vpop.f32.mrf.mxu3 }
 0x4e2   : > { %vm3512_vm9 = vweird.f32 %v5423_v4  ;;  %5428 = vrcp.f32 %v7386_v38  ;;  %v5425_v29 = vpop.eup %5424  ;;  %v3544_v47 = vsel %vm3543_vm8, %v5421_v51, %v3540_v60  ;;  %vm7397_vm10 = vcmp.eq.f32.partialorder %v3515_v9, 8.507059e+37 }
 0x4e3   : > { %5430 = vpow2.f32 %v4835_v13  ;;  %v2410_v17 = vadd.f32 %v2409_v34, %v6472_v39  ;;  %v3549_v2 = vsel %vm3546_vm6, %v3548_v11, %v3544_v47  ;;  %v3510_v44 = vadd.f32 %v5423_v4, %v3509_v0  ;;  %vm3513_vm11 = vmor %vm3511_vm7, %vm3512_vm9 }
 0x4e4   : > { %v3518_v48 = vor.u32 1.1754944e-38, %v3517_v12  ;;  %v3522_v37 = vmul.f32 %v5425_v29, %v7364_v45  ;;  %4318 = vst.msk [vmem:[%s6529_s18 + $0x178] sm:$0xff] %vm790_vm1, %v3549_v2  ;;  %v3530_v3 = vand.u32 2147483647, %v7364_v45  ;;  %v3532_v8 = vand.u32 2147483648, %v7364_v45 }
 0x4e5   : > { %v4839_v52 = vmul.f32 -1.442695, %v2410_v17  ;;  %v2232_v55 = vadd.f32 %v2231_v31, %v6475_v19  ;;  %v3514_v18 = vsel %vm3513_vm11, %v5423_v4, %v3510_v44  ;;  %v2321_v20 = vadd.f32 %v2320_v1, %v6477_v53 }
 0x4e6   : > { %v5427_v62 = vpop.eup %5426  ;;  %v3523_v22 = vsub.f32 1.0, %v3522_v37  ;;  %v2413_v49 = vadd.f32 %v2412_v10, %v6472_v39  ;;  %v3519_v23 = vsel %vm7397_vm10, %v3518_v48, %v3514_v18  ;;  %vm3526_vm13 = vweird.f32 %v7364_v45 }
 0x4e7   : > { %v7414_v28 = vadd.f32 1.0, %v5427_v62  ;;  %5432 = vpow2.f32 %v4839_v52  ;;  %v4837_v25 = vmul.f32 -1.442695, %v2232_v55  ;;  %4316 = vst [vmem:[%s6529_s18 + $0x168] sm:$0xff] %v3519_v23  ;;  %vm3527_vm2 = vweird.f32 %v5425_v29 }
 0x4e8   : > { %v5429_v32 = vpop.eup %5428  ;;  %v3524_v27 = vmul.f32 %v5425_v29, %v3523_v22  ;;  %vm7418_vm12 = vcmp.eq.f32.partialorder %v3530_v3, 8.507059e+37  ;;  %v3533_v5 = vor.u32 1.1754944e-38, %v3532_v8  ;;  %v3590_v34 = vand.u32 2147483647, %v7386_v38  ;;  %vm3528_vm14 = vmor %vm3526_vm13, %vm3527_vm2 }
 0x4e9   : > { %v5431_v33 = vpop.eup %5430  ;;  %v3582_v6 = vmul.f32 %v5429_v32, %v7386_v38  ;;  %5434 = vrcp.f32 %v7414_v28  ;;  %v4838_v41 = vmul.f32 -1.442695, %v2321_v20  ;;  %v4842_v45 = vmul.f32 -1.442695, %v2413_v49 }
 0x4ea   : > { %v3525_v14 = vadd.f32 %v5425_v29, %v3524_v27  ;;  %v7425_v51 = vadd.f32 1.0, %v5431_v33  ;;  %5436 = vpow2.f32 %v4837_v25  ;;  %v2235_v35 = vadd.f32 %v2234_v40, %v6475_v19 }
 0x4eb   : > { %v3583_v54 = vsub.f32 1.0, %v3582_v6  ;;  %vm3587_vm15 = vweird.f32 %v5429_v32  ;;  %v3592_v21 = vand.u32 2147483648, %v7386_v38  ;;  %v3560_v4 = vand.u32 2147483647, %v7414_v28 }
 0x4ec   : > { %v3529_v58 = vsel %vm3528_vm14, %v5425_v29, %v3525_v14  ;;  %5438 = vrcp.f32 %v7425_v51  ;;  %v2324_v57 = vadd.f32 %v2323_v15, %v6477_v53  ;;  %vm3586_vm0 = vweird.f32 %v7386_v38  ;;  %v2414_v29 = vpop.f32.mrf.mxu0 }
 0x4ed   : > { %v5433_v24 = vpop.eup %5432  ;;  %v3534_v56 = vsel %vm7418_vm12, %v3533_v5, %v3529_v58  ;;  %v3584_v59 = vmul.f32 %v5429_v32, %v3583_v54  ;;  %vm7436_vm3 = vcmp.eq.f32.partialorder %v3590_v34, 8.507059e+37  ;;  %5440 = vpow2.f32 %v4838_v41  ;;  %vm3588_vm5 = vmor %vm3586_vm0, %vm3587_vm15 }
 0x4ee   : > { %4317 = vst [vmem:[%s6529_s18 + $0x170] sm:$0xff] %v3534_v56  ;;  %v7440_v30 = vadd.f32 1.0, %v5433_v24  ;;  %v3562_v50 = vand.u32 2147483648, %v7414_v28  ;;  %5442 = vpow2.f32 %v4842_v45  ;;  %v4840_v9 = vmul.f32 -1.442695, %v2235_v35  ;;  %v2325_v35 = vpop.f32.mrf.mxu2 }
 0x4ef   : > { %v5435_v63 = vpop.eup %5434  ;;  %v3585_v46 = vadd.f32 %v5429_v32, %v3584_v59  ;;  %v3593_v31 = vor.u32 1.1754944e-38, %v3592_v21  ;;  %v3575_v12 = vand.u32 2147483647, %v7425_v51  ;;  %vm3556_vm4 = vweird.f32 %v7414_v28 }
 0x4f0   : > { %v3552_v16 = vmul.f32 %v5435_v63, %v7414_v28  ;;  %5444 = vrcp.f32 %v7440_v30  ;;  %v5437_v38 = vpop.eup %5436  ;;  %vm7448_vm6 = vcmp.eq.f32.partialorder %v3560_v4, 8.507059e+37  ;;  %v4841_v13 = vmul.f32 -1.442695, %v2324_v57 }
 0x4f1   : > { %v3589_v61 = vsel %vm3588_vm5, %v5429_v32, %v3585_v46  ;;  %v3577_v11 = vand.u32 2147483648, %v7425_v51  ;;  %v7455_v0 = vadd.f32 1.0, %v5437_v38  ;;  %v3563_v47 = vor.u32 1.1754944e-38, %v3562_v50 }
 0x4f2   : > { %v5439_v1 = vpop.eup %5438  ;;  %v3594_v26 = vsel %vm7436_vm3, %v3593_v31, %v3589_v61  ;;  %v3553_v60 = vsub.f32 1.0, %v3552_v16  ;;  %vm3571_vm7 = vweird.f32 %v7425_v51  ;;  %5446 = vpow2.f32 %v4840_v9 }
 0x4f3   : > { %4321 = vst.msk [vmem:[%s6529_s18 + $0x190] sm:$0xff] %vm790_vm1, %v3594_v26  ;;  %v3567_v43 = vmul.f32 %v5439_v1, %v7425_v51  ;;  %v5441_v17 = vpop.eup %5440  ;;  %vm3557_vm8 = vweird.f32 %v5435_v63  ;;  %vm7461_vm9 = vcmp.eq.f32.partialorder %v3575_v12, 8.507059e+37  ;;  %5448 = vrcp.f32 %v7455_v0 }
 0x4f4   : > { %v3554_v10 = vmul.f32 %v5435_v63, %v3553_v60  ;;  %v5443_v44 = vpop.eup %5442  ;;  %v7466_v37 = vadd.f32 1.0, %v5441_v17  ;;  %5450 = vpow2.f32 %v4841_v13  ;;  %v2415_v3 = vadd.f32 %v2414_v29, %v6472_v39  ;;  %vm3558_vm10 = vmor %vm3556_vm4, %vm3557_vm8  ;;  %v2417_v46 = vpop.f32.mrf.mxu0 }
 0x4f5   : > { %v3568_v48 = vsub.f32 1.0, %v3567_v43  ;;  %v3578_v55 = vor.u32 1.1754944e-38, %v3577_v11  ;;  %v3635_v62 = vand.u32 2147483647, %v7440_v30  ;;  %v7470_v18 = vadd.f32 1.0, %v5443_v44  ;;  %v2239_v17 = vpop.f32.mrf.mxu3 }
 0x4f6   : > { %v5445_v8 = vpop.eup %5444  ;;  %v3555_v52 = vadd.f32 %v5435_v63, %v3554_v10  ;;  %vm3572_vm11 = vweird.f32 %v5439_v1  ;;  %vm3631_vm13 = vweird.f32 %v7440_v30  ;;  %v3637_v23 = vand.u32 2147483648, %v7440_v30 }
 0x4f7   : > { %v3569_v22 = vmul.f32 %v5439_v1, %v3568_v48  ;;  %v3627_v20 = vmul.f32 %v5445_v8, %v7440_v30  ;;  %v3605_v25 = vand.u32 2147483647, %v7455_v0  ;;  %5452 = vrcp.f32 %v7466_v37  ;;  %vm3573_vm2 = vmor %vm3571_vm7, %vm3572_vm11 }
 0x4f8   : > { %v3559_v49 = vsel %vm3558_vm10, %v5435_v63, %v3555_v52  ;;  %v5447_v32 = vpop.eup %5446  ;;  %v3607_v33 = vand.u32 2147483648, %v7455_v0  ;;  %vm3632_vm12 = vweird.f32 %v5445_v8  ;;  %vm7486_vm14 = vcmp.eq.f32.partialorder %v3635_v62, 8.507059e+37 }
 0x4f9   : > { %v3564_v27 = vsel %vm7448_vm6, %v3563_v47, %v3559_v49  ;;  %v3570_v28 = vadd.f32 %v5439_v1, %v3569_v22  ;;  %v3628_v40 = vsub.f32 1.0, %v3627_v20  ;;  %v5449_v5 = vpop.eup %5448  ;;  %5454 = vrcp.f32 %v7470_v18  ;;  %vm3633_vm3 = vmor %vm3631_vm13, %vm3632_vm12 }
 0x4fa   : > { %4319 = vst [vmem:[%s6529_s18 + $0x180] sm:$0xff] %v3564_v27  ;;  %v4845_v14 = vmul.f32 -1.442695, %v2415_v3  ;;  %v5451_v34 = vpop.eup %5450  ;;  %v3597_v54 = vmul.f32 %v5449_v5, %v7455_v0  ;;  %v3620_v45 = vand.u32 2147483647, %v7466_v37  ;;  %v3638_v58 = vor.u32 1.1754944e-38, %v3637_v23 }
 0x4fb   : > { %v3574_v41 = vsel %vm3573_vm2, %v5439_v1, %v3570_v28  ;;  %v3629_v15 = vmul.f32 %v5445_v8, %v3628_v40  ;;  %vm3601_vm15 = vweird.f32 %v7455_v0  ;;  %vm7496_vm0 = vcmp.eq.f32.partialorder %v3605_v25, 8.507059e+37 }
 0x4fc   : > { %v3579_v51 = vsel %vm7461_vm9, %v3578_v55, %v3574_v41  ;;  %v3598_v56 = vsub.f32 1.0, %v3597_v54  ;;  %v3608_v59 = vor.u32 1.1754944e-38, %v3607_v33  ;;  %v7501_v4 = vadd.f32 1.0, %v5447_v32  ;;  %v2328_v55 = vpop.f32.mrf.mxu2  ;;  %v2419_v33 = vpop.f32.mrf.mxu0 }
 0x4fd   : > { %4320 = vst [vmem:[%s6529_s18 + $0x188] sm:$0xff] %v3579_v51  ;;  %v3630_v24 = vadd.f32 %v5445_v8, %v3629_v15  ;;  %v5453_v57 = vpop.eup %5452  ;;  %vm3616_vm5 = vweird.f32 %v7466_v37  ;;  %v3622_v7 = vand.u32 2147483648, %v7466_v37  ;;  %v7508_v63 = vadd.f32 1.0, %v5451_v34 }
 0x4fe   : > { %5456 = vpow2.f32 %v4845_v14  ;;  %v3599_v9 = vmul.f32 %v5449_v5, %v3598_v56  ;;  %vm3602_vm4 = vweird.f32 %v5449_v5  ;;  %v3612_v31 = vmul.f32 %v5453_v57, %v7466_v37 }
 0x4ff   : > { %v3634_v50 = vsel %vm3633_vm3, %v5445_v8, %v3630_v24  ;;  %vm7511_vm6 = vcmp.eq.f32.partialorder %v3620_v45, 8.507059e+37  ;;  %v5455_v30 = vpop.eup %5454  ;;  %v3680_v38 = vand.u32 2147483647, %v7470_v18  ;;  %5458 = vrcp.f32 %v7501_v4  ;;  %vm3603_vm8 = vmor %vm3601_vm15, %vm3602_vm4 }
 0x500   : > { %v3639_v12 = vsel %vm7486_vm14, %v3638_v58, %v3634_v50  ;;  %v2237_v61 = vadd.f32 %v2236_v42, %v6475_v19  ;;  %v3600_v36 = vadd.f32 %v5449_v5, %v3599_v9  ;;  %v3613_v13 = vsub.f32 1.0, %v3612_v31 }
 0x501   : > { %4324 = vst.msk [vmem:[%s6529_s18 + $0x1a8] sm:$0xff] %vm790_vm1, %v3639_v12  ;;  %v3672_v1 = vmul.f32 %v5455_v30, %v7470_v18  ;;  %vm3676_vm7 = vweird.f32 %v7470_v18  ;;  %vm3617_vm9 = vweird.f32 %v5453_v57  ;;  %v3682_v26 = vand.u32 2147483648, %v7470_v18 }
 0x502   : > { %5460 = vrcp.f32 %v7508_v63  ;;  %v2326_v60 = vadd.f32 %v2325_v35, %v6477_v53  ;;  %v3604_v11 = vsel %vm3603_vm8, %v5449_v5, %v3600_v36  ;;  %v3614_v29 = vmul.f32 %v5453_v57, %v3613_v13  ;;  %vm3618_vm13 = vmor %vm3616_vm5, %vm3617_vm9 }
 0x503   : > { %v3673_v47 = vsub.f32 1.0, %v3672_v1  ;;  %v3650_v43 = vand.u32 2147483647, %v7501_v4  ;;  %v3609_v2 = vsel %vm7496_vm0, %v3608_v59, %v3604_v11  ;;  %v3623_v0 = vor.u32 1.1754944e-38, %v3622_v7 }
 0x504   : > { %v5457_v10 = vpop.eup %5456  ;;  %vm7532_vm10 = vcmp.eq.f32.partialorder %v3680_v38, 8.507059e+37  ;;  %v4843_v48 = vmul.f32 -1.442695, %v2237_v61  ;;  %4322 = vst [vmem:[%s6529_s18 + $0x198] sm:$0xff] %v3609_v2  ;;  %v3615_v3 = vadd.f32 %v5453_v57, %v3614_v29  ;;  %vm3677_vm11 = vweird.f32 %v5455_v30  ;;  %v2330_v38 = vpop.f32.mrf.mxu2 }
 0x505   : > { %v3674_v8 = vmul.f32 %v5455_v30, %v3673_v47  ;;  %v7537_v52 = vadd.f32 1.0, %v5457_v10  ;;  %v5459_v62 = vpop.eup %5458  ;;  %v3683_v22 = vor.u32 1.1754944e-38, %v3682_v26  ;;  %vm3646_vm2 = vweird.f32 %v7501_v4  ;;  %vm3678_vm14 = vmor %vm3676_vm7, %vm3677_vm11 }
 0x506   : > { %5462 = vpow2.f32 %v4843_v48  ;;  %v4844_v20 = vmul.f32 -1.442695, %v2326_v60  ;;  %v3619_v49 = vsel %vm3618_vm13, %v5453_v57, %v3615_v3  ;;  %v3642_v25 = vmul.f32 %v5459_v62, %v7501_v4  ;;  %v2241_v57 = vpop.f32.mrf.mxu3 }
 0x507   : > { %v3675_v23 = vadd.f32 %v5455_v30, %v3674_v8  ;;  %vm7544_vm12 = vcmp.eq.f32.partialorder %v3650_v43, 8.507059e+37  ;;  %v2418_v27 = vadd.f32 %v2417_v46, %v6472_v39  ;;  %v3624_v37 = vsel %vm7511_vm6, %v3623_v0, %v3619_v49  ;;  %v2422_v43 = vpop.f32.mrf.mxu0 }
 0x508   : > { %v5461_v28 = vpop.eup %5460  ;;  %v3652_v40 = vand.u32 2147483648, %v7501_v4  ;;  %vm3661_vm15 = vweird.f32 %v7508_v63  ;;  %5464 = vrcp.f32 %v7537_v52  ;;  %4323 = vst [vmem:[%s6529_s18 + $0x1a0] sm:$0xff] %v3624_v37  ;;  %v3643_v5 = vsub.f32 1.0, %v3642_v25 }
 0x509   : > { %v3679_v42 = vsel %vm3678_vm14, %v5455_v30, %v3675_v23  ;;  %v3657_v6 = vmul.f32 %v5461_v28, %v7508_v63  ;;  %v3665_v14 = vand.u32 2147483647, %v7508_v63  ;;  %vm3647_vm0 = vweird.f32 %v5459_v62 }
 0x50a   : > { %v3684_v34 = vsel %vm7532_vm10, %v3683_v22, %v3679_v42  ;;  %v3667_v18 = vand.u32 2147483648, %v7508_v63  ;;  %5466 = vpow2.f32 %v4844_v20  ;;  %v3644_v41 = vmul.f32 %v5459_v62, %v3643_v5  ;;  %vm3648_vm5 = vmor %vm3646_vm2, %vm3647_vm0 }
 0x50b   : > { %4327 = vst.msk [vmem:[%s6529_s18 + $0x1c0] sm:$0xff] %vm790_vm1, %v3684_v34  ;;  %v3658_v15 = vsub.f32 1.0, %v3657_v6  ;;  %v4848_v54 = vmul.f32 -1.442695, %v2418_v27  ;;  %v2240_v45 = vadd.f32 %v2239_v17, %v6475_v19  ;;  %v3653_v51 = vor.u32 1.1754944e-38, %v3652_v40 }
 0x50c   : > { %v5463_v35 = vpop.eup %5462  ;;  %vm3662_vm3 = vweird.f32 %v5461_v28  ;;  %v2329_v58 = vadd.f32 %v2328_v55, %v6477_v53  ;;  %v2420_v21 = vadd.f32 %v2419_v33, %v6472_v39  ;;  %v3645_v24 = vadd.f32 %v5459_v62, %v3644_v41 }
 0x50d   : > { %v3659_v56 = vmul.f32 %v5461_v28, %v3658_v15  ;;  %v7568_v59 = vadd.f32 1.0, %v5463_v35  ;;  %5468 = vpow2.f32 %v4848_v54  ;;  %vm7573_vm4 = vcmp.eq.f32.partialorder %v3665_v14, 8.507059e+37  ;;  %vm3663_vm7 = vmor %vm3661_vm15, %vm3662_vm3 }
 0x50e   : > { %v5465_v7 = vpop.eup %5464  ;;  %v3668_v50 = vor.u32 1.1754944e-38, %v3667_v18  ;;  %vm3721_vm6 = vweird.f32 %v7537_v52  ;;  %v4846_v9 = vmul.f32 -1.442695, %v2240_v45  ;;  %v3649_v31 = vsel %vm3648_vm5, %v5459_v62, %v3645_v24 }
 0x50f   : > { %v3660_v16 = vadd.f32 %v5461_v28, %v3659_v56  ;;  %v3717_v30 = vmul.f32 %v5465_v7, %v7537_v52  ;;  %v3725_v12 = vand.u32 2147483647, %v7537_v52  ;;  %v3654_v4 = vsel %vm7544_vm12, %v3653_v51, %v3649_v31 }
 0x510   : > { %v5467_v61 = vpop.eup %5466  ;;  %5470 = vrcp.f32 %v7568_v59  ;;  %v4847_v36 = vmul.f32 -1.442695, %v2329_v58  ;;  %v2242_v13 = vadd.f32 %v2241_v57, %v6475_v19  ;;  %4325 = vst [vmem:[%s6529_s18 + $0x1b0] sm:$0xff] %v3654_v4  ;;  %v4851_v11 = vmul.f32 -1.442695, %v2420_v21 }
 0x511   : > { %v3664_v1 = vsel %vm3663_vm7, %v5461_v28, %v3660_v16  ;;  %v3718_v26 = vsub.f32 1.0, %v3717_v30  ;;  %v7588_v60 = vadd.f32 1.0, %v5467_v61  ;;  %v3727_v47 = vand.u32 2147483648, %v7537_v52  ;;  %v7646_v30 = vpop.f32.mrf.mxu3 }
 0x512   : > { %v3669_v29 = vsel %vm7573_vm4, %v3668_v50, %v3664_v1  ;;  %5472 = vpow2.f32 %v4846_v9  ;;  %v2331_v63 = vadd.f32 %v2330_v38, %v6477_v53  ;;  %vm3722_vm8 = vweird.f32 %v5465_v7 }
 0x513   : > { %v5469_v17 = vpop.eup %5468  ;;  %4326 = vst [vmem:[%s6529_s18 + $0x1b8] sm:$0xff] %v3669_v29  ;;  %v3719_v10 = vmul.f32 %v5465_v7, %v3718_v26  ;;  %v3695_v2 = vand.u32 2147483647, %v7568_v59  ;;  %5474 = vrcp.f32 %v7588_v60  ;;  %vm7597_vm9 = vcmp.eq.f32.partialorder %v3725_v12, 8.507059e+37  ;;  %vm3723_vm10 = vmor %vm3721_vm6, %vm3722_vm8  ;;  %v7648_v12 = vpop.f32.mrf.mxu2 }
 0x514   : > { %v3697_v44 = vand.u32 2147483648, %v7568_v59  ;;  %v7602_v48 = vadd.f32 1.0, %v5469_v17  ;;  %5476 = vpow2.f32 %v4847_v36  ;;  %v4849_v8 = vmul.f32 -1.442695, %v2242_v13 }
 0x515   : > { %v3720_v3 = vadd.f32 %v5465_v7, %v3719_v10  ;;  %5478 = vpow2.f32 %v4851_v11  ;;  %v2423_v55 = vadd.f32 %v2422_v43, %v6472_v39  ;;  %v3728_v22 = vor.u32 1.1754944e-38, %v3727_v47 }
 0x516   : > { %v5471_v62 = vpop.eup %5470  ;;  %v3710_v20 = vand.u32 2147483647, %v7588_v60  ;;  %5480 = vrcp.f32 %v7602_v48  ;;  %v4850_v49 = vmul.f32 -1.442695, %v2331_v63  ;;  %vm3691_vm11 = vweird.f32 %v7568_v59 }
 0x517   : > { %v3724_v23 = vsel %vm3723_vm10, %v5465_v7, %v3720_v3  ;;  %v3687_v25 = vmul.f32 %v5471_v62, %v7568_v59  ;;  %vm7611_vm13 = vcmp.eq.f32.partialorder %v3695_v2, 8.507059e+37  ;;  %v3698_v28 = vor.u32 1.1754944e-38, %v3697_v44 }
 0x518   : > { %v5473_v27 = vpop.eup %5472  ;;  %v3729_v52 = vsel %vm7597_vm9, %v3728_v22, %v3724_v23  ;;  %vm3706_vm2 = vweird.f32 %v7588_v60  ;;  %v3712_v37 = vand.u32 2147483648, %v7588_v60  ;;  %5482 = vpow2.f32 %v4849_v8 }
 0x519   : > { %v5475_v40 = vpop.eup %5474  ;;  %4330 = vst.msk [vmem:[%s6529_s18 + $0x1d8] sm:$0xff] %vm790_vm1, %v3729_v52  ;;  %v3688_v33 = vsub.f32 1.0, %v3687_v25  ;;  %v7621_v42 = vadd.f32 1.0, %v5473_v27  ;;  %v4854_v5 = vmul.f32 -1.442695, %v2423_v55  ;;  %vm3692_vm12 = vweird.f32 %v5471_v62  ;;  %v2246_v34 = vpop.f32.mrf.mxu3 }
 0x51a   : > { %v5477_v6 = vpop.eup %5476  ;;  %v3702_v14 = vmul.f32 %v5475_v40, %v7588_v60  ;;  %vm7624_vm14 = vcmp.eq.f32.partialorder %v3710_v20, 8.507059e+37  ;;  %5484 = vpow2.f32 %v4850_v49  ;;  %v3770_v15 = vand.u32 2147483647, %v7602_v48  ;;  %vm3693_vm0 = vmor %vm3691_vm11, %vm3692_vm12 }
 0x51b   : > { %v5479_v18 = vpop.eup %5478  ;;  %v3689_v41 = vmul.f32 %v5471_v62, %v3688_v33  ;;  %v3772_v54 = vand.u32 2147483648, %v7602_v48  ;;  %5486 = vrcp.f32 %v7621_v42  ;;  %v3713_v51 = vor.u32 1.1754944e-38, %v3712_v37 }
 0x51c   : > { %v5481_v45 = vpop.eup %5480  ;;  %v3703_v35 = vsub.f32 1.0, %v3702_v14  ;;  %v7631_v58 = vadd.f32 1.0, %v5477_v6  ;;  %v7633_v21 = vadd.f32 1.0, %v5479_v18  ;;  %vm3766_vm15 = vweird.f32 %v7602_v48  ;;  %v2335_v18 = vpop.f32.mrf.mxu2 }
 0x51d   : > { %v3690_v24 = vadd.f32 %v5471_v62, %v3689_v41  ;;  %v3762_v56 = vmul.f32 %v5481_v45, %v7602_v48  ;;  %5488 = vpow2.f32 %v4854_v5  ;;  %vm3707_vm3 = vweird.f32 %v5475_v40  ;;  %v7685_v48 = vpop.f32.mrf.mxu0 }
 0x51e   : > { %v3704_v57 = vmul.f32 %v5475_v40, %v3703_v35  ;;  %v3740_v7 = vand.u32 2147483647, %v7621_v42  ;;  %5490 = vrcp.f32 %v7631_v58  ;;  %v5483_v46 = vpop.eup %5482  ;;  %vm7642_vm5 = vcmp.eq.f32.partialorder %v3770_v15, 8.507059e+37  ;;  %vm3708_vm4 = vmor %vm3706_vm2, %vm3707_vm3 }
 0x51f   : > { %v3694_v50 = vsel %vm3693_vm0, %v5471_v62, %v3690_v24  ;;  %v3763_v9 = vsub.f32 1.0, %v3762_v56  ;;  %v3773_v16 = vor.u32 1.1754944e-38, %v3772_v54  ;;  %v3742_v4 = vand.u32 2147483648, %v7621_v42 }
 0x520   : > { %v5485_v59 = vpop.eup %5484  ;;  %v3699_v38 = vsel %vm7611_vm13, %v3698_v28, %v3694_v50  ;;  %v3705_v61 = vadd.f32 %v5475_v40, %v3704_v57  ;;  %5492 = vrcp.f32 %v7633_v21  ;;  %vm3767_vm6 = vweird.f32 %v5481_v45 }
 0x521   : > { %v5487_v36 = vpop.eup %5486  ;;  %4328 = vst [vmem:[%s6529_s18 + $0x1c8] sm:$0xff] %v3699_v38  ;;  %v3764_v13 = vmul.f32 %v5481_v45, %v3763_v9  ;;  %vm3736_vm7 = vweird.f32 %v7621_v42  ;;  %v3755_v1 = vand.u32 2147483647, %v7631_v58  ;;  %vm7661_vm8 = vcmp.eq.f32.partialorder %v3740_v7, 8.507059e+37  ;;  %vm3768_vm9 = vmor %vm3766_vm15, %vm3767_vm6 }
 0x522   : > { %v3709_v26 = vsel %vm3708_vm4, %v5475_v40, %v3705_v61  ;;  %v3732_v11 = vmul.f32 %v5487_v36, %v7621_v42  ;;  %v3757_v47 = vand.u32 2147483648, %v7631_v58  ;;  %v3815_v17 = vand.u32 2147483647, %v7633_v21 }
 0x523   : > { %v5489_v63 = vpop.eup %5488  ;;  %v3714_v60 = vsel %vm7624_vm14, %v3713_v51, %v3709_v26  ;;  %v3765_v43 = vadd.f32 %v5481_v45, %v3764_v13  ;;  %v7669_v10 = vadd.f32 1.0, %v5483_v46  ;;  %v3743_v44 = vor.u32 1.1754944e-38, %v3742_v4 }
 0x524   : > { %v5491_v2 = vpop.eup %5490  ;;  %4329 = vst [vmem:[%s6529_s18 + $0x1d0] sm:$0xff] %v3714_v60  ;;  %v3733_v0 = vsub.f32 1.0, %v3732_v11  ;;  %vm3751_vm10 = vweird.f32 %v7631_v58  ;;  %v7675_v3 = vadd.f32 1.0, %v5485_v59  ;;  %vm7678_vm11 = vcmp.eq.f32.partialorder %v3755_v1, 8.507059e+37 }
 0x525   : > { %v3769_v8 = vsel %vm3768_vm9, %v5481_v45, %v3765_v43  ;;  %v3747_v55 = vmul.f32 %v5491_v2, %v7631_v58  ;;  %vm3811_vm13 = vweird.f32 %v7633_v21  ;;  %v3817_v22 = vand.u32 2147483648, %v7633_v21 }
 0x526   : > { %5494 = vrcp.f32 %v7669_v10  ;;  %v5493_v20 = vpop.eup %5492  ;;  %v3774_v49 = vsel %vm7642_vm5, %v3773_v16, %v3769_v8  ;;  %v3734_v23 = vmul.f32 %v5487_v36, %v3733_v0  ;;  %vm3737_vm2 = vweird.f32 %v5487_v36  ;;  %v2338_v8 = vpop.f32.mrf.mxu2 }
 0x527   : > { %v7689_v25 = vadd.f32 1.0, %v5489_v63  ;;  %4333 = vst.msk [vmem:[%s6529_s18 + $0x1f0] sm:$0xff] %vm790_vm1, %v3774_v49  ;;  %v3748_v32 = vsub.f32 1.0, %v3747_v55  ;;  %v3758_v27 = vor.u32 1.1754944e-38, %v3757_v47  ;;  %v3807_v52 = vmul.f32 %v5493_v20, %v7633_v21  ;;  %vm3738_vm14 = vmor %vm3736_vm7, %vm3737_vm2 }
 0x528   : > { %vm7694_vm12 = vcmp.eq.f32.partialorder %v3815_v17, 8.507059e+37  ;;  %v3735_v37 = vadd.f32 %v5487_v36, %v3734_v23  ;;  %v3785_v40 = vand.u32 2147483647, %v7669_v10  ;;  %v3787_v33 = vand.u32 2147483648, %v7669_v10 }
 0x529   : > { %5496 = vrcp.f32 %v7675_v3  ;;  %v3749_v5 = vmul.f32 %v5491_v2, %v3748_v32  ;;  %vm3752_vm15 = vweird.f32 %v5491_v2  ;;  %v3808_v6 = vsub.f32 1.0, %v3807_v52 }
 0x52a   : > { %v3818_v14 = vor.u32 1.1754944e-38, %v3817_v22  ;;  %v3739_v41 = vsel %vm3738_vm14, %v5487_v36, %v3735_v37  ;;  %vm3781_vm0 = vweird.f32 %v7669_v10  ;;  %v3802_v15 = vand.u32 2147483648, %v7675_v3  ;;  %vm3753_vm5 = vmor %vm3751_vm10, %vm3752_vm15  ;;  %v2427_v36 = vpop.f32.mrf.mxu0 }
 0x52b   : > { %5498 = vrcp.f32 %v7689_v25  ;;  %v3744_v45 = vsel %vm7661_vm8, %v3743_v44, %v3739_v41  ;;  %v3750_v42 = vadd.f32 %v5491_v2, %v3749_v5  ;;  %v3809_v35 = vmul.f32 %v5493_v20, %v3808_v6  ;;  %v2249_v44 = vpop.f32.mrf.mxu3 }
 0x52c   : > { %v5495_v54 = vpop.eup %5494  ;;  %vm3812_vm3 = vweird.f32 %v5493_v20  ;;  %4331 = vst [vmem:[%s6529_s18 + $0x1e0] sm:$0xff] %v3744_v45  ;;  %vm7713_vm6 = vcmp.eq.f32.partialorder %v3785_v40, 8.507059e+37  ;;  %v3788_v56 = vor.u32 1.1754944e-38, %v3787_v33  ;;  %v3800_v57 = vand.u32 2147483647, %v7675_v3 }
 0x52d   : > { %v3777_v51 = vmul.f32 %v5495_v54, %v7669_v10  ;;  %vm3782_vm4 = vweird.f32 %v5495_v54  ;;  %v3754_v7 = vsel %vm3753_vm5, %v5491_v2, %v3750_v42  ;;  %v3810_v46 = vadd.f32 %v5493_v20, %v3809_v35  ;;  %vm3813_vm8 = vmor %vm3811_vm13, %vm3812_vm3 }
 0x52e   : > { %vm3796_vm7 = vweird.f32 %v7675_v3  ;;  %v3803_v50 = vor.u32 1.1754944e-38, %v3802_v15  ;;  %v2245_v58 = vadd.f32 %v7646_v30, %v6475_v19  ;;  %v3759_v31 = vsel %vm7678_vm11, %v3758_v27, %v3754_v7  ;;  %vm3783_vm13 = vmor %vm3781_vm0, %vm3782_vm4 }
 0x52f   : > { %v5497_v9 = vpop.eup %5496  ;;  %v3778_v16 = vsub.f32 1.0, %v3777_v51  ;;  %v3860_v59 = vand.u32 2147483647, %v7689_v25  ;;  %v2334_v38 = vadd.f32 %v7648_v12, %v6477_v53  ;;  %4332 = vst [vmem:[%s6529_s18 + $0x1e8] sm:$0xff] %v3759_v31  ;;  %v3814_v61 = vsel %vm3813_vm8, %v5493_v20, %v3810_v46 }
 0x530   : > { %v3792_v4 = vmul.f32 %v5497_v9, %v7675_v3  ;;  %vm3797_vm9 = vweird.f32 %v5497_v9  ;;  %vm3856_vm10 = vweird.f32 %v7689_v25  ;;  %v3862_v30 = vand.u32 2147483648, %v7689_v25 }
 0x531   : > { %v5499_v13 = vpop.eup %5498  ;;  %v3819_v21 = vsel %vm7694_vm12, %v3818_v14, %v3814_v61  ;;  %v3779_v1 = vmul.f32 %v5495_v54, %v3778_v16  ;;  %v4852_v26 = vmul.f32 -1.442695, %v2245_v58  ;;  %v4853_v11 = vmul.f32 -1.442695, %v2334_v38  ;;  %vm3798_vm2 = vmor %vm3796_vm7, %vm3797_vm9 }
 0x532   : > { %4336 = vst.msk [vmem:[%s6529_s18 + $0x208] sm:$0xff] %vm790_vm1, %v3819_v21  ;;  %v3793_v12 = vsub.f32 1.0, %v3792_v4  ;;  %v3852_v29 = vmul.f32 %v5499_v13, %v7689_v25  ;;  %vm3857_vm11 = vweird.f32 %v5499_v13  ;;  %v2425_v47 = vadd.f32 %v7685_v48, %v6472_v39 }
 0x533   : > { %v3780_v63 = vadd.f32 %v5495_v54, %v3779_v1  ;;  %5500 = vpow2.f32 %v4852_v26  ;;  %v2247_v60 = vadd.f32 %v2246_v34, %v6475_v19  ;;  %v2336_v43 = vadd.f32 %v2335_v18, %v6477_v53  ;;  %vm3858_vm14 = vmor %vm3856_vm10, %vm3857_vm11  ;;  %v2429_v34 = vpop.f32.mrf.mxu0  ;;  %v2251_v24 = vpop.f32.mrf.mxu3 }
 0x534   : > { %v3794_v17 = vmul.f32 %v5497_v9, %v3793_v12  ;;  %v3853_v2 = vsub.f32 1.0, %v3852_v29  ;;  %5502 = vpow2.f32 %v4853_v11  ;;  %v4857_v0 = vmul.f32 -1.442695, %v2425_v47 }
 0x535   : > { %v3784_v55 = vsel %vm3783_vm13, %v5495_v54, %v3780_v63  ;;  %v4855_v62 = vmul.f32 -1.442695, %v2247_v60  ;;  %v4856_v22 = vmul.f32 -1.442695, %v2336_v43  ;;  %v2428_v48 = vadd.f32 %v2427_v36, %v6472_v39 }
 0x536   : > { %v3789_v20 = vsel %vm7713_vm6, %v3788_v56, %v3784_v55  ;;  %v3795_v49 = vadd.f32 %v5497_v9, %v3794_v17  ;;  %v3854_v23 = vmul.f32 %v5499_v13, %v3853_v2  ;;  %5504 = vpow2.f32 %v4857_v0  ;;  %v2340_v56 = vpop.f32.mrf.mxu2 }
 0x537   : > { %4334 = vst [vmem:[%s6529_s18 + $0x1f8] sm:$0xff] %v3789_v20  ;;  %5506 = vpow2.f32 %v4855_v62  ;;  %v4860_v10 = vmul.f32 -1.442695, %v2428_v48  ;;  %v2250_v32 = vadd.f32 %v2249_v44, %v6475_v19  ;;  %v2339_v27 = vadd.f32 %v2338_v8, %v6477_v53 }
 0x538   : > { %v3799_v52 = vsel %vm3798_vm2, %v5497_v9, %v3795_v49  ;;  %vm3801_vm12 = vcmp.eq.f32.partialorder %v3800_v57, 8.507059e+37  ;;  %v3855_v28 = vadd.f32 %v5499_v13, %v3854_v23  ;;  %5508 = vpow2.f32 %v4856_v22 }
 0x539   : > { %v5501_v37 = vpop.eup %5500  ;;  %v3804_v40 = vsel %vm3801_vm12, %v3803_v50, %v3799_v52  ;;  %v3863_v33 = vor.u32 1.1754944e-38, %v3862_v30  ;;  %vm3861_vm15 = vcmp.eq.f32.partialorder %v3860_v59, 8.507059e+37  ;;  %v4858_v14 = vmul.f32 -1.442695, %v2250_v32 }
 0x53a   : > { %v5503_v3 = vpop.eup %5502  ;;  %4335 = vst [vmem:[%s6529_s18 + $0x200] sm:$0xff] %v3804_v40  ;;  %v3859_v5 = vsel %vm3858_vm14, %v5499_v13, %v3855_v28  ;;  %v7758_v6 = vadd.f32 1.0, %v5501_v37  ;;  %5510 = vpow2.f32 %v4860_v10  ;;  %v4859_v15 = vmul.f32 -1.442695, %v2339_v27 }
 0x53b   : > { %v3864_v18 = vsel %vm3861_vm15, %v3863_v33, %v3859_v5  ;;  %v7760_v41 = vadd.f32 1.0, %v5503_v3  ;;  %v2430_v45 = vadd.f32 %v2429_v34, %v6472_v39  ;;  %v7780_v16 = vadd.f32 %v2251_v24, %v6475_v19 }
 0x53c   : > { %v5505_v54 = vpop.eup %5504  ;;  %4339 = vst.msk [vmem:[%s6529_s18 + $0x220] sm:$0xff] %vm790_vm1, %v3864_v18  ;;  %5512 = vrcp.f32 %v7758_v6  ;;  %v3830_v57 = vand.u32 2147483647, %v7758_v6  ;;  %v3832_v7 = vand.u32 2147483648, %v7758_v6  ;;  %v7783_v59 = vadd.f32 %v2340_v56, %v6477_v53 }
 0x53d   : > { %v5507_v25 = vpop.eup %5506  ;;  %5514 = vrcp.f32 %v7760_v41  ;;  %v7767_v35 = vadd.f32 1.0, %v5505_v54  ;;  %v3845_v50 = vand.u32 2147483647, %v7760_v41  ;;  %v3847_v58 = vand.u32 2147483648, %v7760_v41 }
 0x53e   : > { %v5509_v42 = vpop.eup %5508  ;;  %v7769_v51 = vadd.f32 1.0, %v5507_v25  ;;  %5516 = vpow2.f32 %v4858_v14  ;;  %v4863_v31 = vmul.f32 -1.442695, %v2430_v45  ;;  %vm3826_vm0 = vweird.f32 %v7758_v6 }
 0x53f   : > { %v7773_v46 = vadd.f32 1.0, %v5509_v42  ;;  %5518 = vpow2.f32 %v4859_v15  ;;  %vm3841_vm3 = vweird.f32 %v7760_v41  ;;  %v3907_v61 = vand.u32 2147483648, %v7767_v35  ;;  %v7834_v15 = vpop.f32.mrf.mxu0 }
 0x540   : > { %5520 = vrcp.f32 %v7767_v35  ;;  %v5511_v9 = vpop.eup %5510  ;;  %vm7790_vm5 = vcmp.eq.f32.partialorder %v3830_v57, 8.507059e+37  ;;  %v3833_v13 = vor.u32 1.1754944e-38, %v3832_v7  ;;  %v3905_v21 = vand.u32 2147483647, %v7767_v35 }
 0x541   : > { %5522 = vrcp.f32 %v7769_v51  ;;  %vm7796_vm4 = vcmp.eq.f32.partialorder %v3845_v50, 8.507059e+37  ;;  %v3848_v12 = vor.u32 1.1754944e-38, %v3847_v58  ;;  %v3875_v29 = vand.u32 2147483647, %v7769_v51 }
 0x542   : > { %v5513_v38 = vpop.eup %5512  ;;  %5524 = vrcp.f32 %v7773_v46  ;;  %vm3901_vm6 = vweird.f32 %v7767_v35  ;;  %v3877_v60 = vand.u32 2147483648, %v7769_v51  ;;  %v7803_v43 = vadd.f32 1.0, %v5511_v9 }
 0x543   : > { %v5515_v4 = vpop.eup %5514  ;;  %v3822_v30 = vmul.f32 %v5513_v38, %v7758_v6  ;;  %vm3827_vm7 = vweird.f32 %v5513_v38  ;;  %v3908_v0 = vor.u32 1.1754944e-38, %v3907_v61  ;;  %vm3871_vm9 = vweird.f32 %v7769_v51 }
 0x544   : > { %v5517_v1 = vpop.eup %5516  ;;  %v3837_v26 = vmul.f32 %v5515_v4, %v7760_v41  ;;  %vm3842_vm8 = vweird.f32 %v5515_v4  ;;  %vm7807_vm10 = vcmp.eq.f32.partialorder %v3905_v21, 8.507059e+37  ;;  %vm3886_vm11 = vweird.f32 %v7773_v46  ;;  %vm3828_vm2 = vmor %vm3826_vm0, %vm3827_vm7 }
 0x545   : > { %v5519_v47 = vpop.eup %5518  ;;  %v3823_v63 = vsub.f32 1.0, %v3822_v30  ;;  %5526 = vrcp.f32 %v7803_v43  ;;  %v7813_v22 = vadd.f32 1.0, %v5517_v1  ;;  %vm7816_vm13 = vcmp.eq.f32.partialorder %v3875_v29, 8.507059e+37  ;;  %vm3843_vm14 = vmor %vm3841_vm3, %vm3842_vm8 }
 0x546   : > { %v5521_v17 = vpop.eup %5520  ;;  %v3838_v2 = vsub.f32 1.0, %v3837_v26  ;;  %v3890_v10 = vand.u32 2147483647, %v7773_v46  ;;  %v3892_v32 = vand.u32 2147483648, %v7773_v46  ;;  %5528 = vpow2.f32 %v4863_v31  ;;  %v2254_v31 = vpop.f32.mrf.mxu3 }
 0x547   : > { %v5523_v44 = vpop.eup %5522  ;;  %v3824_v8 = vmul.f32 %v5513_v38, %v3823_v63  ;;  %v3897_v55 = vmul.f32 %v5521_v17, %v7767_v35  ;;  %vm3902_vm12 = vweird.f32 %v5521_v17  ;;  %v7826_v33 = vadd.f32 1.0, %v5519_v47  ;;  %v2434_v62 = vpop.f32.mrf.mxu0 }
 0x548   : > { %v5525_v48 = vpop.eup %5524  ;;  %v3839_v20 = vmul.f32 %v5515_v4, %v3838_v2  ;;  %v3867_v49 = vmul.f32 %v5523_v44, %v7769_v51  ;;  %5530 = vrcp.f32 %v7813_v22  ;;  %vm3872_vm15 = vweird.f32 %v5523_v44  ;;  %vm3903_vm3 = vmor %vm3901_vm6, %vm3902_vm12  ;;  %v2343_v2 = vpop.f32.mrf.mxu2 }
 0x549   : > { %v3825_v27 = vadd.f32 %v5513_v38, %v3824_v8  ;;  %v3898_v52 = vsub.f32 1.0, %v3897_v55  ;;  %v3882_v28 = vmul.f32 %v5525_v48, %v7773_v46  ;;  %vm3887_vm0 = vweird.f32 %v5525_v48 }
 0x54a   : > { %v3840_v37 = vadd.f32 %v5515_v4, %v3839_v20  ;;  %v3868_v40 = vsub.f32 1.0, %v3867_v49  ;;  %v3878_v24 = vor.u32 1.1754944e-38, %v3877_v60  ;;  %v3893_v9 = vor.u32 1.1754944e-38, %v3892_v32  ;;  %vm3888_vm6 = vmor %vm3886_vm11, %vm3887_vm0 }
 0x54b   : > { %v3829_v3 = vsel %vm3828_vm2, %v5513_v38, %v3825_v27  ;;  %v3899_v5 = vmul.f32 %v5521_v17, %v3898_v52  ;;  %v3883_v14 = vsub.f32 1.0, %v3882_v28  ;;  %v5527_v54 = vpop.eup %5526  ;;  %v3950_v35 = vand.u32 2147483647, %v7803_v43 }
 0x54c   : > { %v3834_v6 = vsel %vm7790_vm5, %v3833_v13, %v3829_v3  ;;  %v3844_v34 = vsel %vm3843_vm14, %v5515_v4, %v3840_v37  ;;  %v3869_v18 = vmul.f32 %v5523_v44, %v3868_v40  ;;  %vm7843_vm5 = vcmp.eq.f32.partialorder %v3890_v10, 8.507059e+37  ;;  %v5529_v7 = vpop.eup %5528 }
 0x54d   : > { %4337 = vst [vmem:[%s6529_s18 + $0x210] sm:$0xff] %v3834_v6  ;;  %v3849_v25 = vsel %vm7796_vm4, %v3848_v12, %v3844_v34  ;;  %v3900_v41 = vadd.f32 %v5521_v17, %v3899_v5  ;;  %v3884_v45 = vmul.f32 %v5525_v48, %v3883_v14  ;;  %v3942_v57 = vmul.f32 %v5527_v54, %v7803_v43  ;;  %vm3873_vm4 = vmor %vm3871_vm9, %vm3872_vm15 }
 0x54e   : > { %4338 = vst [vmem:[%s6529_s18 + $0x218] sm:$0xff] %v3849_v25  ;;  %v3870_v42 = vadd.f32 %v5523_v44, %v3869_v18  ;;  %5532 = vrcp.f32 %v7826_v33  ;;  %v5531_v51 = vpop.eup %5530  ;;  %v3952_v13 = vand.u32 2147483648, %v7803_v43  ;;  %v3920_v21 = vand.u32 2147483647, %v7813_v22  ;;  %v2256_v28 = vpop.f32.mrf.mxu3 }
 0x54f   : > { %v3904_v50 = vsel %vm3903_vm3, %v5521_v17, %v3900_v41  ;;  %v3885_v58 = vadd.f32 %v5525_v48, %v3884_v45  ;;  %v3943_v4 = vsub.f32 1.0, %v3942_v57  ;;  %vm3947_vm7 = vweird.f32 %v5527_v54 }
 0x550   : > { %v3909_v38 = vsel %vm7807_vm10, %v3908_v0, %v3904_v50  ;;  %v3874_v61 = vsel %vm3873_vm4, %v5523_v44, %v3870_v42  ;;  %v3912_v26 = vmul.f32 %v5531_v51, %v7813_v22  ;;  %vm3946_vm8 = vweird.f32 %v7803_v43 }
 0x551   : > { %4342 = vst.msk [vmem:[%s6529_s18 + $0x238] sm:$0xff] %vm790_vm1, %v3909_v38  ;;  %v3879_v30 = vsel %vm7816_vm13, %v3878_v24, %v3874_v61  ;;  %v3889_v36 = vsel %vm3888_vm6, %v5525_v48, %v3885_v58  ;;  %v3944_v46 = vmul.f32 %v5527_v54, %v3943_v4  ;;  %vm7870_vm9 = vcmp.eq.f32.partialorder %v3950_v35, 8.507059e+37  ;;  %vm3948_vm10 = vmor %vm3946_vm8, %vm3947_vm7  ;;  %v2345_v58 = vpop.f32.mrf.mxu2  ;;  %v2437_v61 = vpop.f32.mrf.mxu0 }
 0x552   : > { %4340 = vst [vmem:[%s6529_s18 + $0x228] sm:$0xff] %v3879_v30  ;;  %v3894_v1 = vsel %vm7843_vm5, %v3893_v9, %v3889_v36  ;;  %v3922_v12 = vand.u32 2147483648, %v7813_v22  ;;  %v7875_v29 = vadd.f32 1.0, %v5529_v7  ;;  %v3913_v63 = vsub.f32 1.0, %v3912_v26 }
 0x553   : > { %4341 = vst [vmem:[%s6529_s18 + $0x230] sm:$0xff] %v3894_v1  ;;  %v3945_v47 = vadd.f32 %v5527_v54, %v3944_v46  ;;  %v4861_v60 = vmul.f32 -1.442695, %v7780_v16  ;;  %v4862_v17 = vmul.f32 -1.442695, %v7783_v59  ;;  %v3953_v0 = vor.u32 1.1754944e-38, %v3952_v13 }
 0x554   : > { %vm3916_vm11 = vweird.f32 %v7813_v22  ;;  %vm7880_vm13 = vcmp.eq.f32.partialorder %v3920_v21, 8.507059e+37  ;;  %5534 = vrcp.f32 %v7875_v29  ;;  %v5533_v44 = vpop.eup %5532  ;;  %v3914_v55 = vmul.f32 %v5531_v51, %v3913_v63 }
 0x555   : > { %v3949_v8 = vsel %vm3948_vm10, %v5527_v54, %v3945_v47  ;;  %vm3917_vm2 = vweird.f32 %v5531_v51  ;;  %v3935_v16 = vand.u32 2147483647, %v7826_v33  ;;  %v3923_v48 = vor.u32 1.1754944e-38, %v3922_v12 }
 0x556   : > { %v3954_v59 = vsel %vm7870_vm9, %v3953_v0, %v3949_v8  ;;  %v3927_v20 = vmul.f32 %v5533_v44, %v7826_v33  ;;  %5536 = vpow2.f32 %v4861_v60  ;;  %v3915_v49 = vadd.f32 %v5531_v51, %v3914_v55  ;;  %vm3918_vm14 = vmor %vm3916_vm11, %vm3917_vm2  ;;  %v2259_v46 = vpop.f32.mrf.mxu3 }
 0x557   : > { %4345 = vst.msk [vmem:[%s6529_s18 + $0x250] sm:$0xff] %vm790_vm1, %v3954_v59  ;;  %vm3931_vm12 = vweird.f32 %v7826_v33  ;;  %v3937_v23 = vand.u32 2147483648, %v7826_v33  ;;  %5538 = vpow2.f32 %v4862_v17  ;;  %v2433_v32 = vadd.f32 %v7834_v15, %v6472_v39 }
 0x558   : > { %v3928_v10 = vsub.f32 1.0, %v3927_v20  ;;  %v2255_v27 = vadd.f32 %v2254_v31, %v6475_v19  ;;  %v2344_v52 = vadd.f32 %v2343_v2, %v6477_v53  ;;  %v3919_v37 = vsel %vm3918_vm14, %v5531_v51, %v3915_v49 }
 0x559   : > { %vm3932_vm15 = vweird.f32 %v5533_v44  ;;  %vm7899_vm0 = vcmp.eq.f32.partialorder %v3935_v16, 8.507059e+37  ;;  %v2435_v3 = vadd.f32 %v2434_v62, %v6472_v39  ;;  %v3924_v5 = vsel %vm7880_vm13, %v3923_v48, %v3919_v37 }
 0x55a   : > { %v5535_v22 = vpop.eup %5534  ;;  %v3929_v14 = vmul.f32 %v5533_v44, %v3928_v10  ;;  %v4866_v6 = vmul.f32 -1.442695, %v2433_v32  ;;  %v4864_v34 = vmul.f32 -1.442695, %v2255_v27  ;;  %4343 = vst [vmem:[%s6529_s18 + $0x240] sm:$0xff] %v3924_v5  ;;  %v3938_v18 = vor.u32 1.1754944e-38, %v3937_v23  ;;  %vm3933_vm3 = vmor %vm3931_vm12, %vm3932_vm15 }
 0x55b   : > { %v3987_v15 = vmul.f32 %v5535_v22, %v7875_v29  ;;  %v4865_v54 = vmul.f32 -1.442695, %v2344_v52  ;;  %v2257_v25 = vadd.f32 %v2256_v28, %v6475_v19  ;;  %v3995_v42 = vand.u32 2147483647, %v7875_v29 }
 0x55c   : > { %v5537_v41 = vpop.eup %5536  ;;  %v3930_v45 = vadd.f32 %v5533_v44, %v3929_v14  ;;  %v3997_v24 = vand.u32 2147483648, %v7875_v29  ;;  %5540 = vpow2.f32 %v4866_v6  ;;  %v4869_v50 = vmul.f32 -1.442695, %v2435_v3 }
 0x55d   : > { %v5539_v56 = vpop.eup %5538  ;;  %v3988_v57 = vsub.f32 1.0, %v3987_v15  ;;  %v7914_v7 = vadd.f32 1.0, %v5537_v41  ;;  %5542 = vpow2.f32 %v4864_v34  ;;  %vm3992_vm5 = vweird.f32 %v5535_v22 }
 0x55e   : > { %v3934_v9 = vsel %vm3933_vm3, %v5533_v44, %v3930_v45  ;;  %v7916_v35 = vadd.f32 1.0, %v5539_v56  ;;  %5544 = vpow2.f32 %v4865_v54  ;;  %v4867_v33 = vmul.f32 -1.442695, %v2257_v25 }
 0x55f   : > { %v3939_v31 = vsel %vm7899_vm0, %v3938_v18, %v3934_v9  ;;  %v3989_v38 = vmul.f32 %v5535_v22, %v3988_v57  ;;  %5546 = vrcp.f32 %v7914_v7  ;;  %v2346_v4 = vadd.f32 %v2345_v58, %v6477_v53 }
 0x560   : > { %4344 = vst [vmem:[%s6529_s18 + $0x248] sm:$0xff] %v3939_v31  ;;  %5548 = vrcp.f32 %v7916_v35  ;;  %vm3991_vm4 = vweird.f32 %v7875_v29  ;;  %vm3996_vm6 = vcmp.eq.f32.partialorder %v3995_v42, 8.507059e+37  ;;  %v3998_v36 = vor.u32 1.1754944e-38, %v3997_v24 }
 0x561   : > { %v3990_v51 = vadd.f32 %v5535_v22, %v3989_v38  ;;  %5550 = vpow2.f32 %v4869_v50  ;;  %vm3993_vm7 = vmor %vm3991_vm4, %vm3992_vm5  ;;  %v3965_v13 = vand.u32 2147483647, %v7914_v7  ;;  %v3967_v21 = vand.u32 2147483648, %v7914_v7 }
 0x562   : > { %v5541_v30 = vpop.eup %5540  ;;  %v2438_v1 = vadd.f32 %v2437_v61, %v6472_v39  ;;  %v3980_v12 = vand.u32 2147483647, %v7916_v35  ;;  %5552 = vpow2.f32 %v4867_v33  ;;  %v3982_v60 = vand.u32 2147483648, %v7916_v35 }
 0x563   : > { %v5543_v26 = vpop.eup %5542  ;;  %v3994_v11 = vsel %vm3993_vm7, %v5535_v22, %v3990_v51  ;;  %v7930_v47 = vadd.f32 1.0, %v5541_v30  ;;  %v4868_v2 = vmul.f32 -1.442695, %v2346_v4  ;;  %vm3961_vm8 = vweird.f32 %v7914_v7 }
 0x564   : > { %v5545_v29 = vpop.eup %5544  ;;  %v3999_v63 = vsel %vm3996_vm6, %v3998_v36, %v3994_v11  ;;  %v7933_v17 = vadd.f32 1.0, %v5543_v26  ;;  %vm3976_vm9 = vweird.f32 %v7916_v35  ;;  %v2260_v43 = vadd.f32 %v2259_v46, %v6475_v19 }
 0x565   : > { %v5547_v0 = vpop.eup %5546  ;;  %4348 = vst.msk [vmem:[%s6529_s18 + $0x268] sm:$0xff] %vm790_vm1, %v3999_v63  ;;  %5554 = vrcp.f32 %v7930_v47  ;;  %vm7942_vm10 = vcmp.eq.f32.partialorder %v3965_v13, 8.507059e+37  ;;  %v3968_v16 = vor.u32 1.1754944e-38, %v3967_v21  ;;  %vm7948_vm11 = vcmp.eq.f32.partialorder %v3980_v12, 8.507059e+37 }
 0x566   : > { %v5549_v44 = vpop.eup %5548  ;;  %v3957_v8 = vmul.f32 %v5547_v0, %v7914_v7  ;;  %5556 = vrcp.f32 %v7933_v17  ;;  %v4042_v20 = vand.u32 2147483648, %v7930_v47  ;;  %v4872_v49 = vmul.f32 -1.442695, %v2438_v1  ;;  %v2348_v1 = vpop.f32.mrf.mxu2 }
 0x567   : > { %v5551_v62 = vpop.eup %5550  ;;  %v3972_v59 = vmul.f32 %v5549_v44, %v7916_v35  ;;  %v3983_v10 = vor.u32 1.1754944e-38, %v3982_v60  ;;  %v4040_v32 = vand.u32 2147483647, %v7930_v47  ;;  %v7954_v27 = vadd.f32 1.0, %v5545_v29  ;;  %v2439_v29 = vpop.f32.mrf.mxu0 }
 0x568   : > { %v3958_v23 = vsub.f32 1.0, %v3957_v8  ;;  %v5553_v52 = vpop.eup %5552  ;;  %v7956_v37 = vadd.f32 1.0, %v5551_v62  ;;  %5558 = vpow2.f32 %v4868_v2  ;;  %v7958_v40 = vmul.f32 -1.442695, %v2260_v43 }
 0x569   : > { %v3973_v28 = vsub.f32 1.0, %v3972_v59  ;;  %vm3962_vm13 = vweird.f32 %v5547_v0  ;;  %vm4036_vm2 = vweird.f32 %v7930_v47  ;;  %5560 = vrcp.f32 %v7954_v27 }
 0x56a   : > { %v3959_v3 = vmul.f32 %v5547_v0, %v3958_v23  ;;  %vm3977_vm12 = vweird.f32 %v5549_v44  ;;  %v4043_v14 = vor.u32 1.1754944e-38, %v4042_v20  ;;  %vm4006_vm14 = vweird.f32 %v7933_v17  ;;  %vm3963_vm0 = vmor %vm3961_vm8, %vm3962_vm13  ;;  %v2261_v20 = vpop.f32.mrf.mxu3 }
 0x56b   : > { %v5555_v22 = vpop.eup %5554  ;;  %v3974_v5 = vmul.f32 %v5549_v44, %v3973_v28  ;;  %vm7964_vm15 = vcmp.eq.f32.partialorder %v4040_v32, 8.507059e+37  ;;  %5562 = vrcp.f32 %v7956_v37  ;;  %v7969_v54 = vadd.f32 1.0, %v5553_v52  ;;  %vm3978_vm3 = vmor %vm3976_vm9, %vm3977_vm12 }
 0x56c   : > { %v5557_v6 = vpop.eup %5556  ;;  %v3960_v34 = vadd.f32 %v5547_v0, %v3959_v3  ;;  %v4032_v18 = vmul.f32 %v5555_v22, %v7930_v47  ;;  %v4010_v45 = vand.u32 2147483647, %v7933_v17  ;;  %v4012_v42 = vand.u32 2147483648, %v7933_v17 }
 0x56d   : > { %v3975_v25 = vadd.f32 %v5549_v44, %v3974_v5  ;;  %v4002_v41 = vmul.f32 %v5557_v6, %v7933_v17  ;;  %v4025_v57 = vand.u32 2147483647, %v7954_v27  ;;  %5564 = vpow2.f32 %v4872_v49 }
 0x56e   : > { %v3964_v24 = vsel %vm3963_vm0, %v5547_v0, %v3960_v34  ;;  %v4033_v56 = vsub.f32 1.0, %v4032_v18  ;;  %v5559_v7 = vpop.eup %5558  ;;  %v4027_v31 = vand.u32 2147483648, %v7954_v27  ;;  %vm4037_vm5 = vweird.f32 %v5555_v22  ;;  %v2350_v15 = vpop.f32.mrf.mxu2 }
 0x56f   : > { %v3969_v50 = vsel %vm7942_vm10, %v3968_v16, %v3964_v24  ;;  %v3979_v58 = vsel %vm3978_vm3, %v5549_v44, %v3975_v25  ;;  %v4003_v9 = vsub.f32 1.0, %v4002_v41  ;;  %v5561_v38 = vpop.eup %5560  ;;  %5566 = vrcp.f32 %v7969_v54  ;;  %vm4038_vm9 = vmor %vm4036_vm2, %vm4037_vm5  ;;  %v2442_v24 = vpop.f32.mrf.mxu0 }
 0x570   : > { %4346 = vst [vmem:[%s6529_s18 + $0x258] sm:$0xff] %v3969_v50  ;;  %v3984_v33 = vsel %vm7948_vm11, %v3983_v10, %v3979_v58  ;;  %v4034_v35 = vmul.f32 %v5555_v22, %v4033_v56  ;;  %vm4007_vm4 = vweird.f32 %v5557_v6  ;;  %vm7988_vm6 = vcmp.eq.f32.partialorder %v4010_v45, 8.507059e+37 }
 0x571   : > { %4347 = vst [vmem:[%s6529_s18 + $0x260] sm:$0xff] %v3984_v33  ;;  %v4004_v61 = vmul.f32 %v5557_v6, %v4003_v9  ;;  %v4017_v51 = vmul.f32 %v5561_v38, %v7954_v27  ;;  %v5563_v30 = vpop.eup %5562  ;;  %v4013_v13 = vor.u32 1.1754944e-38, %v4012_v42  ;;  %vm4021_vm7 = vweird.f32 %v7954_v27  ;;  %vm4008_vm10 = vmor %vm4006_vm14, %vm4007_vm4 }
 0x572   : > { %v4035_v36 = vadd.f32 %v5555_v22, %v4034_v35  ;;  %vm7994_vm8 = vcmp.eq.f32.partialorder %v4025_v57, 8.507059e+37  ;;  %v4028_v11 = vor.u32 1.1754944e-38, %v4027_v31  ;;  %v4077_v12 = vmul.f32 %v5563_v30, %v7956_v37 }
 0x573   : > { %v4005_v46 = vadd.f32 %v5557_v6, %v4004_v61  ;;  %v4018_v26 = vsub.f32 1.0, %v4017_v51  ;;  %v5565_v63 = vpop.eup %5564  ;;  %vm4022_vm11 = vweird.f32 %v5561_v38  ;;  %vm4081_vm13 = vweird.f32 %v7956_v37 }
 0x574   : > { %v4039_v60 = vsel %vm4038_vm9, %v5555_v22, %v4035_v36  ;;  %v8005_v2 = vadd.f32 1.0, %v5559_v7  ;;  %v4078_v44 = vsub.f32 1.0, %v4077_v12  ;;  %v4085_v17 = vand.u32 2147483647, %v7956_v37  ;;  %vm4023_vm12 = vmor %vm4021_vm7, %vm4022_vm11 }
 0x575   : > { %v4044_v47 = vsel %vm7964_vm15, %v4043_v14, %v4039_v60  ;;  %v4009_v0 = vsel %vm4008_vm10, %v5557_v6, %v4005_v46  ;;  %v4019_v43 = vmul.f32 %v5561_v38, %v4018_v26  ;;  %v5567_v8 = vpop.eup %5566  ;;  %v4087_v16 = vand.u32 2147483648, %v7956_v37 }
 0x576   : > { %4351 = vst.msk [vmem:[%s6529_s18 + $0x280] sm:$0xff] %vm790_vm1, %v4044_v47  ;;  %v4014_v55 = vsel %vm7988_vm6, %v4013_v13, %v4009_v0  ;;  %5568 = vrcp.f32 %v8005_v2  ;;  %v4079_v59 = vmul.f32 %v5563_v30, %v4078_v44  ;;  %vm4082_vm2 = vweird.f32 %v5563_v30 }
 0x577   : > { %4349 = vst [vmem:[%s6529_s18 + $0x270] sm:$0xff] %v4014_v55  ;;  %v4020_v62 = vadd.f32 %v5561_v38, %v4019_v43  ;;  %v4047_v48 = vmul.f32 %v5567_v8, %v7969_v54  ;;  %v4055_v49 = vand.u32 2147483647, %v7969_v54  ;;  %v4057_v23 = vand.u32 2147483648, %v7969_v54  ;;  %vm4083_vm14 = vmor %vm4081_vm13, %vm4082_vm2 }
 0x578   : > { %v8023_v10 = vadd.f32 1.0, %v5565_v63  ;;  %5570 = vpow2.f32 %v7958_v40  ;;  %v4080_v52 = vadd.f32 %v5563_v30, %v4079_v59  ;;  %v2349_v3 = vadd.f32 %v2348_v1, %v6477_v53 }
 0x579   : > { %v4024_v32 = vsel %vm4023_vm12, %v5561_v38, %v4020_v62  ;;  %v4048_v28 = vsub.f32 1.0, %v4047_v48  ;;  %vm4086_vm15 = vcmp.eq.f32.partialorder %v4085_v17, 8.507059e+37  ;;  %v4088_v27 = vor.u32 1.1754944e-38, %v4087_v16 }
 0x57a   : > { %v4029_v22 = vsel %vm7994_vm8, %v4028_v11, %v4024_v32  ;;  %5572 = vrcp.f32 %v8023_v10  ;;  %v4084_v5 = vsel %vm4083_vm14, %v5563_v30, %v4080_v52  ;;  %vm4051_vm0 = vweird.f32 %v7969_v54  ;;  %v2264_v30 = vpop.f32.mrf.mxu3 }
 0x57b   : > { %4350 = vst [vmem:[%s6529_s18 + $0x278] sm:$0xff] %v4029_v22  ;;  %v4049_v14 = vmul.f32 %v5567_v8, %v4048_v28  ;;  %vm4052_vm3 = vweird.f32 %v5567_v8  ;;  %v4089_v6 = vsel %vm4086_vm15, %v4088_v27, %v4084_v5  ;;  %vm8034_vm5 = vcmp.eq.f32.partialorder %v4055_v49, 8.507059e+37 }
 0x57c   : > { %v5569_v40 = vpop.eup %5568  ;;  %v4871_v18 = vmul.f32 -1.442695, %v2349_v3  ;;  %v2440_v37 = vadd.f32 %v2439_v29, %v6472_v39  ;;  %4354 = vst.msk [vmem:[%s6529_s18 + $0x298] sm:$0xff] %vm790_vm1, %v4089_v6  ;;  %v4058_v41 = vor.u32 1.1754944e-38, %v4057_v23  ;;  %v4070_v42 = vand.u32 2147483647, %v8005_v2  ;;  %vm4053_vm4 = vmor %vm4051_vm0, %vm4052_vm3 }
 0x57d   : > { %v4050_v25 = vadd.f32 %v5567_v8, %v4049_v14  ;;  %v4062_v45 = vmul.f32 %v5569_v40, %v8005_v2  ;;  %v4072_v57 = vand.u32 2147483648, %v8005_v2  ;;  %v2262_v50 = vadd.f32 %v2261_v20, %v6475_v19 }
 0x57e   : > { %v5571_v56 = vpop.eup %5570  ;;  %5574 = vpow2.f32 %v4871_v18  ;;  %v4875_v7 = vmul.f32 -1.442695, %v2440_v37  ;;  %v2351_v38 = vadd.f32 %v2350_v15, %v6477_v53  ;;  %v2443_v54 = vadd.f32 %v2442_v24, %v6472_v39 }
 0x57f   : > { %v4054_v58 = vsel %vm4053_vm4, %v5567_v8, %v4050_v25  ;;  %v4063_v9 = vsub.f32 1.0, %v4062_v45  ;;  %v8047_v31 = vadd.f32 1.0, %v5571_v56  ;;  %v4873_v61 = vmul.f32 -1.442695, %v2262_v50  ;;  %v2353_v8 = vpop.f32.mrf.mxu2 }
 0x580   : > { %v5573_v33 = vpop.eup %5572  ;;  %v4059_v35 = vsel %vm8034_vm5, %v4058_v41, %v4054_v58  ;;  %5576 = vpow2.f32 %v4875_v7  ;;  %vm4067_vm6 = vweird.f32 %v5569_v40  ;;  %vm4066_vm7 = vweird.f32 %v8005_v2 }
 0x581   : > { %4352 = vst [vmem:[%s6529_s18 + $0x288] sm:$0xff] %v4059_v35  ;;  %v4064_v4 = vmul.f32 %v5569_v40, %v4063_v9  ;;  %v4122_v51 = vmul.f32 %v5573_v33, %v8023_v10  ;;  %5578 = vrcp.f32 %v8047_v31  ;;  %vm8057_vm8 = vcmp.eq.f32.partialorder %v4070_v42, 8.507059e+37  ;;  %vm4068_vm9 = vmor %vm4066_vm7, %vm4067_vm6 }
 0x582   : > { %v4130_v13 = vand.u32 2147483647, %v8023_v10  ;;  %5580 = vpow2.f32 %v4873_v61  ;;  %v4874_v46 = vmul.f32 -1.442695, %v2351_v38  ;;  %v4878_v26 = vmul.f32 -1.442695, %v2443_v54 }
 0x583   : > { %v4065_v21 = vadd.f32 %v5569_v40, %v4064_v4  ;;  %v4123_v1 = vsub.f32 1.0, %v4122_v51  ;;  %v4073_v12 = vor.u32 1.1754944e-38, %v4072_v57  ;;  %vm4127_vm10 = vweird.f32 %v5573_v33 }
 0x584   : > { %v5575_v11 = vpop.eup %5574  ;;  %v4132_v29 = vand.u32 2147483648, %v8023_v10  ;;  %v2265_v63 = vadd.f32 %v2264_v30, %v6475_v19  ;;  %5582 = vpow2.f32 %v4874_v46  ;;  %vm4126_vm11 = vweird.f32 %v8023_v10 }
 0x585   : > { %v4069_v60 = vsel %vm4068_vm9, %v5569_v40, %v4065_v21  ;;  %v4124_v2 = vmul.f32 %v5573_v33, %v4123_v1  ;;  %v8064_v47 = vadd.f32 1.0, %v5575_v11  ;;  %5584 = vpow2.f32 %v4878_v26  ;;  %vm4128_vm2 = vmor %vm4126_vm11, %vm4127_vm10  ;;  %v2444_v21 = vpop.f32.mrf.mxu0 }
 0x586   : > { %v5577_v0 = vpop.eup %5576  ;;  %v4074_v43 = vsel %vm8057_vm8, %v4073_v12, %v4069_v60  ;;  %v4876_v44 = vmul.f32 -1.442695, %v2265_v63  ;;  %vm4131_vm13 = vcmp.eq.f32.partialorder %v4130_v13, 8.507059e+37  ;;  %v4100_v16 = vand.u32 2147483647, %v8047_v31 }
 0x587   : > { %v5579_v55 = vpop.eup %5578  ;;  %4353 = vst [vmem:[%s6529_s18 + $0x290] sm:$0xff] %v4074_v43  ;;  %v4125_v17 = vadd.f32 %v5573_v33, %v4124_v2  ;;  %5586 = vrcp.f32 %v8064_v47  ;;  %v4133_v59 = vor.u32 1.1754944e-38, %v4132_v29  ;;  %v4102_v20 = vand.u32 2147483648, %v8047_v31 }
 0x588   : > { %v5581_v62 = vpop.eup %5580  ;;  %v4092_v48 = vmul.f32 %v5579_v55, %v8047_v31  ;;  %v8075_v49 = vadd.f32 1.0, %v5577_v0  ;;  %5588 = vpow2.f32 %v4876_v44  ;;  %v2354_v32 = vadd.f32 %v2353_v8, %v6477_v53 }
 0x589   : > { %v4129_v23 = vsel %vm4128_vm2, %v5573_v33, %v4125_v17  ;;  %v8077_v10 = vadd.f32 1.0, %v5581_v62  ;;  %v4115_v3 = vand.u32 2147483647, %v8064_v47  ;;  %vm4096_vm12 = vweird.f32 %v8047_v31 }
 0x58a   : > { %v4134_v52 = vsel %vm4131_vm13, %v4133_v59, %v4129_v23  ;;  %v4093_v28 = vsub.f32 1.0, %v4092_v48  ;;  %5590 = vrcp.f32 %v8075_v49  ;;  %v5583_v22 = vpop.eup %5582  ;;  %vm8085_vm14 = vcmp.eq.f32.partialorder %v4100_v16, 8.507059e+37  ;;  %v2266_v48 = vpop.f32.mrf.mxu3 }
 0x58b   : > { %4357 = vst.msk [vmem:[%s6529_s18 + $0x2b0] sm:$0xff] %vm790_vm1, %v4134_v52  ;;  %5592 = vrcp.f32 %v8077_v10  ;;  %v5585_v5 = vpop.eup %5584  ;;  %vm4097_vm15 = vweird.f32 %v5579_v55  ;;  %v4103_v40 = vor.u32 1.1754944e-38, %v4102_v20  ;;  %v4117_v6 = vand.u32 2147483648, %v8064_v47 }
 0x58c   : > { %v4094_v14 = vmul.f32 %v5579_v55, %v4093_v28  ;;  %vm4111_vm0 = vweird.f32 %v8064_v47  ;;  %v8092_v18 = vadd.f32 1.0, %v5583_v22  ;;  %v8094_v37 = vadd.f32 1.0, %v5585_v5  ;;  %vm4098_vm5 = vmor %vm4096_vm12, %vm4097_vm15  ;;  %v2355_v28 = vpop.f32.mrf.mxu2 }
 0x58d   : > { %v5587_v34 = vpop.eup %5586  ;;  %v4877_v15 = vmul.f32 -1.442695, %v2354_v32  ;;  %vm8097_vm3 = vcmp.eq.f32.partialorder %v4115_v3, 8.507059e+37  ;;  %v4175_v42 = vand.u32 2147483647, %v8075_v49  ;;  %v4177_v56 = vand.u32 2147483648, %v8075_v49 }
 0x58e   : > { %v4095_v25 = vadd.f32 %v5579_v55, %v4094_v14  ;;  %v4107_v41 = vmul.f32 %v5587_v34, %v8064_v47  ;;  %v5589_v24 = vpop.eup %5588  ;;  %v4145_v57 = vand.u32 2147483647, %v8077_v10  ;;  %v4147_v7 = vand.u32 2147483648, %v8077_v10 }
 0x58f   : > { %5594 = vrcp.f32 %v8092_v18  ;;  %v4118_v38 = vor.u32 1.1754944e-38, %v4117_v6  ;;  %vm4171_vm4 = vweird.f32 %v8075_v49  ;;  %vm4141_vm6 = vweird.f32 %v8077_v10 }
 0x590   : > { %v5591_v50 = vpop.eup %5590  ;;  %v4099_v58 = vsel %vm4098_vm5, %v5579_v55, %v4095_v25  ;;  %v4108_v9 = vsub.f32 1.0, %v4107_v41  ;;  %5596 = vrcp.f32 %v8094_v37  ;;  %vm4112_vm7 = vweird.f32 %v5587_v34 }
 0x591   : > { %v5593_v33 = vpop.eup %5592  ;;  %v4104_v31 = vsel %vm8085_vm14, %v4103_v40, %v4099_v58  ;;  %v4167_v35 = vmul.f32 %v5591_v50, %v8075_v49  ;;  %vm8115_vm8 = vcmp.eq.f32.partialorder %v4175_v42, 8.507059e+37  ;;  %v4178_v30 = vor.u32 1.1754944e-38, %v4177_v56  ;;  %vm4113_vm10 = vmor %vm4111_vm0, %vm4112_vm7 }
 0x592   : > { %4355 = vst [vmem:[%s6529_s18 + $0x2a0] sm:$0xff] %v4104_v31  ;;  %v4109_v61 = vmul.f32 %v5587_v34, %v4108_v9  ;;  %v4137_v4 = vmul.f32 %v5593_v33, %v8077_v10  ;;  %vm8120_vm9 = vcmp.eq.f32.partialorder %v4145_v57, 8.507059e+37  ;;  %v4148_v13 = vor.u32 1.1754944e-38, %v4147_v7 }
 0x593   : > { %v4168_v51 = vsub.f32 1.0, %v4167_v35  ;;  %v8124_v26 = vadd.f32 1.0, %v5589_v24  ;;  %5598 = vpow2.f32 %v4877_v15  ;;  %vm4172_vm11 = vweird.f32 %v5591_v50 }
 0x594   : > { %v4110_v1 = vadd.f32 %v5587_v34, %v4109_v61  ;;  %v4138_v46 = vsub.f32 1.0, %v4137_v4  ;;  %vm4142_vm13 = vweird.f32 %v5593_v33  ;;  %vm4156_vm2 = vweird.f32 %v8092_v18  ;;  %vm4173_vm12 = vmor %vm4171_vm4, %vm4172_vm11 }
 0x595   : > { %v5595_v11 = vpop.eup %5594  ;;  %v4169_v12 = vmul.f32 %v5591_v50, %v4168_v51  ;;  %v2445_v0 = vadd.f32 %v2444_v21, %v6472_v39  ;;  %v4160_v8 = vand.u32 2147483647, %v8092_v18  ;;  %v4162_v16 = vand.u32 2147483648, %v8092_v18  ;;  %vm4143_vm14 = vmor %vm4141_vm6, %vm4142_vm13 }
 0x596   : > { %v5597_v29 = vpop.eup %5596  ;;  %v4114_v63 = vsel %vm4113_vm10, %v5587_v34, %v4110_v1  ;;  %v4139_v60 = vmul.f32 %v5593_v33, %v4138_v46  ;;  %v4152_v2 = vmul.f32 %v5595_v11, %v8092_v18  ;;  %5600 = vrcp.f32 %v8124_v26 }
 0x597   : > { %v4119_v43 = vsel %vm8097_vm3, %v4118_v38, %v4114_v63  ;;  %v4170_v44 = vadd.f32 %v5591_v50, %v4169_v12  ;;  %v4212_v47 = vmul.f32 %v5597_v29, %v8094_v37  ;;  %vm4157_vm15 = vweird.f32 %v5595_v11 }
 0x598   : > { %4356 = vst [vmem:[%s6529_s18 + $0x2a8] sm:$0xff] %v4119_v43  ;;  %v4140_v55 = vadd.f32 %v5593_v33, %v4139_v60  ;;  %v4153_v17 = vsub.f32 1.0, %v4152_v2  ;;  %v4222_v59 = vand.u32 2147483648, %v8094_v37  ;;  %v4881_v52 = vmul.f32 -1.442695, %v2445_v0  ;;  %vm4158_vm3 = vmor %vm4156_vm2, %vm4157_vm15 }
 0x599   : > { %v4174_v39 = vsel %vm4173_vm12, %v5591_v50, %v4170_v44  ;;  %v4213_v62 = vsub.f32 1.0, %v4212_v47  ;;  %v5599_v20 = vpop.eup %5598  ;;  %vm4217_vm0 = vweird.f32 %v5597_v29  ;;  %v4220_v22 = vand.u32 2147483647, %v8094_v37 }
 0x59a   : > { %v4179_v49 = vsel %vm8115_vm8, %v4178_v30, %v4174_v39  ;;  %v4144_v23 = vsel %vm4143_vm14, %v5593_v33, %v4140_v55  ;;  %v4154_v32 = vmul.f32 %v5595_v11, %v4153_v17  ;;  %v2826_v5 = vadd.f32 1.0, %v5599_v20 }
 0x59b   : > { %4360 = vst.msk [vmem:[%s6529_s18 + $0x2c8] sm:$0xff] %vm790_vm1, %v4179_v49  ;;  %v4149_v10 = vsel %vm8120_vm9, %v4148_v13, %v4144_v23  ;;  %v4214_v3 = vmul.f32 %v5597_v29, %v4213_v62  ;;  %5602 = vpow2.f32 %v4881_v52  ;;  %v2267_v14 = vadd.f32 %v2266_v48, %v6475_v19 }
 0x59c   : > { %4358 = vst [vmem:[%s6529_s18 + $0x2b8] sm:$0xff] %v4149_v10  ;;  %v4155_v27 = vadd.f32 %v5595_v11, %v4154_v32  ;;  %v4163_v40 = vor.u32 1.1754944e-38, %v4162_v16  ;;  %vm4216_vm5 = vweird.f32 %v8094_v37  ;;  %v2356_v34 = vadd.f32 %v2355_v28, %v6477_v53  ;;  %v5601_v15 = vpop.eup %5600 }
 0x59d   : > { %v4215_v6 = vadd.f32 %v5597_v29, %v4214_v3  ;;  %vm4161_vm4 = vcmp.eq.f32.partialorder %v4160_v8, 8.507059e+37  ;;  %vm4218_vm6 = vmor %vm4216_vm5, %vm4217_vm0  ;;  %v4223_v41 = vor.u32 1.1754944e-38, %v4222_v59  ;;  %5604 = vrcp.f32 %v2826_v5 }
 0x59e   : > { %v4159_v25 = vsel %vm4158_vm3, %v5595_v11, %v4155_v27  ;;  %vm4221_vm7 = vcmp.eq.f32.partialorder %v4220_v22, 8.507059e+37  ;;  %v4182_v18 = vmul.f32 %v5601_v15, %v8124_v26  ;;  %v4879_v24 = vmul.f32 -1.442695, %v2267_v14 }
 0x59f   : > { %v4164_v19 = vsel %vm4161_vm4, %v4163_v40, %v4159_v25  ;;  %v4219_v45 = vsel %vm4218_vm6, %v5597_v29, %v4215_v6  ;;  %v4880_v56 = vmul.f32 -1.442695, %v2356_v34  ;;  %v4190_v57 = vand.u32 2147483647, %v8124_v26 }
 0x5a0   : > { %4359 = vst [vmem:[%s6529_s18 + $0x2c0] sm:$0xff] %v4164_v19  ;;  %v4224_v42 = vsel %vm4221_vm7, %v4223_v41, %v4219_v45  ;;  %v4183_v37 = vsub.f32 1.0, %v4182_v18  ;;  %v4192_v7 = vand.u32 2147483648, %v8124_v26  ;;  %5606 = vpow2.f32 %v4879_v24 }
 0x5a1   : > { %4363 = vst.msk [vmem:[%s6529_s18 + $0x2e0] sm:$0xff] %vm790_vm1, %v4224_v42  ;;  %v5603_v53 = vpop.eup %5602  ;;  %vm4187_vm8 = vweird.f32 %v5601_v15  ;;  %5608 = vpow2.f32 %v4880_v56  ;;  %vm4186_vm9 = vweird.f32 %v8124_v26  ;;  %vm4191_vm11 = vcmp.eq.f32.partialorder %v4190_v57, 8.507059e+37 }
 0x5a2   : > { %v4184_v50 = vmul.f32 %v5601_v15, %v4183_v37  ;;  %v2830_v58 = vadd.f32 1.0, %v5603_v53  ;;  %vm4188_vm10 = vmor %vm4186_vm9, %vm4187_vm8  ;;  %v4193_v31 = vor.u32 1.1754944e-38, %v4192_v7  ;;  %v4207_v51 = vand.u32 2147483648, %v2826_v5 }
 0x5a3   : > { %v5605_v9 = vpop.eup %5604  ;;  %v4205_v13 = vand.u32 2147483647, %v2826_v5  ;;  %vm4201_vm2 = vweird.f32 %v2826_v5 }
 0x5a4   : > { %v4185_v38 = vadd.f32 %v5601_v15, %v4184_v50  ;;  %v4197_v33 = vmul.f32 %v5605_v9, %v2826_v5  ;;  %5610 = vrcp.f32 %v2830_v58  ;;  %vm4202_vm13 = vweird.f32 %v5605_v9 }
 0x5a5   : > { %vm4203_vm12 = vmor %vm4201_vm2, %vm4202_vm13  ;;  %v4208_v11 = vor.u32 1.1754944e-38, %v4207_v51  ;;  %vm4206_vm14 = vcmp.eq.f32.partialorder %v4205_v13, 8.507059e+37  ;;  %v4267_v2 = vand.u32 2147483648, %v2830_v58  ;;  %v4265_v43 = vand.u32 2147483647, %v2830_v58 }
 0x5a6   : > { %v4189_v35 = vsel %vm4188_vm10, %v5601_v15, %v4185_v38  ;;  %v4198_v61 = vsub.f32 1.0, %v4197_v33  ;;  %v5607_v54 = vpop.eup %5606  ;;  %vm4261_vm0 = vweird.f32 %v2830_v58 }
 0x5a7   : > { %v4194_v4 = vsel %vm4191_vm11, %v4193_v31, %v4189_v35  ;;  %v5609_v30 = vpop.eup %5608  ;;  %v2828_v21 = vadd.f32 1.0, %v5607_v54  ;;  %v4268_v17 = vor.u32 1.1754944e-38, %v4267_v2  ;;  %vm4266_vm5 = vcmp.eq.f32.partialorder %v4265_v43, 8.507059e+37 }
 0x5a8   : > { %4361 = vst [vmem:[%s6529_s18 + $0x2d0] sm:$0xff] %v4194_v4  ;;  %v4199_v36 = vmul.f32 %v5605_v9, %v4198_v61  ;;  %v2829_v1 = vadd.f32 1.0, %v5609_v30 }
 0x5a9   : > { %5612 = vrcp.f32 %v2828_v21  ;;  %v4237_v48 = vand.u32 2147483648, %v2828_v21  ;;  %v4235_v23 = vand.u32 2147483647, %v2828_v21  ;;  %vm4231_vm7 = vweird.f32 %v2828_v21 }
 0x5aa   : > { %v5611_v46 = vpop.eup %5610  ;;  %v4200_v26 = vadd.f32 %v5605_v9, %v4199_v36  ;;  %5614 = vrcp.f32 %v2829_v1  ;;  %v4252_v32 = vand.u32 2147483648, %v2829_v1  ;;  %v4250_v28 = vand.u32 2147483647, %v2829_v1 }
 0x5ab   : > { %v4257_v12 = vmul.f32 %v5611_v46, %v2830_v58  ;;  %vm4262_vm15 = vweird.f32 %v5611_v46  ;;  %v4238_v3 = vor.u32 1.1754944e-38, %v4237_v48  ;;  %vm4246_vm9 = vweird.f32 %v2829_v1 }
 0x5ac   : > { %v4204_v29 = vsel %vm4203_vm12, %v5605_v9, %v4200_v26  ;;  %vm4263_vm3 = vmor %vm4261_vm0, %vm4262_vm15  ;;  %vm4236_vm10 = vcmp.eq.f32.partialorder %v4235_v23, 8.507059e+37  ;;  %v4253_v5 = vor.u32 1.1754944e-38, %v4252_v32 }
 0x5ad   : > { %v4209_v63 = vsel %vm4206_vm14, %v4208_v11, %v4204_v29  ;;  %v4258_v60 = vsub.f32 1.0, %v4257_v12 }
 0x5ae   : > { %4362 = vst [vmem:[%s6529_s18 + $0x2d8] sm:$0xff] %v4209_v63 }
 0x5af   : > { %v4259_v0 = vmul.f32 %v5611_v46, %v4258_v60  ;;  %v5613_v44 = vpop.eup %5612 }
 0x5b0   : > { %v5615_v8 = vpop.eup %5614  ;;  %v4227_v55 = vmul.f32 %v5613_v44, %v2828_v21  ;;  %vm4232_vm4 = vweird.f32 %v5613_v44 }
 0x5b1   : > { %v4260_v47 = vadd.f32 %v5611_v46, %v4259_v0  ;;  %v4242_v16 = vmul.f32 %v5615_v8, %v2829_v1  ;;  %vm4247_vm6 = vweird.f32 %v5615_v8  ;;  %vm4233_vm8 = vmor %vm4231_vm7, %vm4232_vm4 }
 0x5b2   : > { %v4228_v62 = vsub.f32 1.0, %v4227_v55  ;;  %vm4248_vm11 = vmor %vm4246_vm9, %vm4247_vm6 }
 0x5b3   : > { %v4264_v39 = vsel %vm4263_vm3, %v5611_v46, %v4260_v47  ;;  %v4243_v20 = vsub.f32 1.0, %v4242_v16 }
 0x5b4   : > { %v4269_v59 = vsel %vm4266_vm5, %v4268_v17, %v4264_v39  ;;  %v4229_v49 = vmul.f32 %v5613_v44, %v4228_v62 }
 0x5b5   : > { %4366 = vst.msk [vmem:[%s6529_s18 + $0x2f8] sm:$0xff] %vm790_vm1, %v4269_v59  ;;  %v4244_v52 = vmul.f32 %v5615_v8, %v4243_v20  ;;  %vm4251_vm1 = vcmp.eq.f32.partialorder %v4250_v28, 8.507059e+37 }
 0x5b6   : > { %v4230_v10 = vadd.f32 %v5613_v44, %v4229_v49 }
 0x5b7   : > { %v4245_v22 = vadd.f32 %v5615_v8, %v4244_v52 }
 0x5b8   : > { %v4234_v27 = vsel %vm4233_vm8, %v5613_v44, %v4230_v10 }
 0x5b9   : > { %v4239_v14 = vsel %vm4236_vm10, %v4238_v3, %v4234_v27  ;;  %v4249_v40 = vsel %vm4248_vm11, %v5615_v8, %v4245_v22 }
 0x5ba   : > { %4364 = vst [vmem:[%s6529_s18 + $0x2e8] sm:$0xff] %v4239_v14  ;;  %v4254_v6 = vsel %vm4251_vm1, %v4253_v5, %v4249_v40 }
 0x5bb   : > { %4365 = vst [vmem:[%s6529_s18 + $0x2f0] sm:$0xff] %v4254_v6 }
 0x5bc PF: > { %s25_s29 = sadd.s32 1, %s5623_s29  }
 0x5bd   : > { %p22_p4 = scmp.ge.s32.totalorder %s25_s29, 4  }
 0x5bf   :  { %24 = sbr.rel (!%p22_p4) target bundleno = 1 (0x1), region = 114 }

</bundles_post_ra>
